<compile_context>
chip_gen: v5e
topology: v5e:2x2
jax: 0.10.0
libtpu: 0.0.40
codegen_flags: <defaults>
</compile_context>

<pallas_src>
import functools

import numpy as np
import jax
import jax.numpy as jnp
from jax import lax
from jax.experimental import pallas as pl
from jax.experimental.pallas import tpu as pltpu

NEG_INF = -1e30


# ----------------------------------------------------------------------------
# Kernel
# ----------------------------------------------------------------------------
def segnn_kernel(first_ref, cnt_ref,            # SMEM prefetch: per-row-tile edge-tile window
                 dst_ref,                       # (1, TE) i32: dst node id per edge
                 ent_ref,                       # (TN, D) f32: entity rows of this row tile
                 srch_ref, relh_ref,            # (TE, D) bf16: per-edge gathered features
                 we_ref, wn_ref, wc_ref,        # (D, D) bf16: layer weights (VMEM resident)
                 ent_out_ref,                   # (TN, D) f32 output
                 m_ref, l_ref, acc_ref):        # scratch (3,TN,1),(3,TN,1),(3,TN,D) f32
    ni = pl.program_id(0)
    ei = pl.program_id(1)
    n_e = pl.num_programs(1)
    tn = ent_ref.shape[0]
    te = srch_ref.shape[0]

    @pl.when(ei == 0)
    def _init():
        m_ref[...] = jnp.full(m_ref.shape, NEG_INF, jnp.float32)
        l_ref[...] = jnp.zeros(l_ref.shape, jnp.float32)
        acc_ref[...] = jnp.zeros(acc_ref.shape, jnp.float32)

    # Only the first cnt[ni] steps along the edge axis carry work; the clamped
    # tail repeats the last window tile (no re-DMA) and is skipped here.
    @pl.when(ei < cnt_ref[ni])
    def _accumulate():
        srch = srch_ref[...]                               # (TE, D) bf16
        relh = relh_ref[...]                               # (TE, D) bf16
        comph = srch * relh                                # CompLayer msg (comp_op='mul')
        ent_bf = ent_ref[...].astype(jnp.bfloat16)         # (TN, D)
        dst_ids = dst_ref[...]                             # (1, TE)
        row_ids = ni * tn + lax.broadcasted_iota(jnp.int32, (tn, te), 0)
        valid = row_ids == dst_ids                         # (TN, TE) incidence mask

        def update(layer, msg):
            # e_dot_v logits on the MXU: the destination row of every valid
            # edge is resident in ent_ref, so ent_tile @ msg^T gives the score
            # at (dst_row, edge); invalid entries are masked.
            logit = lax.dot_general(ent_bf, msg, (((1,), (1,)), ((), ())),
                                    preferred_element_type=jnp.float32)   # (TN, TE)
            m_prev = m_ref[layer]                                         # (TN, 1)
            row_max = jnp.max(jnp.where(valid, logit, NEG_INF),
                              axis=-1, keepdims=True)
            m_new = jnp.maximum(m_prev, row_max)
            scale = jnp.exp(m_prev - m_new)                               # (TN, 1)
            # Exactly one valid row per edge column -> masked sublane reduce
            # extracts the per-edge exp argument; exp only on (1, TE).
            arg_e = jnp.sum(jnp.where(valid, logit - m_new, 0.0),
                            axis=0, keepdims=True)                        # (1, TE)
            p = jnp.where(valid, jnp.exp(arg_e), 0.0)                     # (TN, TE)
            l_ref[layer] = scale * l_ref[layer] + jnp.sum(p, axis=-1, keepdims=True)
            acc_ref[layer] = scale * acc_ref[layer] + jnp.dot(
                p.astype(jnp.bfloat16), msg, preferred_element_type=jnp.float32)
            m_ref[layer] = m_new

        update(0, relh)     # EdgeLayer
        update(1, srch)     # NodeLayer
        update(2, comph)    # CompLayer

    @pl.when(ei == n_e - 1)
    def _finalize():
        out = ent_ref[...]
        for layer, w_ref in ((0, we_ref), (1, wn_ref), (2, wc_ref)):
            # Exact reciprocal: finalize runs once per row tile (cold path).
            inv_l = pl.reciprocal(jnp.maximum(l_ref[layer], 1e-30))
            neigh = (acc_ref[layer] * inv_l).astype(jnp.bfloat16)
            out = out + jnp.tanh(jnp.dot(neigh, w_ref[...],
                                         preferred_element_type=jnp.float32))
        ent_out_ref[...] = out.astype(ent_out_ref.dtype)


# ----------------------------------------------------------------------------
# Device-side wrapper (jitted)
# ----------------------------------------------------------------------------
@functools.partial(jax.jit, static_argnames=("tn", "te", "max_tiles"))
def _segnn_forward_impl(ent_emb, rel_emb, src_p, dst_p, typ_p, first, count,
                        w_edge, w_node, w_comp, rel_w, *, tn, te, max_tiles):
    N, D = ent_emb.shape
    n_tiles = first.shape[0]
    n_pad = n_tiles * tn

    ent_p = jnp.pad(ent_emb, ((0, n_pad - N), (0, 0)))
    # bf16 edge-feature gathers: halves HBM traffic of the dominant streams.
    ent_bf = ent_p.astype(jnp.bfloat16)
    src_h = ent_bf[src_p]                                  # (E_pad, D) bf16
    rel_h = rel_emb.astype(jnp.bfloat16)[typ_p]            # (E_pad, D) bf16
    dst_ids = dst_p.reshape(1, -1)                         # (1, E_pad) i32

    we = w_edge.astype(jnp.bfloat16)
    wn = w_node.astype(jnp.bfloat16)
    wc = w_comp.astype(jnp.bfloat16)

    # Data-dependent edge-tile indexing: row tile n only touches edge tiles
    # [first[n], first[n]+count[n]); past the window the index clamps to the
    # last window tile so Pallas skips the re-DMA.
    def _edge_tile(n, e, first_ref, cnt_ref):
        last = first_ref[n] + jnp.maximum(cnt_ref[n] - 1, 0)
        return jnp.minimum(first_ref[n] + e, last)

    def dst_map(n, e, first_ref, cnt_ref):
        return (0, _edge_tile(n, e, first_ref, cnt_ref))

    def edge_map(n, e, first_ref, cnt_ref):
        return (_edge_tile(n, e, first_ref, cnt_ref), 0)

    def row_map(n, e, first_ref, cnt_ref):
        return (n, 0)

    def const_map(n, e, first_ref, cnt_ref):
        return (0, 0)

    # Explicit VMEM budget: double-buffered streams + resident weights + scratch.
    vmem_needed = (2 * 2 * te * D * 2          # src_h, rel_h (bf16, 2 buffers)
                   + 2 * te * 4                # dst ids
                   + 2 * 2 * tn * D * 4        # ent in + ent out (f32, 2 buffers)
                   + 2 * 3 * D * D * 2         # layer weights (bf16, 2 buffers)
                   + 2 * 3 * tn * 4            # m, l scratch
                   + 3 * tn * D * 4)           # acc scratch
    vmem_limit = int(min(64 * 2 ** 20, max(32 * 2 ** 20, 2 * vmem_needed)))

    ent_out = pl.pallas_call(
        segnn_kernel,
        out_shape=jax.ShapeDtypeStruct((n_pad, D), ent_emb.dtype),
        grid_spec=pltpu.PrefetchScalarGridSpec(
            num_scalar_prefetch=2,
            grid=(n_tiles, max_tiles),
            in_specs=[
                pl.BlockSpec((1, te), dst_map),       # dst ids
                pl.BlockSpec((tn, D), row_map),       # entity rows
                pl.BlockSpec((te, D), edge_map),      # src_h
                pl.BlockSpec((te, D), edge_map),      # rel_h
                pl.BlockSpec((D, D), const_map),      # w_edge (resident)
                pl.BlockSpec((D, D), const_map),      # w_node (resident)
                pl.BlockSpec((D, D), const_map),      # w_comp (resident)
            ],
            out_specs=pl.BlockSpec((tn, D), row_map),
            scratch_shapes=[
                pltpu.VMEM((3, tn, 1), jnp.float32),  # m (per layer)
                pltpu.VMEM((3, tn, 1), jnp.float32),  # l (per layer)
                pltpu.VMEM((3, tn, D), jnp.float32),  # acc (per layer)
            ]),
        compiler_params=pltpu.CompilerParams(
            dimension_semantics=("parallel", "arbitrary"),
            vmem_limit_bytes=vmem_limit),
    )(first, count, dst_ids, ent_p, src_h, rel_h, we, wn, wc)

    # Tiny relation projection: plain XLA glue (removed from the kernel).
    rel_out = jnp.dot(rel_emb, rel_w, preferred_element_type=jnp.float32)
    return ent_out[:N], rel_out


# ----------------------------------------------------------------------------
# Host-side wrapper: sort edges by dst, build the scalar-prefetch window table.
# ----------------------------------------------------------------------------
def _round_up(x, m):
    return (x + m - 1) // m * m


def segnn_forward(ent_emb, rel_emb, edge_src, edge_dst, edge_type,
                  w_edge, w_node, w_comp, rel_w, *, tn=128, te=512):
    """SEGNN.aggragate_emb forward (dropout = identity, bn disabled)."""
    N, D = ent_emb.shape
    E = int(edge_src.shape[0])
    assert tn % 8 == 0 and te % 128 == 0 and D % 128 == 0

    dst_np = np.asarray(jax.device_get(edge_dst)).astype(np.int32)
    src_np = np.asarray(jax.device_get(edge_src)).astype(np.int32)
    typ_np = np.asarray(jax.device_get(edge_type)).astype(np.int32)
    order = np.argsort(dst_np, kind="stable")
    dst_np, src_np, typ_np = dst_np[order], src_np[order], typ_np[order]

    n_pad, e_pad = _round_up(N, tn), _round_up(E, te)
    n_tiles, e_tiles = n_pad // tn, e_pad // te

    dst_p = np.full((e_pad,), -1, np.int32)   # -1 marks padding edges
    dst_p[:E] = dst_np
    src_p = np.zeros((e_pad,), np.int32)
    src_p[:E] = src_np
    typ_p = np.zeros((e_pad,), np.int32)
    typ_p[:E] = typ_np

    # Per-row-tile contiguous edge-tile window [first, first + count).
    edge_tile = np.arange(e_pad, dtype=np.int32) // te
    row_tile = np.where(dst_p >= 0, dst_p // tn, -1)
    first = np.zeros((n_tiles,), np.int32)
    count = np.zeros((n_tiles,), np.int32)
    for n in range(n_tiles):
        t = edge_tile[row_tile == n]
        if t.size:
            first[n] = t.min()
            count[n] = t.max() - t.min() + 1
    max_tiles = max(1, int(count.max()))

    return _segnn_forward_impl(
        ent_emb, rel_emb,
        jnp.asarray(src_p), jnp.asarray(dst_p), jnp.asarray(typ_p),
        jnp.asarray(first), jnp.asarray(count),
        w_edge, w_node, w_comp, rel_w,
        tn=tn, te=te, max_tiles=max_tiles)


# ----------------------------------------------------------------------------
# Pure-JAX reference (segment-wise edge softmax), for validation only
# ----------------------------------------------------------------------------
def _ref_layer(msg, dst_h, dst, w, num_nodes):
    score = jnp.sum(msg * dst_h, axis=-1)
    m = jnp.full((num_nodes,), -1e30, jnp.float32).at[dst].max(score)
    e = jnp.exp(score - m[dst])
    denom = jnp.zeros((num_nodes,), jnp.float32).at[dst].add(e)
    p = e / jnp.maximum(denom[dst], 1e-30)
    neigh = jnp.zeros((num_nodes, msg.shape[1]), jnp.float32
                      ).at[dst].add(p[:, None] * msg)
    return jnp.tanh(neigh @ w)


def segnn_reference(ent_emb, rel_emb, edge_src, edge_dst, edge_type,
                    w_edge, w_node, w_comp, rel_w, num_nodes):
    src_h, dst_h = ent_emb[edge_src], ent_emb[edge_dst]
    rel_h = rel_emb[edge_type]
    edge_out = _ref_layer(rel_h, dst_h, edge_dst, w_edge, num_nodes)
    node_out = _ref_layer(src_h, dst_h, edge_dst, w_node, num_nodes)
    comp_out = _ref_layer(src_h * rel_h, dst_h, edge_dst, w_comp, num_nodes)
    return ent_emb + edge_out + node_out + comp_out, rel_emb @ rel_w


# ----------------------------------------------------------------------------
def xavier_normal(key, shape):
    fan_in, fan_out = shape[0], shape[1]
    std = (2.0 / (fan_in + fan_out)) ** 0.5
    return std * jax.random.normal(key, shape, dtype=jnp.float32)


if __name__ == "__main__":
    # Small synthetic graph; sizes chosen to exercise padding, the multi-tile
    # edge windows and the clamped tail (grid = (3, max_tiles) with e_tiles=6).
    N_ENT, N_REL, H_DIM, N_EDGE = 300, 4, 128, 700   # rel table has 2*N_REL rows

    key = jax.random.PRNGKey(0)
    keys = jax.random.split(key, 9)

    ent_emb = jax.random.normal(keys[0], (N_ENT, H_DIM), dtype=jnp.float32)
    rel_emb = jax.random.normal(keys[1], (2 * N_REL, H_DIM), dtype=jnp.float32)

    edge_src = jax.random.randint(keys[2], (N_EDGE,), 0, N_ENT, dtype=jnp.int32)
    edge_dst = jax.random.randint(keys[3], (N_EDGE,), 0, N_ENT, dtype=jnp.int32)
    edge_type = jax.random.randint(keys[4], (N_EDGE,), 0, 2 * N_REL, dtype=jnp.int32)

    w_edge = xavier_normal(keys[5], (H_DIM, H_DIM))   # EdgeLayer.neigh_w
    w_node = xavier_normal(keys[6], (H_DIM, H_DIM))   # NodeLayer.neigh_w
    w_comp = xavier_normal(keys[7], (H_DIM, H_DIM))   # CompLayer.neigh_w
    rel_w = xavier_normal(keys[8], (H_DIM, H_DIM))    # SEGNN.rel_w

    ent_out, rel_out = segnn_forward(
        ent_emb, rel_emb, edge_src, edge_dst, edge_type,
        w_edge, w_node, w_comp, rel_w, tn=128, te=128)
    ent_out = jax.block_until_ready(ent_out)
    rel_out = jax.block_until_ready(rel_out)

    # Validate against pure-JAX f32 reference.  Edge streams / score matmul /
    # aggregation matmuls use bf16 MXU operands -> loose elementwise tol, but
    # the mean error must stay small.
    ent_ref, rel_ref = segnn_reference(
        ent_emb, rel_emb, edge_src, edge_dst, edge_type,
        w_edge, w_node, w_comp, rel_w, N_ENT)
    assert ent_out.shape == ent_ref.shape
    assert jnp.allclose(ent_out, ent_ref, atol=1e-1, rtol=1e-1), "ent mismatch"
    assert float(jnp.mean(jnp.abs(ent_out - ent_ref))) < 3e-2, "ent mean err too large"
    assert jnp.allclose(rel_out, rel_ref, atol=1e-3, rtol=1e-3), "rel mismatch"

    print("KERNEL_OK")
</pallas_src>

<mosaic_0001>
module attributes {stable_mosaic.version = 11 : i64} {
  func.func @segnn_kernel(%arg0: i32, %arg1: i32, %arg2: memref<3xi32, #tpu.memory_space<smem>>, %arg3: memref<3xi32, #tpu.memory_space<smem>>, %arg4: memref<1x128xi32, #tpu.memory_space<vmem>>, %arg5: memref<128x128xf32, #tpu.memory_space<vmem>>, %arg6: memref<128x128xbf16, #tpu.memory_space<vmem>>, %arg7: memref<128x128xbf16, #tpu.memory_space<vmem>>, %arg8: memref<128x128xbf16, #tpu.memory_space<vmem>>, %arg9: memref<128x128xbf16, #tpu.memory_space<vmem>>, %arg10: memref<128x128xbf16, #tpu.memory_space<vmem>>, %arg11: memref<128x128xf32, #tpu.memory_space<vmem>>, %arg12: memref<3x128x1xf32, #tpu.memory_space<vmem>>, %arg13: memref<3x128x1xf32, #tpu.memory_space<vmem>>, %arg14: memref<3x128x128xf32, #tpu.memory_space<vmem>>) attributes {dimension_semantics = [#tpu.dimension_semantics<parallel>, #tpu.dimension_semantics<arbitrary>], iteration_bounds = array<i64: 3, 3>, scalar_prefetch = 2 : i64, scratch_operands = 3 : i64, tpu.core_type = #tpu.core_type<tc>, window_params = [{transform_indices = @transform_0, window_bounds = array<i64: 1, 128>}, {transform_indices = @transform_1, window_bounds = array<i64: 128, 128>}, {transform_indices = @transform_2, window_bounds = array<i64: 128, 128>}, {transform_indices = @transform_3, window_bounds = array<i64: 128, 128>}, {pipeline_mode = #tpu.pipeline_mode<synchronous>, transform_indices = @transform_4, window_bounds = array<i64: 128, 128>}, {pipeline_mode = #tpu.pipeline_mode<synchronous>, transform_indices = @transform_5, window_bounds = array<i64: 128, 128>}, {pipeline_mode = #tpu.pipeline_mode<synchronous>, transform_indices = @transform_6, window_bounds = array<i64: 128, 128>}, {transform_indices = @transform_7, window_bounds = array<i64: 128, 128>}]} {
    %c0_i32 = arith.constant 0 : i32
    %0 = arith.cmpi eq, %arg1, %c0_i32 : i32
    %1 = arith.extui %0 : i1 to i32
    %c0_i32_0 = arith.constant 0 : i32
    %2 = arith.cmpi ne, %1, %c0_i32_0 : i32
    scf.if %2 {
      %cst = arith.constant -1.000000e+30 : f32
      %11 = vector.broadcast %cst : f32 to vector<3x128x1xf32>
      %c0 = arith.constant 0 : index
      %c0_3 = arith.constant 0 : index
      %c0_4 = arith.constant 0 : index
      %12 = vector.load %arg12[%c0, %c0_3, %c0_4] : memref<3x128x1xf32, #tpu.memory_space<vmem>>, vector<3x128x1xf32>
      tpu.vector_store %arg12[%c0, %c0_3, %c0_4], %11 {strides = array<i32>} : memref<3x128x1xf32, #tpu.memory_space<vmem>>, vector<3x128x1xf32>,
      %cst_5 = arith.constant 0.000000e+00 : f32
      %13 = vector.broadcast %cst_5 : f32 to vector<3x128x1xf32>
      %c0_6 = arith.constant 0 : index
      %c0_7 = arith.constant 0 : index
      %c0_8 = arith.constant 0 : index
      %14 = vector.load %arg13[%c0_6, %c0_7, %c0_8] : memref<3x128x1xf32, #tpu.memory_space<vmem>>, vector<3x128x1xf32>
      tpu.vector_store %arg13[%c0_6, %c0_7, %c0_8], %13 {strides = array<i32>} : memref<3x128x1xf32, #tpu.memory_space<vmem>>, vector<3x128x1xf32>,
      %cst_9 = arith.constant 0.000000e+00 : f32
      %15 = vector.broadcast %cst_9 : f32 to vector<3x128x128xf32>
      %c0_10 = arith.constant 0 : index
      %c0_11 = arith.constant 0 : index
      %c0_12 = arith.constant 0 : index
      %16 = vector.load %arg14[%c0_10, %c0_11, %c0_12] : memref<3x128x128xf32, #tpu.memory_space<vmem>>, vector<3x128x128xf32>
      tpu.vector_store %arg14[%c0_10, %c0_11, %c0_12], %15 {strides = array<i32>} : memref<3x128x128xf32, #tpu.memory_space<vmem>>, vector<3x128x128xf32>,
    } else {
    }
    %3 = arith.index_cast %arg0 : i32 to index
    %4 = memref.load %arg3[%3] : memref<3xi32, #tpu.memory_space<smem>>
    %5 = arith.cmpi slt, %arg1, %4 : i32
    %6 = arith.extui %5 : i1 to i32
    %c0_i32_1 = arith.constant 0 : i32
    %7 = arith.cmpi ne, %6, %c0_i32_1 : i32
    scf.if %7 {
      %c0 = arith.constant 0 : index
      %c0_3 = arith.constant 0 : index
      %11 = vector.load %arg6[%c0, %c0_3] : memref<128x128xbf16, #tpu.memory_space<vmem>>, vector<128x128xbf16>
      %c0_4 = arith.constant 0 : index
      %c0_5 = arith.constant 0 : index
      %12 = vector.load %arg7[%c0_4, %c0_5] : memref<128x128xbf16, #tpu.memory_space<vmem>>, vector<128x128xbf16>
      %13 = arith.mulf %11, %12 : vector<128x128xbf16>
      %c0_6 = arith.constant 0 : index
      %c0_7 = arith.constant 0 : index
      %14 = vector.load %arg5[%c0_6, %c0_7] : memref<128x128xf32, #tpu.memory_space<vmem>>, vector<128x128xf32>
      %15 = arith.truncf %14 : vector<128x128xf32> to vector<128x128xbf16>
      %c0_8 = arith.constant 0 : index
      %c0_9 = arith.constant 0 : index
      %16 = vector.load %arg4[%c0_8, %c0_9] : memref<1x128xi32, #tpu.memory_space<vmem>>, vector<1x128xi32>
      %c128_i32 = arith.constant 128 : i32
      %17 = arith.muli %arg0, %c128_i32 : i32
      %18 = tpu.iota {dimensions = array<i32: 0>} : vector<128x128xi32>
      %19 = vector.broadcast %17 : i32 to vector<128x128xi32>
      %20 = arith.addi %19, %18 : vector<128x128xi32>
      %21 = vector.broadcast %16 : vector<1x128xi32> to vector<128x128xi32>
      %22 = arith.cmpi eq, %20, %21 : vector<128x128xi32>
      %cst = arith.constant dense<0.000000e+00> : vector<128x128xf32>
      %23 = tpu.matmul %15, %12, %cst {dimension_numbers = #tpu.dot_dimension_numbers<[1], [1], [0], [0], [0, 0, 1, 0], [], []>} : vector<128x128xbf16>, vector<128x128xbf16>, vector<128x128xf32> -> vector<128x128xf32>
      %c0_10 = arith.constant 0 : index
      %c0_11 = arith.constant 0 : index
      %c0_12 = arith.constant 0 : index
      %24 = vector.load %arg12[%c0_10, %c0_11, %c0_12] : memref<3x128x1xf32, #tpu.memory_space<vmem>>, vector<1x128x1xf32>
      %25 = vector.shape_cast %24 : vector<1x128x1xf32> to vector<128x1xf32>
      %cst_13 = arith.constant -1.000000e+30 : f32
      %26 = vector.broadcast %cst_13 : f32 to vector<128x128xf32>
      %27 = arith.select %22, %23, %26 : vector<128x128xi1>, vector<128x128xf32>
      %cst_14 = arith.constant dense<0xFF800000> : vector<128xf32>
      %28 = vector.multi_reduction <maximumf>, %27, %cst_14 [1] : vector<128x128xf32> to vector<128xf32>
      %29 = vector.shape_cast %28 : vector<128xf32> to vector<128x1xf32>
      %30 = arith.maximumf %25, %29 : vector<128x1xf32>
      %31 = arith.subf %25, %30 : vector<128x1xf32>
      %32 = math.exp %31 : vector<128x1xf32>
      %33 = vector.broadcast %30 : vector<128x1xf32> to vector<128x128xf32>
      %34 = arith.subf %23, %33 : vector<128x128xf32>
      %cst_15 = arith.constant 0.000000e+00 : f32
      %35 = vector.broadcast %cst_15 : f32 to vector<128x128xf32>
      %36 = arith.select %22, %34, %35 : vector<128x128xi1>, vector<128x128xf32>
      %cst_16 = arith.constant dense<0.000000e+00> : vector<128xf32>
      %37 = vector.multi_reduction <add>, %36, %cst_16 [0] : vector<128x128xf32> to vector<128xf32>
      %38 = vector.shape_cast %37 : vector<128xf32> to vector<1x128xf32>
      %39 = math.exp %38 : vector<1x128xf32>
      %cst_17 = arith.constant 0.000000e+00 : f32
      %40 = vector.shape_cast %39 : vector<1x128xf32> to vector<1x128xf32>
      %41 = vector.broadcast %40 : vector<1x128xf32> to vector<128x128xf32>
      %42 = vector.broadcast %cst_17 : f32 to vector<128x128xf32>
      %43 = arith.select %22, %41, %42 : vector<128x128xi1>, vector<128x128xf32>
      %c0_18 = arith.constant 0 : index
      %c0_19 = arith.constant 0 : index
      %c0_20 = arith.constant 0 : index
      %44 = vector.load %arg13[%c0_18, %c0_19, %c0_20] : memref<3x128x1xf32, #tpu.memory_space<vmem>>, vector<1x128x1xf32>
      %45 = vector.shape_cast %44 : vector<1x128x1xf32> to vector<128x1xf32>
      %46 = arith.mulf %32, %45 : vector<128x1xf32>
      %cst_21 = arith.constant dense<0.000000e+00> : vector<128xf32>
      %47 = vector.multi_reduction <add>, %43, %cst_21 [1] : vector<128x128xf32> to vector<128xf32>
      %48 = vector.shape_cast %47 : vector<128xf32> to vector<128x1xf32>
      %49 = arith.addf %46, %48 : vector<128x1xf32>
      %c0_22 = arith.constant 0 : index
      %c0_23 = arith.constant 0 : index
      %c0_24 = arith.constant 0 : index
      %50 = vector.load %arg13[%c0_22, %c0_23, %c0_24] : memref<3x128x1xf32, #tpu.memory_space<vmem>>, vector<1x128x1xf32>
      %51 = vector.shape_cast %50 : vector<1x128x1xf32> to vector<128x1xf32>
      %52 = vector.shape_cast %49 : vector<128x1xf32> to vector<1x128x1xf32>
      tpu.vector_store %arg13[%c0_22, %c0_23, %c0_24], %52 {strides = array<i32>} : memref<3x128x1xf32, #tpu.memory_space<vmem>>, vector<1x128x1xf32>,
      %c0_25 = arith.constant 0 : index
      %c0_26 = arith.constant 0 : index
      %c0_27 = arith.constant 0 : index
      %53 = vector.load %arg14[%c0_25, %c0_26, %c0_27] : memref<3x128x128xf32, #tpu.memory_space<vmem>>, vector<1x128x128xf32>
      %54 = vector.shape_cast %53 : vector<1x128x128xf32> to vector<128x128xf32>
      %55 = vector.broadcast %32 : vector<128x1xf32> to vector<128x128xf32>
      %56 = arith.mulf %55, %54 : vector<128x128xf32>
      %57 = arith.truncf %43 : vector<128x128xf32> to vector<128x128xbf16>
      %cst_28 = arith.constant dense<0.000000e+00> : vector<128x128xf32>
      %58 = tpu.matmul %57, %12, %cst_28 {dimension_numbers = #tpu.dot_dimension_numbers<[1], [0], [0], [1], [0, 0, 1, 1], [], []>} : vector<128x128xbf16>, vector<128x128xbf16>, vector<128x128xf32> -> vector<128x128xf32>
      %59 = arith.addf %56, %58 : vector<128x128xf32>
      %c0_29 = arith.constant 0 : index
      %c0_30 = arith.constant 0 : index
      %c0_31 = arith.constant 0 : index
      %60 = vector.load %arg14[%c0_29, %c0_30, %c0_31] : memref<3x128x128xf32, #tpu.memory_space<vmem>>, vector<1x128x128xf32>
      %61 = vector.shape_cast %60 : vector<1x128x128xf32> to vector<128x128xf32>
      %62 = vector.shape_cast %59 : vector<128x128xf32> to vector<1x128x128xf32>
      tpu.vector_store %arg14[%c0_29, %c0_30, %c0_31], %62 {strides = array<i32>} : memref<3x128x128xf32, #tpu.memory_space<vmem>>, vector<1x128x128xf32>,
      %c0_32 = arith.constant 0 : index
      %c0_33 = arith.constant 0 : index
      %c0_34 = arith.constant 0 : index
      %63 = vector.load %arg12[%c0_32, %c0_33, %c0_34] : memref<3x128x1xf32, #tpu.memory_space<vmem>>, vector<1x128x1xf32>
      %64 = vector.shape_cast %63 : vector<1x128x1xf32> to vector<128x1xf32>
      %65 = vector.shape_cast %30 : vector<128x1xf32> to vector<1x128x1xf32>
      tpu.vector_store %arg12[%c0_32, %c0_33, %c0_34], %65 {strides = array<i32>} : memref<3x128x1xf32, #tpu.memory_space<vmem>>, vector<1x128x1xf32>,
      %cst_35 = arith.constant dense<0.000000e+00> : vector<128x128xf32>
      %66 = tpu.matmul %15, %11, %cst_35 {dimension_numbers = #tpu.dot_dimension_numbers<[1], [1], [0], [0], [0, 0, 1, 0], [], []>} : vector<128x128xbf16>, vector<128x128xbf16>, vector<128x128xf32> -> vector<128x128xf32>
      %c1 = arith.constant 1 : index
      %c0_36 = arith.constant 0 : index
      %c0_37 = arith.constant 0 : index
      %67 = vector.load %arg12[%c1, %c0_36, %c0_37] : memref<3x128x1xf32, #tpu.memory_space<vmem>>, vector<1x128x1xf32>
      %68 = vector.shape_cast %67 : vector<1x128x1xf32> to vector<128x1xf32>
      %cst_38 = arith.constant -1.000000e+30 : f32
      %69 = vector.broadcast %cst_38 : f32 to vector<128x128xf32>
      %70 = arith.select %22, %66, %69 : vector<128x128xi1>, vector<128x128xf32>
      %cst_39 = arith.constant dense<0xFF800000> : vector<128xf32>
      %71 = vector.multi_reduction <maximumf>, %70, %cst_39 [1] : vector<128x128xf32> to vector<128xf32>
      %72 = vector.shape_cast %71 : vector<128xf32> to vector<128x1xf32>
      %73 = arith.maximumf %68, %72 : vector<128x1xf32>
      %74 = arith.subf %68, %73 : vector<128x1xf32>
      %75 = math.exp %74 : vector<128x1xf32>
      %76 = vector.broadcast %73 : vector<128x1xf32> to vector<128x128xf32>
      %77 = arith.subf %66, %76 : vector<128x128xf32>
      %cst_40 = arith.constant 0.000000e+00 : f32
      %78 = vector.broadcast %cst_40 : f32 to vector<128x128xf32>
      %79 = arith.select %22, %77, %78 : vector<128x128xi1>, vector<128x128xf32>
      %cst_41 = arith.constant dense<0.000000e+00> : vector<128xf32>
      %80 = vector.multi_reduction <add>, %79, %cst_41 [0] : vector<128x128xf32> to vector<128xf32>
      %81 = vector.shape_cast %80 : vector<128xf32> to vector<1x128xf32>
      %82 = math.exp %81 : vector<1x128xf32>
      %cst_42 = arith.constant 0.000000e+00 : f32
      %83 = vector.shape_cast %82 : vector<1x128xf32> to vector<1x128xf32>
      %84 = vector.broadcast %83 : vector<1x128xf32> to vector<128x128xf32>
      %85 = vector.broadcast %cst_42 : f32 to vector<128x128xf32>
      %86 = arith.select %22, %84, %85 : vector<128x128xi1>, vector<128x128xf32>
      %c1_43 = arith.constant 1 : index
      %c0_44 = arith.constant 0 : index
      %c0_45 = arith.constant 0 : index
      %87 = vector.load %arg13[%c1_43, %c0_44, %c0_45] : memref<3x128x1xf32, #tpu.memory_space<vmem>>, vector<1x128x1xf32>
      %88 = vector.shape_cast %87 : vector<1x128x1xf32> to vector<128x1xf32>
      %89 = arith.mulf %75, %88 : vector<128x1xf32>
      %cst_46 = arith.constant dense<0.000000e+00> : vector<128xf32>
      %90 = vector.multi_reduction <add>, %86, %cst_46 [1] : vector<128x128xf32> to vector<128xf32>
      %91 = vector.shape_cast %90 : vector<128xf32> to vector<128x1xf32>
      %92 = arith.addf %89, %91 : vector<128x1xf32>
      %c1_47 = arith.constant 1 : index
      %c0_48 = arith.constant 0 : index
      %c0_49 = arith.constant 0 : index
      %93 = vector.load %arg13[%c1_47, %c0_48, %c0_49] : memref<3x128x1xf32, #tpu.memory_space<vmem>>, vector<1x128x1xf32>
      %94 = vector.shape_cast %93 : vector<1x128x1xf32> to vector<128x1xf32>
      %95 = vector.shape_cast %92 : vector<128x1xf32> to vector<1x128x1xf32>
      tpu.vector_store %arg13[%c1_47, %c0_48, %c0_49], %95 {strides = array<i32>} : memref<3x128x1xf32, #tpu.memory_space<vmem>>, vector<1x128x1xf32>,
      %c1_50 = arith.constant 1 : index
      %c0_51 = arith.constant 0 : index
      %c0_52 = arith.constant 0 : index
      %96 = vector.load %arg14[%c1_50, %c0_51, %c0_52] : memref<3x128x128xf32, #tpu.memory_space<vmem>>, vector<1x128x128xf32>
      %97 = vector.shape_cast %96 : vector<1x128x128xf32> to vector<128x128xf32>
      %98 = vector.broadcast %75 : vector<128x1xf32> to vector<128x128xf32>
      %99 = arith.mulf %98, %97 : vector<128x128xf32>
      %100 = arith.truncf %86 : vector<128x128xf32> to vector<128x128xbf16>
      %cst_53 = arith.constant dense<0.000000e+00> : vector<128x128xf32>
      %101 = tpu.matmul %100, %11, %cst_53 {dimension_numbers = #tpu.dot_dimension_numbers<[1], [0], [0], [1], [0, 0, 1, 1], [], []>} : vector<128x128xbf16>, vector<128x128xbf16>, vector<128x128xf32> -> vector<128x128xf32>
      %102 = arith.addf %99, %101 : vector<128x128xf32>
      %c1_54 = arith.constant 1 : index
      %c0_55 = arith.constant 0 : index
      %c0_56 = arith.constant 0 : index
      %103 = vector.load %arg14[%c1_54, %c0_55, %c0_56] : memref<3x128x128xf32, #tpu.memory_space<vmem>>, vector<1x128x128xf32>
      %104 = vector.shape_cast %103 : vector<1x128x128xf32> to vector<128x128xf32>
      %105 = vector.shape_cast %102 : vector<128x128xf32> to vector<1x128x128xf32>
      tpu.vector_store %arg14[%c1_54, %c0_55, %c0_56], %105 {strides = array<i32>} : memref<3x128x128xf32, #tpu.memory_space<vmem>>, vector<1x128x128xf32>,
      %c1_57 = arith.constant 1 : index
      %c0_58 = arith.constant 0 : index
      %c0_59 = arith.constant 0 : index
      %106 = vector.load %arg12[%c1_57, %c0_58, %c0_59] : memref<3x128x1xf32, #tpu.memory_space<vmem>>, vector<1x128x1xf32>
      %107 = vector.shape_cast %106 : vector<1x128x1xf32> to vector<128x1xf32>
      %108 = vector.shape_cast %73 : vector<128x1xf32> to vector<1x128x1xf32>
      tpu.vector_store %arg12[%c1_57, %c0_58, %c0_59], %108 {strides = array<i32>} : memref<3x128x1xf32, #tpu.memory_space<vmem>>, vector<1x128x1xf32>,
      %cst_60 = arith.constant dense<0.000000e+00> : vector<128x128xf32>
      %109 = tpu.matmul %15, %13, %cst_60 {dimension_numbers = #tpu.dot_dimension_numbers<[1], [1], [0], [0], [0, 0, 1, 0], [], []>} : vector<128x128xbf16>, vector<128x128xbf16>, vector<128x128xf32> -> vector<128x128xf32>
      %c2 = arith.constant 2 : index
      %c0_61 = arith.constant 0 : index
      %c0_62 = arith.constant 0 : index
      %110 = vector.load %arg12[%c2, %c0_61, %c0_62] : memref<3x128x1xf32, #tpu.memory_space<vmem>>, vector<1x128x1xf32>
      %111 = vector.shape_cast %110 : vector<1x128x1xf32> to vector<128x1xf32>
      %cst_63 = arith.constant -1.000000e+30 : f32
      %112 = vector.broadcast %cst_63 : f32 to vector<128x128xf32>
      %113 = arith.select %22, %109, %112 : vector<128x128xi1>, vector<128x128xf32>
      %cst_64 = arith.constant dense<0xFF800000> : vector<128xf32>
      %114 = vector.multi_reduction <maximumf>, %113, %cst_64 [1] : vector<128x128xf32> to vector<128xf32>
      %115 = vector.shape_cast %114 : vector<128xf32> to vector<128x1xf32>
      %116 = arith.maximumf %111, %115 : vector<128x1xf32>
      %117 = arith.subf %111, %116 : vector<128x1xf32>
      %118 = math.exp %117 : vector<128x1xf32>
      %119 = vector.broadcast %116 : vector<128x1xf32> to vector<128x128xf32>
      %120 = arith.subf %109, %119 : vector<128x128xf32>
      %cst_65 = arith.constant 0.000000e+00 : f32
      %121 = vector.broadcast %cst_65 : f32 to vector<128x128xf32>
      %122 = arith.select %22, %120, %121 : vector<128x128xi1>, vector<128x128xf32>
      %cst_66 = arith.constant dense<0.000000e+00> : vector<128xf32>
      %123 = vector.multi_reduction <add>, %122, %cst_66 [0] : vector<128x128xf32> to vector<128xf32>
      %124 = vector.shape_cast %123 : vector<128xf32> to vector<1x128xf32>
      %125 = math.exp %124 : vector<1x128xf32>
      %cst_67 = arith.constant 0.000000e+00 : f32
      %126 = vector.shape_cast %125 : vector<1x128xf32> to vector<1x128xf32>
      %127 = vector.broadcast %126 : vector<1x128xf32> to vector<128x128xf32>
      %128 = vector.broadcast %cst_67 : f32 to vector<128x128xf32>
      %129 = arith.select %22, %127, %128 : vector<128x128xi1>, vector<128x128xf32>
      %c2_68 = arith.constant 2 : index
      %c0_69 = arith.constant 0 : index
      %c0_70 = arith.constant 0 : index
      %130 = vector.load %arg13[%c2_68, %c0_69, %c0_70] : memref<3x128x1xf32, #tpu.memory_space<vmem>>, vector<1x128x1xf32>
      %131 = vector.shape_cast %130 : vector<1x128x1xf32> to vector<128x1xf32>
      %132 = arith.mulf %118, %131 : vector<128x1xf32>
      %cst_71 = arith.constant dense<0.000000e+00> : vector<128xf32>
      %133 = vector.multi_reduction <add>, %129, %cst_71 [1] : vector<128x128xf32> to vector<128xf32>
      %134 = vector.shape_cast %133 : vector<128xf32> to vector<128x1xf32>
      %135 = arith.addf %132, %134 : vector<128x1xf32>
      %c2_72 = arith.constant 2 : index
      %c0_73 = arith.constant 0 : index
      %c0_74 = arith.constant 0 : index
      %136 = vector.load %arg13[%c2_72, %c0_73, %c0_74] : memref<3x128x1xf32, #tpu.memory_space<vmem>>, vector<1x128x1xf32>
      %137 = vector.shape_cast %136 : vector<1x128x1xf32> to vector<128x1xf32>
      %138 = vector.shape_cast %135 : vector<128x1xf32> to vector<1x128x1xf32>
      tpu.vector_store %arg13[%c2_72, %c0_73, %c0_74], %138 {strides = array<i32>} : memref<3x128x1xf32, #tpu.memory_space<vmem>>, vector<1x128x1xf32>,
      %c2_75 = arith.constant 2 : index
      %c0_76 = arith.constant 0 : index
      %c0_77 = arith.constant 0 : index
      %139 = vector.load %arg14[%c2_75, %c0_76, %c0_77] : memref<3x128x128xf32, #tpu.memory_space<vmem>>, vector<1x128x128xf32>
      %140 = vector.shape_cast %139 : vector<1x128x128xf32> to vector<128x128xf32>
      %141 = vector.broadcast %118 : vector<128x1xf32> to vector<128x128xf32>
      %142 = arith.mulf %141, %140 : vector<128x128xf32>
      %143 = arith.truncf %129 : vector<128x128xf32> to vector<128x128xbf16>
      %cst_78 = arith.constant dense<0.000000e+00> : vector<128x128xf32>
      %144 = tpu.matmul %143, %13, %cst_78 {dimension_numbers = #tpu.dot_dimension_numbers<[1], [0], [0], [1], [0, 0, 1, 1], [], []>} : vector<128x128xbf16>, vector<128x128xbf16>, vector<128x128xf32> -> vector<128x128xf32>
      %145 = arith.addf %142, %144 : vector<128x128xf32>
      %c2_79 = arith.constant 2 : index
      %c0_80 = arith.constant 0 : index
      %c0_81 = arith.constant 0 : index
      %146 = vector.load %arg14[%c2_79, %c0_80, %c0_81] : memref<3x128x128xf32, #tpu.memory_space<vmem>>, vector<1x128x128xf32>
      %147 = vector.shape_cast %146 : vector<1x128x128xf32> to vector<128x128xf32>
      %148 = vector.shape_cast %145 : vector<128x128xf32> to vector<1x128x128xf32>
      tpu.vector_store %arg14[%c2_79, %c0_80, %c0_81], %148 {strides = array<i32>} : memref<3x128x128xf32, #tpu.memory_space<vmem>>, vector<1x128x128xf32>,
      %c2_82 = arith.constant 2 : index
      %c0_83 = arith.constant 0 : index
      %c0_84 = arith.constant 0 : index
      %149 = vector.load %arg12[%c2_82, %c0_83, %c0_84] : memref<3x128x1xf32, #tpu.memory_space<vmem>>, vector<1x128x1xf32>
      %150 = vector.shape_cast %149 : vector<1x128x1xf32> to vector<128x1xf32>
      %151 = vector.shape_cast %116 : vector<128x1xf32> to vector<1x128x1xf32>
      tpu.vector_store %arg12[%c2_82, %c0_83, %c0_84], %151 {strides = array<i32>} : memref<3x128x1xf32, #tpu.memory_space<vmem>>, vector<1x128x1xf32>,
    } else {
    }
    %c2_i32 = arith.constant 2 : i32
    %8 = arith.cmpi eq, %arg1, %c2_i32 : i32
    %9 = arith.extui %8 : i1 to i32
    %c0_i32_2 = arith.constant 0 : i32
    %10 = arith.cmpi ne, %9, %c0_i32_2 : i32
    scf.if %10 {
      %c0 = arith.constant 0 : index
      %c0_3 = arith.constant 0 : index
      %11 = vector.load %arg5[%c0, %c0_3] : memref<128x128xf32, #tpu.memory_space<vmem>>, vector<128x128xf32>
      %c0_4 = arith.constant 0 : index
      %c0_5 = arith.constant 0 : index
      %c0_6 = arith.constant 0 : index
      %12 = vector.load %arg13[%c0_4, %c0_5, %c0_6] : memref<3x128x1xf32, #tpu.memory_space<vmem>>, vector<1x128x1xf32>
      %13 = vector.shape_cast %12 : vector<1x128x1xf32> to vector<128x1xf32>
      %cst = arith.constant 1.000000e-30 : f32
      %14 = vector.broadcast %cst : f32 to vector<128x1xf32>
      %15 = arith.maximumf %13, %14 : vector<128x1xf32>
      %16 = tpu.reciprocal %15 : vector<128x1xf32> -> vector<128x1xf32>
      %c0_7 = arith.constant 0 : index
      %c0_8 = arith.constant 0 : index
      %c0_9 = arith.constant 0 : index
      %17 = vector.load %arg14[%c0_7, %c0_8, %c0_9] : memref<3x128x128xf32, #tpu.memory_space<vmem>>, vector<1x128x128xf32>
      %18 = vector.shape_cast %17 : vector<1x128x128xf32> to vector<128x128xf32>
      %19 = vector.broadcast %16 : vector<128x1xf32> to vector<128x128xf32>
      %20 = arith.mulf %18, %19 : vector<128x128xf32>
      %21 = arith.truncf %20 : vector<128x128xf32> to vector<128x128xbf16>
      %c0_10 = arith.constant 0 : index
      %c0_11 = arith.constant 0 : index
      %22 = vector.load %arg8[%c0_10, %c0_11] : memref<128x128xbf16, #tpu.memory_space<vmem>>, vector<128x128xbf16>
      %cst_12 = arith.constant dense<0.000000e+00> : vector<128x128xf32>
      %23 = tpu.matmul %21, %22, %cst_12 {dimension_numbers = #tpu.dot_dimension_numbers<[1], [0], [0], [1], [0, 0, 1, 1], [], []>} : vector<128x128xbf16>, vector<128x128xbf16>, vector<128x128xf32> -> vector<128x128xf32>
      %24 = math.tanh %23 : vector<128x128xf32>
      %25 = arith.addf %11, %24 : vector<128x128xf32>
      %c1 = arith.constant 1 : index
      %c0_13 = arith.constant 0 : index
      %c0_14 = arith.constant 0 : index
      %26 = vector.load %arg13[%c1, %c0_13, %c0_14] : memref<3x128x1xf32, #tpu.memory_space<vmem>>, vector<1x128x1xf32>
      %27 = vector.shape_cast %26 : vector<1x128x1xf32> to vector<128x1xf32>
      %cst_15 = arith.constant 1.000000e-30 : f32
      %28 = vector.broadcast %cst_15 : f32 to vector<128x1xf32>
      %29 = arith.maximumf %27, %28 : vector<128x1xf32>
      %30 = tpu.reciprocal %29 : vector<128x1xf32> -> vector<128x1xf32>
      %c1_16 = arith.constant 1 : index
      %c0_17 = arith.constant 0 : index
      %c0_18 = arith.constant 0 : index
      %31 = vector.load %arg14[%c1_16, %c0_17, %c0_18] : memref<3x128x128xf32, #tpu.memory_space<vmem>>, vector<1x128x128xf32>
      %32 = vector.shape_cast %31 : vector<1x128x128xf32> to vector<128x128xf32>
      %33 = vector.broadcast %30 : vector<128x1xf32> to vector<128x128xf32>
      %34 = arith.mulf %32, %33 : vector<128x128xf32>
      %35 = arith.truncf %34 : vector<128x128xf32> to vector<128x128xbf16>
      %c0_19 = arith.constant 0 : index
      %c0_20 = arith.constant 0 : index
      %36 = vector.load %arg9[%c0_19, %c0_20] : memref<128x128xbf16, #tpu.memory_space<vmem>>, vector<128x128xbf16>
      %cst_21 = arith.constant dense<0.000000e+00> : vector<128x128xf32>
      %37 = tpu.matmul %35, %36, %cst_21 {dimension_numbers = #tpu.dot_dimension_numbers<[1], [0], [0], [1], [0, 0, 1, 1], [], []>} : vector<128x128xbf16>, vector<128x128xbf16>, vector<128x128xf32> -> vector<128x128xf32>
      %38 = math.tanh %37 : vector<128x128xf32>
      %39 = arith.addf %25, %38 : vector<128x128xf32>
      %c2 = arith.constant 2 : index
      %c0_22 = arith.constant 0 : index
      %c0_23 = arith.constant 0 : index
      %40 = vector.load %arg13[%c2, %c0_22, %c0_23] : memref<3x128x1xf32, #tpu.memory_space<vmem>>, vector<1x128x1xf32>
      %41 = vector.shape_cast %40 : vector<1x128x1xf32> to vector<128x1xf32>
      %cst_24 = arith.constant 1.000000e-30 : f32
      %42 = vector.broadcast %cst_24 : f32 to vector<128x1xf32>
      %43 = arith.maximumf %41, %42 : vector<128x1xf32>
      %44 = tpu.reciprocal %43 : vector<128x1xf32> -> vector<128x1xf32>
      %c2_25 = arith.constant 2 : index
      %c0_26 = arith.constant 0 : index
      %c0_27 = arith.constant 0 : index
      %45 = vector.load %arg14[%c2_25, %c0_26, %c0_27] : memref<3x128x128xf32, #tpu.memory_space<vmem>>, vector<1x128x128xf32>
      %46 = vector.shape_cast %45 : vector<1x128x128xf32> to vector<128x128xf32>
      %47 = vector.broadcast %44 : vector<128x1xf32> to vector<128x128xf32>
      %48 = arith.mulf %46, %47 : vector<128x128xf32>
      %49 = arith.truncf %48 : vector<128x128xf32> to vector<128x128xbf16>
      %c0_28 = arith.constant 0 : index
      %c0_29 = arith.constant 0 : index
      %50 = vector.load %arg10[%c0_28, %c0_29] : memref<128x128xbf16, #tpu.memory_space<vmem>>, vector<128x128xbf16>
      %cst_30 = arith.constant dense<0.000000e+00> : vector<128x128xf32>
      %51 = tpu.matmul %49, %50, %cst_30 {dimension_numbers = #tpu.dot_dimension_numbers<[1], [0], [0], [1], [0, 0, 1, 1], [], []>} : vector<128x128xbf16>, vector<128x128xbf16>, vector<128x128xf32> -> vector<128x128xf32>
      %52 = math.tanh %51 : vector<128x128xf32>
      %53 = arith.addf %39, %52 : vector<128x128xf32>
      %c0_31 = arith.constant 0 : index
      %c0_32 = arith.constant 0 : index
      %54 = vector.load %arg11[%c0_31, %c0_32] : memref<128x128xf32, #tpu.memory_space<vmem>>, vector<128x128xf32>
      tpu.vector_store %arg11[%c0_31, %c0_32], %53 {strides = array<i32>} : memref<128x128xf32, #tpu.memory_space<vmem>>, vector<128x128xf32>,
    } else {
    }
    return
  }
  func.func @transform_0(%arg0: i32, %arg1: i32, %arg2: memref<3xi32, #tpu.memory_space<smem>>, %arg3: memref<3xi32, #tpu.memory_space<smem>>) -> (i32, i32) {
    %0 = arith.index_cast %arg0 : i32 to index
    %1 = memref.load %arg2[%0] : memref<3xi32, #tpu.memory_space<smem>>
    %2 = arith.index_cast %arg0 : i32 to index
    %3 = memref.load %arg3[%2] : memref<3xi32, #tpu.memory_space<smem>>
    %c1_i32 = arith.constant 1 : i32
    %4 = arith.subi %3, %c1_i32 : i32
    %c0_i32 = arith.constant 0 : i32
    %5 = arith.maxsi %4, %c0_i32 : i32
    %6 = arith.addi %1, %5 : i32
    %7 = arith.index_cast %arg0 : i32 to index
    %8 = memref.load %arg2[%7] : memref<3xi32, #tpu.memory_space<smem>>
    %9 = arith.addi %8, %arg1 : i32
    %10 = arith.minsi %9, %6 : i32
    %c0_i32_0 = arith.constant 0 : i32
    %c0_i32_1 = arith.constant 0 : i32
    return %c0_i32_0, %10 : i32, i32
  }
  func.func @transform_1(%arg0: i32, %arg1: i32, %arg2: memref<3xi32, #tpu.memory_space<smem>>, %arg3: memref<3xi32, #tpu.memory_space<smem>>) -> (i32, i32) {
    %c0_i32 = arith.constant 0 : i32
    %c0_i32_0 = arith.constant 0 : i32
    return %arg0, %c0_i32 : i32, i32
  }
  func.func @transform_2(%arg0: i32, %arg1: i32, %arg2: memref<3xi32, #tpu.memory_space<smem>>, %arg3: memref<3xi32, #tpu.memory_space<smem>>) -> (i32, i32) {
    %0 = arith.index_cast %arg0 : i32 to index
    %1 = memref.load %arg2[%0] : memref<3xi32, #tpu.memory_space<smem>>
    %2 = arith.index_cast %arg0 : i32 to index
    %3 = memref.load %arg3[%2] : memref<3xi32, #tpu.memory_space<smem>>
    %c1_i32 = arith.constant 1 : i32
    %4 = arith.subi %3, %c1_i32 : i32
    %c0_i32 = arith.constant 0 : i32
    %5 = arith.maxsi %4, %c0_i32 : i32
    %6 = arith.addi %1, %5 : i32
    %7 = arith.index_cast %arg0 : i32 to index
    %8 = memref.load %arg2[%7] : memref<3xi32, #tpu.memory_space<smem>>
    %9 = arith.addi %8, %arg1 : i32
    %10 = arith.minsi %9, %6 : i32
    %c0_i32_0 = arith.constant 0 : i32
    %c0_i32_1 = arith.constant 0 : i32
    return %10, %c0_i32_0 : i32, i32
  }
  func.func @transform_3(%arg0: i32, %arg1: i32, %arg2: memref<3xi32, #tpu.memory_space<smem>>, %arg3: memref<3xi32, #tpu.memory_space<smem>>) -> (i32, i32) {
    %0 = arith.index_cast %arg0 : i32 to index
    %1 = memref.load %arg2[%0] : memref<3xi32, #tpu.memory_space<smem>>
    %2 = arith.index_cast %arg0 : i32 to index
    %3 = memref.load %arg3[%2] : memref<3xi32, #tpu.memory_space<smem>>
    %c1_i32 = arith.constant 1 : i32
    %4 = arith.subi %3, %c1_i32 : i32
    %c0_i32 = arith.constant 0 : i32
    %5 = arith.maxsi %4, %c0_i32 : i32
    %6 = arith.addi %1, %5 : i32
    %7 = arith.index_cast %arg0 : i32 to index
    %8 = memref.load %arg2[%7] : memref<3xi32, #tpu.memory_space<smem>>
    %9 = arith.addi %8, %arg1 : i32
    %10 = arith.minsi %9, %6 : i32
    %c0_i32_0 = arith.constant 0 : i32
    %c0_i32_1 = arith.constant 0 : i32
    return %10, %c0_i32_0 : i32, i32
  }
  func.func @transform_4(%arg0: i32, %arg1: i32, %arg2: memref<3xi32, #tpu.memory_space<smem>>, %arg3: memref<3xi32, #tpu.memory_space<smem>>) -> (i32, i32) {
    %c0_i32 = arith.constant 0 : i32
    %c0_i32_0 = arith.constant 0 : i32
    %c0_i32_1 = arith.constant 0 : i32
    return %c0_i32, %c0_i32_0 : i32, i32
  }
  func.func @transform_5(%arg0: i32, %arg1: i32, %arg2: memref<3xi32, #tpu.memory_space<smem>>, %arg3: memref<3xi32, #tpu.memory_space<smem>>) -> (i32, i32) {
    %c0_i32 = arith.constant 0 : i32
    %c0_i32_0 = arith.constant 0 : i32
    %c0_i32_1 = arith.constant 0 : i32
    return %c0_i32, %c0_i32_0 : i32, i32
  }
  func.func @transform_6(%arg0: i32, %arg1: i32, %arg2: memref<3xi32, #tpu.memory_space<smem>>, %arg3: memref<3xi32, #tpu.memory_space<smem>>) -> (i32, i32) {
    %c0_i32 = arith.constant 0 : i32
    %c0_i32_0 = arith.constant 0 : i32
    %c0_i32_1 = arith.constant 0 : i32
    return %c0_i32, %c0_i32_0 : i32, i32
  }
  func.func @transform_7(%arg0: i32, %arg1: i32, %arg2: memref<3xi32, #tpu.memory_space<smem>>, %arg3: memref<3xi32, #tpu.memory_space<smem>>) -> (i32, i32) {
    %c0_i32 = arith.constant 0 : i32
    %c0_i32_0 = arith.constant 0 : i32
    return %arg0, %c0_i32 : i32, i32
  }
}

</mosaic_0001>

<bundles_post_ra>
// kernel: _segnn_forward_impl.1
= control target key start
LH: loop header
LB: loop body
LE: loop exit
PB: predicated region body
PF: predicated region fallthrough
CT: control target
= control target key end

     0   :  { %s5358_s15 = smov [#allocation6]   ;;  %s5359_s16 = smov [#allocation7]   ;;  %s8826_s0 = inlined_call_operand.vmem [shape: s32[3], index: 0, kind: input, shape index: {}]   ;;  %s8827_s2 = inlined_call_operand.vmem [shape: s32[1,768], index: 2, kind: input, shape index: {}]   ;;  %s8828_s3 = inlined_call_operand.vmem [shape: f32[384,128], index: 3, kind: input, shape index: {}]   ;;  %s8829_s4 = inlined_call_operand.vmem [shape: bf16[768,128], index: 4, kind: input, shape index: {}]   ;;  %s8830_s5 = inlined_call_operand.vmem [shape: bf16[768,128], index: 5, kind: input, shape index: {}]   ;;  %s8831_s6 = inlined_call_operand.vmem [shape: bf16[128,128], index: 6, kind: input, shape index: {}]   ;;  %s8832_s7 = inlined_call_operand.vmem [shape: bf16[128,128], index: 7, kind: input, shape index: {}]   ;;  %s8833_s8 = inlined_call_operand.vmem [shape: bf16[128,128], index: 8, kind: input, shape index: {}]   ;;  %s8834_s9 = inlined_call_operand.vmem [shape: f32[384,128], index: 9, kind: output, shape index: {}]   ;;  %s8835_s1 = inlined_call_operand.vmem [shape: s32[3], index: 1, kind: input, shape index: {}]  }
   0x1   :  { %s15_s11 = sshll.u32 %s8826_s0, 4  ;;  %s20_s14 = sshll.u32 %s8835_s1, 4  ;;  %s16_s11 = int_to_ptr.vmem [resolvable:$true] %s15_s11  ;;  %s21_s14 = int_to_ptr.vmem [resolvable:$true] %s20_s14 }
   0x2   :  { %18 = dma.vmem_to_smem %s16_s11, 16, %s5358_s15, [#allocation5] }
   0x3   :  { %23 = dma.vmem_to_smem %s21_s14, 16, %s5359_s16, [#allocation5] }
   0x4   :  { %5336 = dma.done.wait [#allocation5], 32 }
   0x5   :  { %5337 = vsyncadd [#allocation5], 4294967264 }
   0x6   :  { %26 = sfence }
   0x7   :  { %s5420_s17 = smov 0   ;;  %s5422_s18 = smov 0  }
   0x8   :  { %s5424_s19 = smov 0   ;;  %s5426_s0 = smov 0  }
   0x9   :  { %s5428_s20 = smov 0  }
   0xa LB: > { %8985 = sst [smem:[#allocation9_spill]] %s5348_s19  ;;  %s41_s1 = sadd.s32 1, %s5348_s19  ;;  %s5356_s20 = sphi %s5428_s20, %s32_s20   ;;  %s5352_s0 = sphi %s5426_s0, %s9544_s0   ;;  %s5348_s19 = sphi %s5424_s19, %s9543_s19   ;;  %s5344_s18 = sphi %s5422_s18, %s9542_s18   ;;  %s5340_s17 = sphi %s5420_s17, %s9541_s17  }
   0xb   : > { %8986 = sst [smem:[#allocation10_spill]] %s5352_s0  ;;  %s44_s21 = sadd.s32 1, %s5352_s0 }
   0xc   : > { %p42_p0 = scmp.ge.s32.totalorder %s41_s1, 3  ;;  %p4615_p1 = scmp.ge.s32.totalorder %s5356_s20, 1 }
   0xd   : > { %p403_p2 = scmp.lt.s32.totalorder %s5356_s20, 10 }
   0xe   : > { %s9546_s1 = smov (%p42_p0, %s41_s1), 0  ;;  %s9548_s21 = smov (!%p42_p0, %s44_s21), %s5352_s0 }
   0xf   : > { %8987 = sst [smem:[#allocation11_spill]] %s9546_s1  ;;  %p404_p3 = pnand %p4615_p1, %p403_p2 }
  0x10   : > { %p46_p4 = scmp.ge.s32.totalorder %s9548_s21, 3  ;;  %s475_s22 = sld [smem:[#allocation6 + %s5344_s18]] (!%p404_p3) }
  0x11   : > { %407 = sbr.rel (%p404_p3) target bundleno = 2066 (0x812), region = 48  ;;  %s4617_s23 = sshll.u32 (!%p404_p3), %s5344_s18, 4 }
  0x12   : > { %s9550_s21 = smov (%p46_p4, %s9548_s21), 0  ;;  %s476_s24 = sld [smem:[#allocation7 + %s5344_s18]] (!%p404_p3) }
  0x13   : > { %8988 = sst [smem:[#allocation12_spill]] %s9550_s21  ;;  %p497_p5 = scmp.lt.s32.totalorder (!%p404_p3), %s4617_s23, 47 }
  0x14   : > { %s502_s25 = sld [smem:[#allocation6 + %s5344_s18]] (!%p404_p3)  ;;  %p4627_p1 = scmp.ne.s32.totalorder (!%p404_p3), %s5340_s17, 0 }
  0x15   : > { %s503_s26 = sld [smem:[#allocation7 + %s5344_s18]] (!%p404_p3) }
  0x16   : > { %s9552_s23 = smov (!%p497_p5, %s4617_s23), 47  ;;  %s526_s28 = sld [smem:[#allocation6 + %s5344_s18]] }
  0x17   : > { %s4618_s27 = sshll.u32 %s9552_s23, 3  ;;  %s527_s12 = sld [smem:[#allocation7 + %s5344_s18]] }
  0x18   : > { %s5463_s10 = scalar_lea.vmem %s8828_s3, %s4618_s27  ;;  %s4616_s11 = sadd.s32 4294967295, %s476_s24 }
  0x19   : > { %p478_p6 = scmp.gt.s32.totalorder %s4616_s11, 0  ;;  %s481_s13 = sadd.s32 %s5340_s17, %s475_s22 }
  0x1a   : > { %s508_s14 = sadd.s32 %s5340_s17, %s502_s25  ;;  %s5471_s21 = scalar_lea.vmem %s8834_s9, %s4618_s27 }
  0x1b   : > { %s9554_s11 = smov (!%p478_p6, %s4616_s11), 0  ;;  %s4619_s1 = sadd.s32 4294967295, %s503_s26 }
  0x1c   : > { %s532_s0 = sadd.s32 %s5340_s17, %s526_s28  ;;  %s480_s23 = sadd.s32 %s9554_s11, %s475_s22 }
  0x1d   : > { %p505_p7 = scmp.gt.s32.totalorder %s4619_s1, 0  ;;  %p482_p8 = scmp.lt.s32.totalorder %s481_s13, %s480_s23 }
  0x1e   : > { %s4622_s19 = sadd.s32 4294967295, %s527_s12 }
  0x1f   : > { %s9556_s1 = smov (!%p505_p7, %s4619_s1), 0  ;;  %s9558_s13 = smov (!%p482_p8, %s481_s13), %s480_s23 }
  0x20   : > { %s507_s29 = sadd.s32 %s9556_s1, %s502_s25  ;;  %p529_p9 = scmp.gt.s32.totalorder %s4622_s19, 0 }
  0x21   : > { %p484_p10 = scmp.lt.s32.totalorder %s9558_s13, 5  ;;  %p509_p11 = scmp.lt.s32.totalorder %s508_s14, %s507_s29 }
  0x22   : > { %s9560_s19 = smov (!%p529_p9, %s4622_s19), 0 }
  0x23   : > { %s9562_s13 = smov (!%p484_p10, %s9558_s13), 5  ;;  %s9564_s14 = smov (!%p509_p11, %s508_s14), %s507_s29 }
  0x24   : > { %s486_s26 = scalar_lea.vmem %s8827_s2, %s9562_s13  ;;  %s531_s30 = sadd.s32 %s9560_s19, %s526_s28 }
  0x25   : > { %s4620_s22 = sshll.u32 %s9564_s14, 4  ;;  %p533_p12 = scmp.lt.s32.totalorder %s532_s0, %s531_s30 }
  0x26   : > { %p512_p13 = scmp.lt.s32.totalorder %s4620_s22, 95 }
  0x27   : > { %s9566_s0 = smov (!%p533_p12, %s532_s0), %s531_s30 }
  0x28   : > { %s9568_s22 = smov (!%p512_p13, %s4620_s22), 95  ;;  %s4623_s11 = sshll.u32 %s9566_s0, 4 }
  0x29   : > { %s4621_s1 = sshll.u32 %s9568_s22, 2  ;;  %p536_p0 = scmp.lt.s32.totalorder %s4623_s11, 95 }
  0x2a   : > { %s5483_s15 = scalar_lea.vmem %s8829_s4, %s4621_s1  ;;  %559 = sbr.rel (%p4627_p1) target bundleno = 192 (0xc0), region = 52 }
  0x2b   : > { %s9570_s11 = smov (!%p536_p0, %s4623_s11), 95 }
  0x2c   : > { %s4624_s16 = sshll.u32 %s9570_s11, 2 }
  0x2d   : > { %s5488_s24 = scalar_lea.vmem %s8830_s5, %s4624_s16 }
  0x2f   : > { %vm560_vm0 = vcmask 7168   ;;  %v5360_v0 = vmov -1e+30   ;;  %v5361_v1 = vmov 0.0  }
  0x30   : > { %561 = vst.msk [vmem:[#allocation2] sm:$0xff] %vm560_vm0, %v5360_v0 }
  0x31   : > { %562 = vst.msk [vmem:[#allocation2 + $0x8] sm:$0xff] %vm560_vm0, %v5360_v0 }
  0x32   : > { %563 = vst.msk [vmem:[#allocation2 + $0x10] sm:$0xff] %vm560_vm0, %v5360_v0 }
  0x33   : > { %564 = vst.msk [vmem:[#allocation2 + $0x18] sm:$0xff] %vm560_vm0, %v5360_v0 }
  0x34   : > { %565 = vst.msk [vmem:[#allocation2 + $0x20] sm:$0xff] %vm560_vm0, %v5360_v0 }
  0x35   : > { %566 = vst.msk [vmem:[#allocation2 + $0x28] sm:$0xff] %vm560_vm0, %v5360_v0 }
  0x36   : > { %567 = vst.msk [vmem:[#allocation2 + $0x30] sm:$0xff] %vm560_vm0, %v5360_v0 }
  0x37   : > { %568 = vst.msk [vmem:[#allocation2 + $0x38] sm:$0xff] %vm560_vm0, %v5360_v0 }
  0x38   : > { %569 = vst.msk [vmem:[#allocation2 + $0x40] sm:$0xff] %vm560_vm0, %v5360_v0 }
  0x39   : > { %570 = vst.msk [vmem:[#allocation2 + $0x48] sm:$0xff] %vm560_vm0, %v5360_v0 }
  0x3a   : > { %571 = vst.msk [vmem:[#allocation2 + $0x50] sm:$0xff] %vm560_vm0, %v5360_v0 }
  0x3b   : > { %572 = vst.msk [vmem:[#allocation2 + $0x58] sm:$0xff] %vm560_vm0, %v5360_v0 }
  0x3c   : > { %573 = vst.msk [vmem:[#allocation2 + $0x60] sm:$0xff] %vm560_vm0, %v5360_v0 }
  0x3d   : > { %574 = vst.msk [vmem:[#allocation2 + $0x68] sm:$0xff] %vm560_vm0, %v5360_v0 }
  0x3e   : > { %575 = vst.msk [vmem:[#allocation2 + $0x70] sm:$0xff] %vm560_vm0, %v5360_v0 }
  0x3f   : > { %576 = vst.msk [vmem:[#allocation2 + $0x78] sm:$0xff] %vm560_vm0, %v5360_v0 }
  0x40   : > { %577 = vst.msk [vmem:[#allocation2 + $0x80] sm:$0xff] %vm560_vm0, %v5360_v0 }
  0x41   : > { %578 = vst.msk [vmem:[#allocation2 + $0x88] sm:$0xff] %vm560_vm0, %v5360_v0 }
  0x42   : > { %579 = vst.msk [vmem:[#allocation2 + $0x90] sm:$0xff] %vm560_vm0, %v5360_v0 }
  0x43   : > { %580 = vst.msk [vmem:[#allocation2 + $0x98] sm:$0xff] %vm560_vm0, %v5360_v0 }
  0x44   : > { %581 = vst.msk [vmem:[#allocation2 + $0xa0] sm:$0xff] %vm560_vm0, %v5360_v0 }
  0x45   : > { %582 = vst.msk [vmem:[#allocation2 + $0xa8] sm:$0xff] %vm560_vm0, %v5360_v0 }
  0x46   : > { %583 = vst.msk [vmem:[#allocation2 + $0xb0] sm:$0xff] %vm560_vm0, %v5360_v0 }
  0x47   : > { %584 = vst.msk [vmem:[#allocation2 + $0xb8] sm:$0xff] %vm560_vm0, %v5360_v0 }
  0x48   : > { %585 = vst.msk [vmem:[#allocation2 + $0xc0] sm:$0xff] %vm560_vm0, %v5360_v0 }
  0x49   : > { %586 = vst.msk [vmem:[#allocation2 + $0xc8] sm:$0xff] %vm560_vm0, %v5360_v0 }
  0x4a   : > { %587 = vst.msk [vmem:[#allocation2 + $0xd0] sm:$0xff] %vm560_vm0, %v5360_v0 }
  0x4b   : > { %588 = vst.msk [vmem:[#allocation2 + $0xd8] sm:$0xff] %vm560_vm0, %v5360_v0 }
  0x4c   : > { %589 = vst.msk [vmem:[#allocation2 + $0xe0] sm:$0xff] %vm560_vm0, %v5360_v0 }
  0x4d   : > { %590 = vst.msk [vmem:[#allocation2 + $0xe8] sm:$0xff] %vm560_vm0, %v5360_v0 }
  0x4e   : > { %591 = vst.msk [vmem:[#allocation2 + $0xf0] sm:$0xff] %vm560_vm0, %v5360_v0 }
  0x4f   : > { %592 = vst.msk [vmem:[#allocation2 + $0xf8] sm:$0xff] %vm560_vm0, %v5360_v0 }
  0x50   : > { %593 = vst.msk [vmem:[#allocation2 + $0x100] sm:$0xff] %vm560_vm0, %v5360_v0 }
  0x51   : > { %594 = vst.msk [vmem:[#allocation2 + $0x108] sm:$0xff] %vm560_vm0, %v5360_v0 }
  0x52   : > { %595 = vst.msk [vmem:[#allocation2 + $0x110] sm:$0xff] %vm560_vm0, %v5360_v0 }
  0x53   : > { %596 = vst.msk [vmem:[#allocation2 + $0x118] sm:$0xff] %vm560_vm0, %v5360_v0 }
  0x54   : > { %597 = vst.msk [vmem:[#allocation2 + $0x120] sm:$0xff] %vm560_vm0, %v5360_v0 }
  0x55   : > { %598 = vst.msk [vmem:[#allocation2 + $0x128] sm:$0xff] %vm560_vm0, %v5360_v0 }
  0x56   : > { %599 = vst.msk [vmem:[#allocation2 + $0x130] sm:$0xff] %vm560_vm0, %v5360_v0 }
  0x57   : > { %600 = vst.msk [vmem:[#allocation2 + $0x138] sm:$0xff] %vm560_vm0, %v5360_v0 }
  0x58   : > { %601 = vst.msk [vmem:[#allocation2 + $0x140] sm:$0xff] %vm560_vm0, %v5360_v0 }
  0x59   : > { %602 = vst.msk [vmem:[#allocation2 + $0x148] sm:$0xff] %vm560_vm0, %v5360_v0 }
  0x5a   : > { %603 = vst.msk [vmem:[#allocation2 + $0x150] sm:$0xff] %vm560_vm0, %v5360_v0 }
  0x5b   : > { %604 = vst.msk [vmem:[#allocation2 + $0x158] sm:$0xff] %vm560_vm0, %v5360_v0 }
  0x5c   : > { %605 = vst.msk [vmem:[#allocation2 + $0x160] sm:$0xff] %vm560_vm0, %v5360_v0 }
  0x5d   : > { %606 = vst.msk [vmem:[#allocation2 + $0x168] sm:$0xff] %vm560_vm0, %v5360_v0 }
  0x5e   : > { %607 = vst.msk [vmem:[#allocation2 + $0x170] sm:$0xff] %vm560_vm0, %v5360_v0 }
  0x5f   : > { %608 = vst.msk [vmem:[#allocation2 + $0x178] sm:$0xff] %vm560_vm0, %v5360_v0 }
  0x60   : > { %609 = vst.msk [vmem:[#allocation3] sm:$0xff] %vm560_vm0, %v5361_v1 }
  0x61   : > { %610 = vst.msk [vmem:[#allocation3 + $0x8] sm:$0xff] %vm560_vm0, %v5361_v1 }
  0x62   : > { %611 = vst.msk [vmem:[#allocation3 + $0x10] sm:$0xff] %vm560_vm0, %v5361_v1 }
  0x63   : > { %612 = vst.msk [vmem:[#allocation3 + $0x18] sm:$0xff] %vm560_vm0, %v5361_v1 }
  0x64   : > { %613 = vst.msk [vmem:[#allocation3 + $0x20] sm:$0xff] %vm560_vm0, %v5361_v1 }
  0x65   : > { %614 = vst.msk [vmem:[#allocation3 + $0x28] sm:$0xff] %vm560_vm0, %v5361_v1 }
  0x66   : > { %615 = vst.msk [vmem:[#allocation3 + $0x30] sm:$0xff] %vm560_vm0, %v5361_v1 }
  0x67   : > { %616 = vst.msk [vmem:[#allocation3 + $0x38] sm:$0xff] %vm560_vm0, %v5361_v1 }
  0x68   : > { %617 = vst.msk [vmem:[#allocation3 + $0x40] sm:$0xff] %vm560_vm0, %v5361_v1 }
  0x69   : > { %618 = vst.msk [vmem:[#allocation3 + $0x48] sm:$0xff] %vm560_vm0, %v5361_v1 }
  0x6a   : > { %619 = vst.msk [vmem:[#allocation3 + $0x50] sm:$0xff] %vm560_vm0, %v5361_v1 }
  0x6b   : > { %620 = vst.msk [vmem:[#allocation3 + $0x58] sm:$0xff] %vm560_vm0, %v5361_v1 }
  0x6c   : > { %621 = vst.msk [vmem:[#allocation3 + $0x60] sm:$0xff] %vm560_vm0, %v5361_v1 }
  0x6d   : > { %622 = vst.msk [vmem:[#allocation3 + $0x68] sm:$0xff] %vm560_vm0, %v5361_v1 }
  0x6e   : > { %623 = vst.msk [vmem:[#allocation3 + $0x70] sm:$0xff] %vm560_vm0, %v5361_v1 }
  0x6f   : > { %624 = vst.msk [vmem:[#allocation3 + $0x78] sm:$0xff] %vm560_vm0, %v5361_v1 }
  0x70   : > { %625 = vst.msk [vmem:[#allocation3 + $0x80] sm:$0xff] %vm560_vm0, %v5361_v1 }
  0x71   : > { %626 = vst.msk [vmem:[#allocation3 + $0x88] sm:$0xff] %vm560_vm0, %v5361_v1 }
  0x72   : > { %627 = vst.msk [vmem:[#allocation3 + $0x90] sm:$0xff] %vm560_vm0, %v5361_v1 }
  0x73   : > { %628 = vst.msk [vmem:[#allocation3 + $0x98] sm:$0xff] %vm560_vm0, %v5361_v1 }
  0x74   : > { %629 = vst.msk [vmem:[#allocation3 + $0xa0] sm:$0xff] %vm560_vm0, %v5361_v1 }
  0x75   : > { %630 = vst.msk [vmem:[#allocation3 + $0xa8] sm:$0xff] %vm560_vm0, %v5361_v1 }
  0x76   : > { %631 = vst.msk [vmem:[#allocation3 + $0xb0] sm:$0xff] %vm560_vm0, %v5361_v1 }
  0x77   : > { %632 = vst.msk [vmem:[#allocation3 + $0xb8] sm:$0xff] %vm560_vm0, %v5361_v1 }
  0x78   : > { %633 = vst.msk [vmem:[#allocation3 + $0xc0] sm:$0xff] %vm560_vm0, %v5361_v1 }
  0x79   : > { %634 = vst.msk [vmem:[#allocation3 + $0xc8] sm:$0xff] %vm560_vm0, %v5361_v1 }
  0x7a   : > { %635 = vst.msk [vmem:[#allocation3 + $0xd0] sm:$0xff] %vm560_vm0, %v5361_v1 }
  0x7b   : > { %636 = vst.msk [vmem:[#allocation3 + $0xd8] sm:$0xff] %vm560_vm0, %v5361_v1 }
  0x7c   : > { %637 = vst.msk [vmem:[#allocation3 + $0xe0] sm:$0xff] %vm560_vm0, %v5361_v1 }
  0x7d   : > { %638 = vst.msk [vmem:[#allocation3 + $0xe8] sm:$0xff] %vm560_vm0, %v5361_v1 }
  0x7e   : > { %639 = vst.msk [vmem:[#allocation3 + $0xf0] sm:$0xff] %vm560_vm0, %v5361_v1 }
  0x7f   : > { %640 = vst.msk [vmem:[#allocation3 + $0xf8] sm:$0xff] %vm560_vm0, %v5361_v1 }
  0x80   : > { %641 = vst.msk [vmem:[#allocation3 + $0x100] sm:$0xff] %vm560_vm0, %v5361_v1 }
  0x81   : > { %642 = vst.msk [vmem:[#allocation3 + $0x108] sm:$0xff] %vm560_vm0, %v5361_v1 }
  0x82   : > { %643 = vst.msk [vmem:[#allocation3 + $0x110] sm:$0xff] %vm560_vm0, %v5361_v1 }
  0x83   : > { %644 = vst.msk [vmem:[#allocation3 + $0x118] sm:$0xff] %vm560_vm0, %v5361_v1 }
  0x84   : > { %645 = vst.msk [vmem:[#allocation3 + $0x120] sm:$0xff] %vm560_vm0, %v5361_v1 }
  0x85   : > { %646 = vst.msk [vmem:[#allocation3 + $0x128] sm:$0xff] %vm560_vm0, %v5361_v1 }
  0x86   : > { %647 = vst.msk [vmem:[#allocation3 + $0x130] sm:$0xff] %vm560_vm0, %v5361_v1 }
  0x87   : > { %648 = vst.msk [vmem:[#allocation3 + $0x138] sm:$0xff] %vm560_vm0, %v5361_v1 }
  0x88   : > { %649 = vst.msk [vmem:[#allocation3 + $0x140] sm:$0xff] %vm560_vm0, %v5361_v1 }
  0x89   : > { %650 = vst.msk [vmem:[#allocation3 + $0x148] sm:$0xff] %vm560_vm0, %v5361_v1 }
  0x8a   : > { %651 = vst.msk [vmem:[#allocation3 + $0x150] sm:$0xff] %vm560_vm0, %v5361_v1 }
  0x8b   : > { %652 = vst.msk [vmem:[#allocation3 + $0x158] sm:$0xff] %vm560_vm0, %v5361_v1 }
  0x8c   : > { %653 = vst.msk [vmem:[#allocation3 + $0x160] sm:$0xff] %vm560_vm0, %v5361_v1 }
  0x8d   : > { %654 = vst.msk [vmem:[#allocation3 + $0x168] sm:$0xff] %vm560_vm0, %v5361_v1 }
  0x8e   : > { %655 = vst.msk [vmem:[#allocation3 + $0x170] sm:$0xff] %vm560_vm0, %v5361_v1 }
  0x8f   : > { %656 = vst.msk [vmem:[#allocation3 + $0x178] sm:$0xff] %vm560_vm0, %v5361_v1 }
  0x90   : > { %657 = vst [vmem:[#allocation4 + $0xb0] sm:$0xff] %v5361_v1 }
  0x91   : > { %658 = vst [vmem:[#allocation4 + $0xd0] sm:$0xff] %v5361_v1 }
  0x92   : > { %659 = vst [vmem:[#allocation4 + $0x10] sm:$0xff] %v5361_v1 }
  0x93   : > { %660 = vst [vmem:[#allocation4 + $0x48] sm:$0xff] %v5361_v1 }
  0x94   : > { %661 = vst [vmem:[#allocation4 + $0x160] sm:$0xff] %v5361_v1 }
  0x95   : > { %662 = vst [vmem:[#allocation4 + $0x128] sm:$0xff] %v5361_v1 }
  0x96   : > { %663 = vst [vmem:[#allocation4 + $0x40] sm:$0xff] %v5361_v1 }
  0x97   : > { %664 = vst [vmem:[#allocation4 + $0x178] sm:$0xff] %v5361_v1 }
  0x98   : > { %665 = vst [vmem:[#allocation4 + $0x108] sm:$0xff] %v5361_v1 }
  0x99   : > { %666 = vst [vmem:[#allocation4 + $0x110] sm:$0xff] %v5361_v1 }
  0x9a   : > { %667 = vst [vmem:[#allocation4 + $0x90] sm:$0xff] %v5361_v1 }
  0x9b   : > { %668 = vst [vmem:[#allocation4 + $0x118] sm:$0xff] %v5361_v1 }
  0x9c   : > { %669 = vst [vmem:[#allocation4 + $0x148] sm:$0xff] %v5361_v1 }
  0x9d   : > { %670 = vst [vmem:[#allocation4 + $0x100] sm:$0xff] %v5361_v1 }
  0x9e   : > { %671 = vst [vmem:[#allocation4 + $0x58] sm:$0xff] %v5361_v1 }
  0x9f   : > { %672 = vst [vmem:[#allocation4 + $0xd8] sm:$0xff] %v5361_v1 }
  0xa0   : > { %673 = vst [vmem:[#allocation4 + $0x80] sm:$0xff] %v5361_v1 }
  0xa1   : > { %674 = vst [vmem:[#allocation4 + $0x130] sm:$0xff] %v5361_v1 }
  0xa2   : > { %675 = vst [vmem:[#allocation4 + $0x138] sm:$0xff] %v5361_v1 }
  0xa3   : > { %676 = vst [vmem:[#allocation4 + $0x120] sm:$0xff] %v5361_v1 }
  0xa4   : > { %677 = vst [vmem:[#allocation4 + $0xe0] sm:$0xff] %v5361_v1 }
  0xa5   : > { %678 = vst [vmem:[#allocation4 + $0xa8] sm:$0xff] %v5361_v1 }
  0xa6   : > { %679 = vst [vmem:[#allocation4 + $0xb8] sm:$0xff] %v5361_v1 }
  0xa7   : > { %680 = vst [vmem:[#allocation4 + $0x168] sm:$0xff] %v5361_v1 }
  0xa8   : > { %681 = vst [vmem:[#allocation4 + $0xe8] sm:$0xff] %v5361_v1 }
  0xa9   : > { %682 = vst [vmem:[#allocation4 + $0xf8] sm:$0xff] %v5361_v1 }
  0xaa   : > { %683 = vst [vmem:[#allocation4 + $0x20] sm:$0xff] %v5361_v1 }
  0xab   : > { %684 = vst [vmem:[#allocation4 + $0x88] sm:$0xff] %v5361_v1 }
  0xac   : > { %685 = vst [vmem:[#allocation4 + $0xa0] sm:$0xff] %v5361_v1 }
  0xad   : > { %686 = vst [vmem:[#allocation4 + $0x170] sm:$0xff] %v5361_v1 }
  0xae   : > { %687 = vst [vmem:[#allocation4 + $0xf0] sm:$0xff] %v5361_v1 }
  0xaf   : > { %688 = vst [vmem:[#allocation4 + $0x140] sm:$0xff] %v5361_v1 }
  0xb0   : > { %689 = vst [vmem:[#allocation4 + $0x60] sm:$0xff] %v5361_v1 }
  0xb1   : > { %690 = vst [vmem:[#allocation4 + $0xc8] sm:$0xff] %v5361_v1 }
  0xb2   : > { %691 = vst [vmem:[#allocation4 + $0x28] sm:$0xff] %v5361_v1 }
  0xb3   : > { %692 = vst [vmem:[#allocation4 + $0x38] sm:$0xff] %v5361_v1 }
  0xb4   : > { %693 = vst [vmem:[#allocation4 + $0xc0] sm:$0xff] %v5361_v1 }
  0xb5   : > { %694 = vst [vmem:[#allocation4 + $0x18] sm:$0xff] %v5361_v1 }
  0xb6   : > { %695 = vst [vmem:[#allocation4 + $0x98] sm:$0xff] %v5361_v1 }
  0xb7   : > { %696 = vst [vmem:[#allocation4 + $0x8] sm:$0xff] %v5361_v1 }
  0xb8   : > { %697 = vst [vmem:[#allocation4] sm:$0xff] %v5361_v1 }
  0xb9   : > { %698 = vst [vmem:[#allocation4 + $0x78] sm:$0xff] %v5361_v1 }
  0xba   : > { %699 = vst [vmem:[#allocation4 + $0x50] sm:$0xff] %v5361_v1 }
  0xbb   : > { %700 = vst [vmem:[#allocation4 + $0x68] sm:$0xff] %v5361_v1 }
  0xbc   : > { %701 = vst [vmem:[#allocation4 + $0x70] sm:$0xff] %v5361_v1 }
  0xbd   : > { %702 = vst [vmem:[#allocation4 + $0x30] sm:$0xff] %v5361_v1 }
  0xbe   : > { %703 = vst [vmem:[#allocation4 + $0x158] sm:$0xff] %v5361_v1 }
  0xbf   : > { %704 = vst [vmem:[#allocation4 + $0x150] sm:$0xff] %v5361_v1 }
  0xc0 PF: > { %s705_s19 = sld [smem:[#allocation7 + %s5344_s18]] }
  0xc6   : > { %p4628_p2 = scmp.ge.s32.totalorder %s5340_s17, %s705_s19 }
  0xc8   : > { %709 = sbr.rel (%p4628_p2) target bundleno = 1614 (0x64e), region = 56 }
  0xcd   : > { %v4880_v2 = vld [vmem:[%s5488_s24 + $0x38] sm:$0xff]  ;;  %v4879_v3 = vld [vmem:[%s5488_s24 + $0x30] sm:$0xff]  ;;  %v4878_v4 = vld [vmem:[%s5488_s24 + $0x28] sm:$0xff]  ;;  %v824_v37 = vlaneseq  ;;  %s4629_s0 = sshll.u32 %s5344_s18, 7  ;;  %v8997_v44 = vmov 0  ;;  %v8999_v50 = vmov 0 }
  0xce   : > { %923 = vmatpush.bf16.xpose.msra.mxu0 %v4880_v2  ;;  %4905 = vmatpush.bf16.msra.mxu1 %v4880_v2  ;;  %v4877_v5 = vld [vmem:[%s5488_s24 + $0x20] sm:$0xff]  ;;  %v4876_v6 = vld [vmem:[%s5488_s24 + $0x18] sm:$0xff]  ;;  %v4875_v7 = vld [vmem:[%s5488_s24 + $0x10] sm:$0xff]  ;;  %v5740_v40 = vstv %s4629_s0  ;;  %v9001_v56 = vmov 0  ;;  %v9003_v62 = vmov 0  ;;  %vm8871_vm0 = vcmask 7168  }
  0xcf   : > { %v4874_v8 = vld [vmem:[%s5488_s24 + $0x8] sm:$0xff]  ;;  %v4873_v9 = vld [vmem:[%s5488_s24] sm:$0xff]  ;;  %v800_v13 = vld [vmem:[%s5463_s10 + $0x10] sm:$0xff]  ;;  %v5738_v39 = vshrl.u32 %v824_v37, 7 }
  0xd0   : > { %v798_v10 = vld [vmem:[%s5463_s10] sm:$0xff]  ;;  %v799_v11 = vld [vmem:[%s5463_s10 + $0x8] sm:$0xff]  ;;  %v801_v14 = vld [vmem:[%s5463_s10 + $0x18] sm:$0xff] }
  0xd1   : > { %v5695_v12 = vpack.c.bf16 %v799_v11, %v798_v10  ;;  %v5700_v15 = vpack.c.bf16 %v801_v14, %v800_v13  ;;  %v802_v16 = vld [vmem:[%s5463_s10 + $0x20] sm:$0xff]  ;;  %v803_v17 = vld [vmem:[%s5463_s10 + $0x28] sm:$0xff]  ;;  %v804_v19 = vld [vmem:[%s5463_s10 + $0x30] sm:$0xff]  ;;  %v842_v41 = vadd.s32 %v5740_v40, %v5738_v39  ;;  %v826_v45 = vadd.s32 8, %v5738_v39 }
  0xd2   : > { %4906 = vmatpush.bf16.msra.mxu1 %v4879_v3  ;;  %v5705_v18 = vpack.c.bf16 %v803_v17, %v802_v16  ;;  %v805_v20 = vld [vmem:[%s5463_s10 + $0x38] sm:$0xff]  ;;  %v806_v22 = vld [vmem:[%s5463_s10 + $0x40] sm:$0xff]  ;;  %v807_v23 = vld [vmem:[%s5463_s10 + $0x48] sm:$0xff]  ;;  %v827_v51 = vadd.s32 16, %v5738_v39  ;;  %v828_v57 = vadd.s32 24, %v5738_v39  ;;  %v829_v63 = vadd.s32 32, %v5738_v39 }
  0xd3   : > { %8989 = vst [vmem:[#allocation13_spill] sm:$0xff] %v5695_v12  ;;  %v5710_v21 = vpack.c.bf16 %v805_v20, %v804_v19  ;;  %v5715_v24 = vpack.c.bf16 %v807_v23, %v806_v22  ;;  %v808_v25 = vld [vmem:[%s5463_s10 + $0x50] sm:$0xff]  ;;  %v809_v26 = vld [vmem:[%s5463_s10 + $0x58] sm:$0xff]  ;;  %v810_v29 = vld [vmem:[%s5463_s10 + $0x60] sm:$0xff]  ;;  %v843_v48 = vadd.s32 %v5740_v40, %v826_v45  ;;  %v832_v16 = vadd.s32 56, %v5738_v39 }
  0xd4   : > { %8990 = vst [vmem:[#allocation14_spill] sm:$0xff] %v5700_v15  ;;  %v5720_v27 = vpack.c.bf16 %v809_v26, %v808_v25  ;;  %v4872_v28 = vld [vmem:[%s5483_s15 + $0x38] sm:$0xff]  ;;  %v811_v30 = vld [vmem:[%s5463_s10 + $0x68] sm:$0xff]  ;;  %v4871_v32 = vld [vmem:[%s5483_s15 + $0x30] sm:$0xff]  ;;  %v844_v54 = vadd.s32 %v5740_v40, %v827_v51  ;;  %v845_v60 = vadd.s32 %v5740_v40, %v828_v57  ;;  %v833_v23 = vadd.s32 64, %v5738_v39 }
  0xd5   : > { %8991 = vst [vmem:[#allocation15_spill] sm:$0xff] %v5705_v18  ;;  %1613 = vmatpush.bf16.xpose.msra.mxu2 %v4872_v28  ;;  %4913 = vmatpush.bf16.msra.mxu3 %v4872_v28  ;;  %v5726_v31 = vpack.c.bf16 %v811_v30, %v810_v29  ;;  %v4870_v33 = vld [vmem:[%s5483_s15 + $0x28] sm:$0xff]  ;;  %v812_v34 = vld [vmem:[%s5463_s10 + $0x70] sm:$0xff]  ;;  %v813_v35 = vld [vmem:[%s5463_s10 + $0x78] sm:$0xff]  ;;  %v849_v20 = vadd.s32 %v5740_v40, %v832_v16  ;;  %v9013_v29 = vmov 0  ;;  %v834_v30 = vadd.s32 72, %v5738_v39 }
  0xd6   : > { %924 = vmatpush.bf16.xpose.msra.mxu0 %v4879_v3  ;;  %4907 = vmatpush.bf16.msra.mxu1 %v4878_v4  ;;  %8992 = vst [vmem:[#allocation16_spill] sm:$0xff] %v5710_v21  ;;  %v5733_v36 = vpack.c.bf16 %v813_v35, %v812_v34  ;;  %v4869_v38 = vld [vmem:[%s5483_s15 + $0x20] sm:$0xff]  ;;  %v4868_v43 = vld [vmem:[%s5483_s15 + $0x18] sm:$0xff]  ;;  %v4867_v49 = vld [vmem:[%s5483_s15 + $0x10] sm:$0xff]  ;;  %v9015_v35 = vmov 0  ;;  %v835_v37 = vadd.s32 80, %v5738_v39 }
  0xd7   : > { %8993 = vst [vmem:[#allocation17_spill] sm:$0xff] %v5715_v24  ;;  %v5749_v42 = vld [vmem:[%s486_s26] ss:$0 sm:$0xff]  ;;  %v4866_v55 = vld [vmem:[%s5483_s15 + $0x8] sm:$0xff]  ;;  %v851_v34 = vadd.s32 %v5740_v40, %v834_v30  ;;  %v9018_v45 = vmov 0  ;;  %v9031_v16 = vmov 0 }
  0xd8   : > { %8994 = vst [vmem:[#allocation18_spill] sm:$0xff] %v5720_v27  ;;  %vm5753_vm1 = vcmp.eq.s32.totalorder %v842_v41, %v5749_v42  ;;  %vm5766_vm2 = vcmp.eq.s32.totalorder %v843_v48, %v5749_v42  ;;  %vm5779_vm3 = vcmp.eq.s32.totalorder %v844_v54, %v5749_v42  ;;  %v4865_v61 = vld [vmem:[%s5483_s15] sm:$0xff]  ;;  %vm5792_vm4 = vcmp.eq.s32.totalorder %v845_v60, %v5749_v42 }
  0xd9   : > { %8995 = vst [vmem:[#allocation19_spill] sm:$0xff] %v5726_v31  ;;  %4914 = vmatpush.bf16.msra.mxu3 %v4871_v32  ;;  %v8998_v44 = vsel %vm5753_vm1, 4294967295, %v8997_v44  ;;  %v9000_v50 = vsel %vm5766_vm2, 4294967295, %v8999_v50  ;;  %v9002_v56 = vsel %vm5779_vm3, 4294967295, %v9001_v56  ;;  %v9004_v62 = vsel %vm5792_vm4, 4294967295, %v9003_v62 }
  0xda   : > { %4908 = vmatpush.bf16.msra.mxu1 %v4877_v5  ;;  %8996 = vst [vmem:[#allocation20_spill] sm:$0xff] %v5733_v36  ;;  %vm5842_vm8 = vcmp.eq.s32.totalorder %v849_v20, %v5749_v42  ;;  %vm5867_vm10 = vcmp.eq.s32.totalorder %v851_v34, %v5749_v42  ;;  %v837_v54 = vadd.s32 96, %v5738_v39  ;;  %v9024_v60 = vmov 0 }
  0xdb   : > { %v9016_v35 = vsel %vm5867_vm10, 4294967295, %v9015_v35  ;;  %v9035_v34 = vmov 0 }
  0xdc   : > { %9017 = vst [vmem:[#allocation21_spill] sm:$0xff] %v9016_v35 }
  0xdd   : > { %1614 = vmatpush.bf16.xpose.msra.mxu2 %v4871_v32  ;;  %4915 = vmatpush.bf16.msra.mxu3 %v4870_v33 }
  0xde   : > { %925 = vmatpush.bf16.xpose.msra.mxu0 %v4878_v4  ;;  %4909 = vmatpush.bf16.msra.mxu1 %v4876_v6 }
  0xe1   : > { %4916 = vmatpush.bf16.msra.mxu3 %v4869_v38 }
  0xe2   : > { %4910 = vmatpush.bf16.msra.mxu1 %v4875_v7 }
  0xe5   : > { %1615 = vmatpush.bf16.xpose.msra.mxu2 %v4870_v33  ;;  %4917 = vmatpush.bf16.msra.mxu3 %v4868_v43 }
  0xe6   : > { %926 = vmatpush.bf16.xpose.msra.mxu0 %v4877_v5  ;;  %4911 = vmatpush.bf16.msra.mxu1 %v4874_v8 }
  0xe9   : > { %4918 = vmatpush.bf16.msra.mxu3 %v4867_v49 }
  0xea   : > { %4912 = vmatpush.bf16.msra.mxu1 %v4873_v9 }
  0xed   : > { %1616 = vmatpush.bf16.xpose.msra.mxu2 %v4869_v38  ;;  %4919 = vmatpush.bf16.msra.mxu3 %v4866_v55 }
  0xee   : > { %927 = vmatpush.bf16.xpose.msra.mxu0 %v4876_v6 }
  0xf1   : > { %4920 = vmatpush.bf16.msra.mxu3 %v4865_v61 }
  0xf5   : > { %1617 = vmatpush.bf16.xpose.msra.mxu2 %v4868_v43 }
  0xf6   : > { %928 = vmatpush.bf16.xpose.msra.mxu0 %v4875_v7 }
  0xfd   : > { %1618 = vmatpush.bf16.xpose.msra.mxu2 %v4867_v49 }
  0xfe   : > { %929 = vmatpush.bf16.xpose.msra.mxu0 %v4874_v8 }
 0x105   : > { %1619 = vmatpush.bf16.xpose.msra.mxu2 %v4866_v55 }
 0x106   : > { %930 = vmatpush.bf16.xpose.msra.mxu0 %v4873_v9 }
 0x10d   : > { %931 = vmatmul.bf16.vlgmr.msra.gmra.mxu0 %v5695_v12  ;;  %1620 = vmatpush.bf16.xpose.msra.mxu2 %v4865_v61 }
 0x10e   : > { %1468 = vmatpush.bf16.msrb.mxu0 %v4880_v2  ;;  %v846_v2 = vadd.s32 %v5740_v40, %v829_v63 }
 0x110   : > { %vm5805_vm5 = vcmp.eq.s32.totalorder %v846_v2, %v5749_v42 }
 0x112   : > { %1469 = vmatpush.bf16.msrb.mxu0 %v4879_v3 }
 0x114   : > { %1621 = vmatmul.bf16.vlgmr.msra.gmra.mxu2 %v5695_v12 }
 0x115   : > { %2160 = vmatpush.bf16.msrb.mxu2 %v4872_v28  ;;  %v850_v28 = vadd.s32 %v5740_v40, %v833_v23 }
 0x116   : > { %1470 = vmatpush.bf16.msrb.mxu0 %v4878_v4  ;;  %v830_v4 = vadd.s32 40, %v5738_v39 }
 0x117   : > { %vm5855_vm9 = vcmp.eq.s32.totalorder %v850_v28, %v5749_v42  ;;  %v5941_v28 = vld [vmem:[#allocation2] sm:$0xff] }
 0x118   : > { %v9014_v29 = vsel %vm5855_vm9, 4294967295, %v9013_v29 }
 0x119   : > { %2161 = vmatpush.bf16.msrb.mxu2 %v4871_v32 }
 0x11a   : > { %1471 = vmatpush.bf16.msrb.mxu0 %v4877_v5 }
 0x11d   : > { %936 = vmatmul.bf16.gmra.mxu0 %v5700_v15  ;;  %2162 = vmatpush.bf16.msrb.mxu2 %v4870_v33 }
 0x11e   : > { %1472 = vmatpush.bf16.msrb.mxu0 %v4876_v6 }
 0x121   : > { %2163 = vmatpush.bf16.msrb.mxu2 %v4869_v38 }
 0x122   : > { %1473 = vmatpush.bf16.msrb.mxu0 %v4875_v7  ;;  %v847_v7 = vadd.s32 %v5740_v40, %v830_v4  ;;  %v5362_v4 = vmov 0  }
 0x123   : > { %4991 = vset.pattern.permute.xlu1 %v5362_v4  ;;  %4992 = vset.pattern.permute.xlu2 %v5362_v4 }
 0x124   : > { %vm5817_vm6 = vcmp.eq.s32.totalorder %v847_v7, %v5749_v42  ;;  %1626 = vmatmul.bf16.gmra.mxu2 %v5700_v15  ;;  %4993 = vset.pattern.permute.xlu0 %v5362_v4  ;;  %v839_v7 = vadd.s32 112, %v5738_v39  ;;  %v5993_v4 = vld [vmem:[#allocation2 + $0x20] sm:$0xff] }
 0x125   : > { %2164 = vmatpush.bf16.msrb.mxu2 %v4868_v43  ;;  %v852_v43 = vadd.s32 %v5740_v40, %v835_v37 }
 0x126   : > { %1474 = vmatpush.bf16.msrb.mxu0 %v4874_v8  ;;  %v9007_v8 = vmov 0 }
 0x127   : > { %v9008_v8 = vsel %vm5817_vm6, 4294967295, %v9007_v8  ;;  %vm5880_vm11 = vcmp.eq.s32.totalorder %v852_v43, %v5749_v42 }
 0x128   : > { %v9019_v45 = vsel %vm5880_vm11, 4294967295, %v9018_v45 }
 0x129   : > { %2165 = vmatpush.bf16.msrb.mxu2 %v4867_v49  ;;  %9020 = vst [vmem:[#allocation22_spill] sm:$0xff] %v9019_v45 }
 0x12a   : > { %1475 = vmatpush.bf16.msrb.mxu0 %v4873_v9  ;;  %v831_v9 = vadd.s32 48, %v5738_v39 }
 0x12c   : > { %v848_v13 = vadd.s32 %v5740_v40, %v831_v9 }
 0x12d   : > { %941 = vmatmul.bf16.gmra.mxu0 %v5705_v18  ;;  %2166 = vmatpush.bf16.msrb.mxu2 %v4866_v55 }
 0x12e   : > { %vm5830_vm7 = vcmp.eq.s32.totalorder %v848_v13, %v5749_v42  ;;  %v856_v13 = vadd.s32 %v5740_v40, %v839_v7 }
 0x130   : > { %vm5930_vm15 = vcmp.eq.s32.totalorder %v856_v13, %v5749_v42  ;;  %v6027_v13 = vld [vmem:[#allocation2 + $0x38] sm:$0xff] }
 0x131   : > { %2167 = vmatpush.bf16.msrb.mxu2 %v4865_v61  ;;  %v838_v61 = vadd.s32 104, %v5738_v39  ;;  %v9032_v16 = vsel %vm5930_vm15, 4294967295, %v9031_v16  ;;  %9039 = vst [vmem:[#allocation31_spill] sm:$0xff] %v6027_v13 }
 0x132   : > { %9033 = vst [vmem:[#allocation27_spill] sm:$0xff] %v9032_v16 }
 0x133   : > { %v855_v2 = vadd.s32 %v5740_v40, %v838_v61 }
 0x134   : > { %1631 = vmatmul.bf16.gmra.mxu2 %v5705_v18  ;;  %v6073_v18 = vld [vmem:[#allocation2 + $0x58] sm:$0xff] }
 0x135   : > { %vm5917_vm14 = vcmp.eq.s32.totalorder %v855_v2, %v5749_v42 }
 0x13d   : > { %946 = vmatmul.bf16.gmra.mxu0 %v5710_v21 }
 0x144   : > { %1636 = vmatmul.bf16.gmra.mxu2 %v5710_v21 }
 0x14d   : > { %951 = vmatmul.bf16.gmra.mxu0 %v5715_v24 }
 0x154   : > { %1641 = vmatmul.bf16.gmra.mxu2 %v5715_v24 }
 0x15d   : > { %956 = vmatmul.bf16.gmra.mxu0 %v5720_v27 }
 0x164   : > { %1646 = vmatmul.bf16.gmra.mxu2 %v5720_v27 }
 0x16d   : > { %961 = vmatmul.bf16.gmra.mxu0 %v5726_v31 }
 0x174   : > { %1651 = vmatmul.bf16.gmra.mxu2 %v5726_v31 }
 0x17d   : > { %966 = vmatmul.bf16.gmra.mxu0 %v5733_v36 }
 0x184   : > { %1656 = vmatmul.bf16.gmra.mxu2 %v5733_v36 }
 0x18a   : > { %v5758_v46 = vpop.f32.mrf.mxu0 }
 0x18b   : > { %v988_v47 = vsel %vm5753_vm1, %v5758_v46, -1e+30 }
 0x18c   : > { %1004 = vmax.xlane.f32.xlu0 %v988_v47  ;;  %v836_v47 = vadd.s32 88, %v5738_v39 }
 0x18e   : > { %v853_v51 = vadd.s32 %v5740_v40, %v836_v47 }
 0x190   : > { %vm5892_vm12 = vcmp.eq.s32.totalorder %v853_v51, %v5749_v42 }
 0x192   : > { %v5771_v52 = vpop.f32.mrf.mxu0 }
 0x193   : > { %v989_v53 = vsel %vm5766_vm2, %v5771_v52, -1e+30 }
 0x194   : > { %1006 = vmax.xlane.f32.xlu0 %v989_v53  ;;  %v9021_v53 = vmov 0 }
 0x195   : > { %v9022_v53 = vsel %vm5892_vm12, 4294967295, %v9021_v53 }
 0x196   : > { %9023 = vst [vmem:[#allocation23_spill] sm:$0xff] %v9022_v53 }
 0x19a   : > { %v5784_v58 = vpop.f32.mrf.mxu0 }
 0x19b   : > { %v990_v59 = vsel %vm5779_vm3, %v5784_v58, -1e+30 }
 0x19c   : > { %1008 = vmax.xlane.f32.xlu1 %v990_v59  ;;  %v854_v59 = vadd.s32 %v5740_v40, %v837_v54 }
 0x19e   : > { %vm5905_vm13 = vcmp.eq.s32.totalorder %v854_v59, %v5749_v42  ;;  %v5981_v59 = vld [vmem:[#allocation2 + $0x18] sm:$0xff] }
 0x19f   : > { %v9025_v60 = vsel %vm5905_vm13, 4294967295, %v9024_v60 }
 0x1a0   : > { %9026 = vst [vmem:[#allocation24_spill] sm:$0xff] %v9025_v60 }
 0x1a2   : > { %v5797_v0 = vpop.f32.mrf.mxu0 }
 0x1a3   : > { %v991_v1 = vsel %vm5792_vm4, %v5797_v0, -1e+30 }
 0x1a4   : > { %1010 = vmax.xlane.f32.xlu1 %v991_v1 }
 0x1aa   : > { %v5810_v5 = vpop.f32.mrf.mxu0 }
 0x1ab   : > { %v992_v6 = vsel %vm5805_vm5, %v5810_v5, -1e+30 }
 0x1ac   : > { %1012 = vmax.xlane.f32.xlu2 %v992_v6  ;;  %v9027_v6 = vmov 0 }
 0x1ad   : > { %v9028_v6 = vsel %vm5917_vm14, 4294967295, %v9027_v6 }
 0x1ae   : > { %9029 = vst [vmem:[#allocation25_spill] sm:$0xff] %v9028_v6 }
 0x1b2   : > { %v5822_v10 = vpop.f32.mrf.mxu0 }
 0x1b3   : > { %v993_v11 = vsel %vm5817_vm6, %v5822_v10, -1e+30 }
 0x1b4   : > { %1014 = vmax.xlane.f32.xlu2 %v993_v11 }
 0x1ba   : > { %v5835_v17 = vpop.f32.mrf.mxu0 }
 0x1bb   : > { %v994_v19 = vsel %vm5830_vm7, %v5835_v17, -1e+30 }
 0x1bc   : > { %1016 = vmax.xlane.f32.xlu0 %v994_v19  ;;  %v840_v19 = vadd.s32 120, %v5738_v39 }
 0x1c2   : > { %v5847_v25 = vpop.f32.mrf.mxu0 }
 0x1c3   : > { %v995_v26 = vsel %vm5842_vm8, %v5847_v25, -1e+30 }
 0x1c4   : > { %1018 = vmax.xlane.f32.xlu1 %v995_v26  ;;  %v857_v26 = vadd.s32 %v5740_v40, %v840_v19  ;;  %v6003_v19 = vld [vmem:[#allocation2 + $0x28] sm:$0xff] }
 0x1ca   : > { %v5860_v32 = vpop.f32.mrf.mxu0 }
 0x1cb   : > { %v996_v33 = vsel %vm5855_vm9, %v5860_v32, -1e+30 }
 0x1cc   : > { %1020 = vmax.xlane.f32.xlu2 %v996_v33 }
 0x1d2   : > { %v5872_v38 = vpop.f32.mrf.mxu0 }
 0x1d3   : > { %v997_v41 = vsel %vm5867_vm10, %v5872_v38, -1e+30 }
 0x1d4   : > { %1022 = vmax.xlane.f32.xlu0 %v997_v41  ;;  %v5960_v41 = vld [vmem:[#allocation2 + $0x8] sm:$0xff] }
 0x1da   : > { %v5885_v48 = vpop.f32.mrf.mxu0 }
 0x1db   : > { %v998_v49 = vsel %vm5880_vm11, %v5885_v48, -1e+30 }
 0x1dc   : > { %1024 = vmax.xlane.f32.xlu1 %v998_v49  ;;  %v5971_v49 = vld [vmem:[#allocation2 + $0x10] sm:$0xff] }
 0x1e2   : > { %v5897_v55 = vpop.f32.mrf.mxu0 }
 0x1e3   : > { %v999_v57 = vsel %vm5892_vm12, %v5897_v55, -1e+30 }
 0x1e4   : > { %1026 = vmax.xlane.f32.xlu2 %v999_v57 }
 0x1ea   : > { %v5910_v63 = vpop.f32.mrf.mxu0 }
 0x1eb   : > { %v1000_v1 = vsel %vm5905_vm13, %v5910_v63, -1e+30  ;;  %vm5947_vm13 = vcmp.eq.s32.totalorder %v857_v26, %v5749_v42 }
 0x1ec   : > { %1028 = vmax.xlane.f32.xlu0 %v1000_v1  ;;  %v9036_v34 = vsel %vm5947_vm13, 4294967295, %v9035_v34 }
 0x1ed   : > { %9037 = vst [vmem:[#allocation29_spill] sm:$0xff] %v9036_v34 }
 0x1f2   : > { %v5922_v9 = vpop.f32.mrf.mxu0 }
 0x1f3   : > { %9030 = vst [vmem:[#allocation26_spill] sm:$0xff] %v5922_v9  ;;  %v1001_v11 = vsel %vm5917_vm14, %v5922_v9, -1e+30 }
 0x1f4   : > { %1030 = vmax.xlane.f32.xlu1 %v1001_v11 }
 0x1fa   : > { %v5935_v20 = vpop.f32.mrf.mxu0 }
 0x1fb   : > { %9034 = vst [vmem:[#allocation28_spill] sm:$0xff] %v5935_v20  ;;  %v1002_v23 = vsel %vm5930_vm15, %v5935_v20, -1e+30 }
 0x1fc   : > { %1032 = vmax.xlane.f32.xlu2 %v1002_v23 }
 0x1ff   : > { %v1005_v30 = vpop.xlane.xlu0 %1004 }
 0x200   : > { %v5944_v33 = vmax.f32 %v5941_v28, %v1005_v30 }
 0x202   : > { %1549 = vst.msk [vmem:[#allocation2] sm:$0xff] %vm8871_vm0, %v5944_v33  ;;  %v5955_v37 = vpop.f32.mrf.mxu0 }
 0x203   : > { %9038 = vst [vmem:[#allocation30_spill] sm:$0xff] %v5955_v37  ;;  %v1003_v40 = vsel %vm5947_vm13, %v5955_v37, -1e+30  ;;  %v6085_v37 = vld [vmem:[#allocation2 + $0x60] sm:$0xff] }
 0x204   : > { %1034 = vmax.xlane.f32.xlu0 %v1003_v40  ;;  %v6013_v40 = vpop.f32.mrf.mxu2  ;;  %9048 = vst [vmem:[#allocation40_spill] sm:$0xff] %v6085_v37 }
 0x207   : > { %v1007_v42 = vpop.xlane.xlu0 %1006 }
 0x208   : > { %v5964_v43 = vmax.f32 %v5960_v41, %v1007_v42  ;;  %v6015_v42 = vld [vmem:[#allocation2 + $0x30] sm:$0xff] }
 0x20a   : > { %1550 = vst.msk [vmem:[#allocation2 + $0x8] sm:$0xff] %vm8871_vm0, %v5964_v43 }
 0x20d   : > { %1102 = vperm.xlu1 %4991, %v5944_v33  }
 0x20f   : > { %v1009_v51 = vpop.xlane.xlu1 %1008 }
 0x210   : > { %v5974_v54 = vmax.f32 %v5971_v49, %v1009_v51 }
 0x212   : > { %1551 = vst.msk [vmem:[#allocation2 + $0x10] sm:$0xff] %vm8871_vm0, %v5974_v54 }
 0x214   : > { %1107 = vperm.xlu2 %4992, %v5964_v43  }
 0x217   : > { %v1011_v61 = vpop.xlane.xlu1 %1010 }
 0x218   : > { %v5985_v1 = vmax.f32 %v5981_v59, %v1011_v61  ;;  %1112 = vperm.xlu0 %4993, %v5974_v54  }
 0x21a   : > { %1552 = vst.msk [vmem:[#allocation2 + $0x18] sm:$0xff] %vm8871_vm0, %v5985_v1 }
 0x21c   : > { %1117 = vperm.xlu2 %4992, %v5985_v1  }
 0x21f   : > { %v1013_v7 = vpop.xlane.xlu2 %1012 }
 0x220   : > { %v5996_v11 = vmax.f32 %v5993_v4, %v1013_v7  ;;  %v6037_v7 = vld [vmem:[#allocation2 + $0x40] sm:$0xff] }
 0x222   : > { %1553 = vst.msk [vmem:[#allocation2 + $0x20] sm:$0xff] %vm8871_vm0, %v5996_v11  ;;  %1122 = vperm.xlu1 %4991, %v5996_v11  }
 0x227   : > { %v1015_v23 = vpop.xlane.xlu2 %1014 }
 0x228   : > { %v6006_v26 = vmax.f32 %v6003_v19, %v1015_v23  ;;  %v6025_v23 = vpop.f32.mrf.mxu2 }
 0x22a   : > { %1554 = vst.msk [vmem:[#allocation2 + $0x28] sm:$0xff] %vm8871_vm0, %v6006_v26  ;;  %1127 = vperm.xlu2 %4992, %v6006_v26  }
 0x22f   : > { %v1017_v51 = vpop.xlane.xlu0 %1016 }
 0x230   : > { %v6018_v61 = vmax.f32 %v6015_v42, %v1017_v51  ;;  %v6039_v39 = vpop.f32.mrf.mxu2  ;;  %v6049_v51 = vld [vmem:[#allocation2 + $0x48] sm:$0xff] }
 0x231   : > { %9041 = vst [vmem:[#allocation33_spill] sm:$0xff] %v6049_v51 }
 0x232   : > { %1555 = vst.msk [vmem:[#allocation2 + $0x30] sm:$0xff] %vm8871_vm0, %v6018_v61  ;;  %1132 = vperm.xlu1 %4991, %v6018_v61  }
 0x237   : > { %v1019_v57 = vpop.xlane.xlu1 %1018 }
 0x238   : > { %v6030_v2 = vmax.f32 %v6027_v13, %v1019_v57  ;;  %v6054_v27 = vpop.f32.mrf.mxu2  ;;  %v6061_v57 = vld [vmem:[#allocation2 + $0x50] sm:$0xff] }
 0x239   : > { %9043 = vst [vmem:[#allocation35_spill] sm:$0xff] %v6054_v27 }
 0x23a   : > { %9040 = vst [vmem:[#allocation32_spill] sm:$0xff] %v6030_v2  ;;  %1137 = vperm.xlu2 %4992, %v6030_v2  }
 0x23b   : > { %1556 = vst.msk [vmem:[#allocation2 + $0x38] sm:$0xff] %vm8871_vm0, %v6030_v2 }
 0x23c   : > { %9044 = vst [vmem:[#allocation36_spill] sm:$0xff] %v6061_v57 }
 0x23f   : > { %v1021_v30 = vpop.xlane.xlu2 %1020 }
 0x240   : > { %v6042_v47 = vmax.f32 %v6037_v7, %v1021_v30  ;;  %v6071_v30 = vpop.f32.mrf.mxu2 }
 0x241   : > { %9046 = vst [vmem:[#allocation38_spill] sm:$0xff] %v6071_v30 }
 0x242   : > { %1557 = vst.msk [vmem:[#allocation2 + $0x40] sm:$0xff] %vm8871_vm0, %v6042_v47  ;;  %1142 = vperm.xlu1 %4991, %v6042_v47  }
 0x247   : > { %v1023_v36 = vpop.xlane.xlu0 %1022 }
 0x248   : > { %v6052_v31 = vmax.f32 %v6049_v51, %v1023_v36  ;;  %v6083_v36 = vpop.f32.mrf.mxu2 }
 0x249   : > { %9047 = vst [vmem:[#allocation39_spill] sm:$0xff] %v6083_v36 }
 0x24a   : > { %9042 = vst [vmem:[#allocation34_spill] sm:$0xff] %v6052_v31  ;;  %1147 = vperm.xlu0 %4993, %v6052_v31  }
 0x24b   : > { %1558 = vst.msk [vmem:[#allocation2 + $0x48] sm:$0xff] %vm8871_vm0, %v6052_v31 }
 0x24f   : > { %v1025_v24 = vpop.xlane.xlu1 %1024 }
 0x250   : > { %v6064_v21 = vmax.f32 %v6061_v57, %v1025_v24  ;;  %v6095_v24 = vld [vmem:[#allocation2 + $0x68] sm:$0xff]  ;;  %v6097_v20 = vpop.f32.mrf.mxu2 }
 0x251   : > { %9050 = vst [vmem:[#allocation42_spill] sm:$0xff] %v6095_v24 }
 0x252   : > { %9045 = vst [vmem:[#allocation37_spill] sm:$0xff] %v6064_v21  ;;  %1152 = vperm.xlu2 %4992, %v6064_v21  }
 0x253   : > { %1559 = vst.msk [vmem:[#allocation2 + $0x50] sm:$0xff] %vm8871_vm0, %v6064_v21 }
 0x254   : > { %9051 = vst [vmem:[#allocation43_spill] sm:$0xff] %v6097_v20 }
 0x257   : > { %v1027_v15 = vpop.xlane.xlu2 %1026 }
 0x258   : > { %v6076_v12 = vmax.f32 %v6073_v18, %v1027_v15  ;;  %v6107_v15 = vld [vmem:[#allocation2 + $0x70] sm:$0xff]  ;;  %v6112_v13 = vpop.f32.mrf.mxu2 }
 0x259   : > { %9053 = vst [vmem:[#allocation45_spill] sm:$0xff] %v6107_v15 }
 0x25a   : > { %1560 = vst.msk [vmem:[#allocation2 + $0x58] sm:$0xff] %vm8871_vm0, %v6076_v12  ;;  %1157 = vperm.xlu1 %4991, %v6076_v12  }
 0x25b   : > { %9055 = vst [vmem:[#allocation47_spill] sm:$0xff] %v6112_v13 }
 0x25f   : > { %v1029_v21 = vpop.xlane.xlu0 %1028 }
 0x260   : > { %v6088_v57 = vmax.f32 %v6085_v37, %v1029_v21  ;;  %v6119_v21 = vld [vmem:[#allocation2 + $0x78] sm:$0xff] }
 0x261   : > { %9056 = vst [vmem:[#allocation48_spill] sm:$0xff] %v6119_v21 }
 0x262   : > { %9049 = vst [vmem:[#allocation41_spill] sm:$0xff] %v6088_v57  ;;  %1162 = vperm.xlu0 %4993, %v6088_v57  }
 0x263   : > { %1561 = vst.msk [vmem:[#allocation2 + $0x60] sm:$0xff] %vm8871_vm0, %v6088_v57 }
 0x267   : > { %v1031_v9 = vpop.xlane.xlu1 %1030 }
 0x268   : > { %v6100_v2 = vmax.f32 %v6095_v24, %v1031_v9  ;;  %v6129_v9 = vpop.f32.mrf.mxu2 }
 0x269   : > { %9058 = vst [vmem:[#allocation50_spill] sm:$0xff] %v6129_v9 }
 0x26a   : > { %9052 = vst [vmem:[#allocation44_spill] sm:$0xff] %v6100_v2  ;;  %1167 = vperm.xlu2 %4992, %v6100_v2  }
 0x26b   : > { %1562 = vst.msk [vmem:[#allocation2 + $0x68] sm:$0xff] %vm8871_vm0, %v6100_v2 }
 0x26f   : > { %v1033_v37 = vpop.xlane.xlu2 %1032 }
 0x270   : > { %v6110_v57 = vmax.f32 %v6107_v15, %v1033_v37  ;;  %v6131_v15 = vpop.f32.mrf.mxu2 }
 0x271   : > { %9059 = vst [vmem:[#allocation51_spill] sm:$0xff] %v6131_v15 }
 0x272   : > { %9054 = vst [vmem:[#allocation46_spill] sm:$0xff] %v6110_v57  ;;  %1172 = vperm.xlu1 %4991, %v6110_v57  }
 0x273   : > { %1563 = vst.msk [vmem:[#allocation2 + $0x70] sm:$0xff] %vm8871_vm0, %v6110_v57  ;;  %v1680_v57 = vsel %vm5766_vm2, %v6025_v23, -1e+30 }
 0x277   : > { %v1035_v24 = vpop.xlane.xlu0 %1034 }
 0x278   : > { %v6122_v2 = vmax.f32 %v6119_v21, %v1035_v24  ;;  %v6133_v31 = vpop.f32.mrf.mxu2  ;;  %v1683_v24 = vsel %vm5805_vm5, %v6071_v30, -1e+30  ;;  %v1686_v21 = vsel %vm5842_vm8, %v6112_v13, -1e+30  ;;  %v1687_v13 = vsel %vm5855_vm9, %v6129_v9, -1e+30 }
 0x279   : > { %9060 = vst [vmem:[#allocation52_spill] sm:$0xff] %v6133_v31 }
 0x27a   : > { %9057 = vst [vmem:[#allocation49_spill] sm:$0xff] %v6122_v2  ;;  %1177 = vperm.xlu0 %4993, %v6122_v2  }
 0x27b   : > { %1564 = vst.msk [vmem:[#allocation2 + $0x78] sm:$0xff] %vm8871_vm0, %v6122_v2  ;;  %v1681_v2 = vsel %vm5779_vm3, %v6039_v39, -1e+30  ;;  %vm9065_vm0 = vnez %v9025_v60 }
 0x27f   : > { %v1103_v9 = vpop.permute.xlu1 %1102 }
 0x280   : > { %v6141_v37 = vpop.f32.mrf.mxu2 }
 0x281   : > { %9061 = vst [vmem:[#allocation53_spill] sm:$0xff] %v6141_v37 }
 0x288   : > { %v6149_v51 = vpop.f32.mrf.mxu2 }
 0x290   : > { %v6166_v30 = vpop.f32.mrf.mxu2 }
 0x291   : > { %9062 = vst [vmem:[#allocation54_spill] sm:$0xff] %v6166_v30 }
 0x293   : > { %1697 = vmax.xlane.f32.xlu2 %v1680_v57  ;;  %v1679_v57 = vsel %vm5753_vm1, %v6013_v40, -1e+30 }
 0x29b   : > { %1703 = vmax.xlane.f32.xlu2 %v1683_v24  ;;  %v1684_v24 = vsel %vm5817_vm6, %v6083_v36, -1e+30  ;;  %v1180_v36 = vsub.f32 %v5758_v46, %v1103_v9 }
 0x29c   : > { %1699 = vmax.xlane.f32.xlu1 %v1681_v2  ;;  %v1689_v2 = vsel %vm5880_vm11, %v6133_v31, -1e+30  ;;  %v6177_v31 = vpop.f32.mrf.mxu2 }
 0x29d   : > { %9063 = vst [vmem:[#allocation55_spill] sm:$0xff] %v6177_v31 }
 0x2a3   : > { %1709 = vmax.xlane.f32.xlu2 %v1686_v21  ;;  %v1682_v21 = vsel %vm5792_vm4, %v6054_v27, -1e+30 }
 0x2a4   : > { %1695 = vmax.xlane.f32.xlu0 %v1679_v57  ;;  %1705 = vmax.xlane.f32.xlu1 %v1684_v24  ;;  %v1692_v57 = vsel %vm5917_vm14, %v6166_v30, -1e+30  ;;  %v1690_v24 = vsel %vm5892_vm12, %v6141_v37, -1e+30  ;;  %v1693_v30 = vsel %vm5930_vm15, %v6177_v31, -1e+30 }
 0x2ab   : > { %1715 = vmax.xlane.f32.xlu2 %v1689_v2  ;;  %v1685_v2 = vsel %vm5830_vm7, %v6097_v20, -1e+30  ;;  %v1691_v20 = vsel %vm9065_vm0, %v6149_v51, -1e+30 }
 0x2ac   : > { %1701 = vmax.xlane.f32.xlu0 %v1682_v21  ;;  %1711 = vmax.xlane.f32.xlu1 %v1687_v13  ;;  %v1108_v13 = vpop.permute.xlu2 %1107  ;;  %v1688_v21 = vsel %vm5867_vm10, %v6131_v15, -1e+30  ;;  %v1123_v15 = vpop.permute.xlu1 %1122 }
 0x2ad   : > { %v1181_v27 = vsub.f32 %v5771_v52, %v1108_v13 }
 0x2b3   : > { %1721 = vmax.xlane.f32.xlu2 %v1692_v57  ;;  %v9064_v57 = vsub.f32 %v5960_v41, %v5964_v43  ;;  %v6196_v41 = vpop.f32.mrf.mxu2  ;;  %v9066_v43 = vsub.f32 %v6003_v19, %v6006_v26  ;;  %v1184_v26 = vsub.f32 %v5810_v5, %v1123_v15 }
 0x2b4   : > { %1707 = vmax.xlane.f32.xlu0 %v1685_v2  ;;  %1717 = vmax.xlane.f32.xlu1 %v1690_v24  ;;  %v1118_v2 = vpop.permute.xlu2 %1117  ;;  %v1113_v24 = vpop.permute.xlu0 %1112  ;;  %v1694_v52 = vsel %vm5947_vm13, %v6196_v41, -1e+30 }
 0x2b5   : > { %v1070_v37 = vmul.f32 1.442695, %v9064_v57  ;;  %v1182_v31 = vsub.f32 %v5784_v58, %v1113_v24  ;;  %v1197_v57 = vsel %vm5766_vm2, %v1181_v27, 0.0  ;;  %v1183_v19 = vsub.f32 %v5797_v0, %v1118_v2  ;;  %v1133_v13 = vpop.permute.xlu1 %1132 }
 0x2b6   : > { %v1200_v24 = vsel %vm5805_vm5, %v1184_v26, 0.0  ;;  %v9068_v0 = vsub.f32 %v6037_v7, %v6042_v47  ;;  %v1186_v15 = vsub.f32 %v5835_v17, %v1133_v13  ;;  %v9072_v17 = vsub.f32 %v5971_v49, %v5974_v54 }
 0x2b7   : > { %4995 = vpow2.f32 %v1070_v37  ;;  %v1198_v46 = vsel %vm5779_vm3, %v1182_v31, 0.0  ;;  %v1199_v31 = vsel %vm5792_vm4, %v1183_v19, 0.0  ;;  %v9073_v19 = vsub.f32 %v6073_v18, %v6076_v12 }
 0x2b8   : > { %v1072_v7 = vmul.f32 1.442695, %v9072_v17  ;;  %v9075_v49 = vsub.f32 %v6015_v42, %v6018_v61 }
 0x2b9   : > { %v1090_v26 = vmul.f32 1.442695, %v9073_v19 }
 0x2ba   : > { %v1080_v54 = vmul.f32 1.442695, %v9075_v49 }
 0x2bc   : > { %1713 = vmax.xlane.f32.xlu0 %v1688_v21  ;;  %1723 = vmax.xlane.f32.xlu1 %v1693_v30  ;;  %v1196_v30 = vsel %vm5753_vm1, %v1180_v36, 0.0  ;;  %v1078_v21 = vmul.f32 1.442695, %v9066_v43  ;;  %v1128_v37 = vpop.permute.xlu2 %1127  ;;  %v9070_v43 = vsub.f32 %v5981_v59, %v5985_v1  ;;  %v1148_v59 = vpop.permute.xlu0 %1147 }
 0x2bd   : > { %v1212_v9 = vadd.f32 %v1197_v57, %v1196_v30  ;;  %v6208_v58 = vpop.eup %4995  ;;  %v1185_v5 = vsub.f32 %v5822_v10, %v1128_v37  ;;  %v1202_v10 = vsel %vm5830_vm7, %v1186_v15, 0.0  ;;  %v1189_v37 = vsub.f32 %v5872_v38, %v1148_v59 }
 0x2be   : > { %4997 = vpow2.f32 %v1078_v21  ;;  %v1074_v21 = vmul.f32 1.442695, %v9070_v43  ;;  %v9077_v38 = vsub.f32 %v5993_v4, %v5996_v11  ;;  %v9079_v4 = vld [vmem:[#allocation33_spill] sm:$0xff]  ;;  %v9080_v11 = vld [vmem:[#allocation34_spill] sm:$0xff] }
 0x2bf   : > { %v1213_v27 = vadd.f32 %v1212_v9, %v1198_v46  ;;  %v1143_v46 = vpop.permute.xlu1 %1142  ;;  %v1201_v47 = vsel %vm5817_vm6, %v1185_v5, 0.0  ;;  %v1205_v18 = vsel %vm5867_vm10, %v1189_v37, 0.0 }
 0x2c0   : > { %v1076_v42 = vmul.f32 1.442695, %v9077_v38 }
 0x2c4   : > { %1719 = vmax.xlane.f32.xlu0 %v1691_v20  ;;  %v9067_v20 = vsub.f32 %v5941_v28, %v5944_v33  ;;  %v1214_v28 = vadd.f32 %v1213_v27, %v1199_v31  ;;  %v1084_v33 = vmul.f32 1.442695, %v9068_v0  ;;  %v6225_v30 = vpop.eup %4997  ;;  %v1138_v57 = vpop.permute.xlu2 %1137 }
 0x2c5   : > { %9069 = vst [vmem:[#allocation56_spill] sm:$0xff] %v6225_v30  ;;  %v1187_v1 = vsub.f32 %v5847_v25, %v1138_v57 }
 0x2c6   : > { %v1068_v36 = vmul.f32 1.442695, %v9067_v20  ;;  %v1215_v2 = vadd.f32 %v1214_v28, %v1200_v24  ;;  %v1188_v20 = vsub.f32 %v5860_v32, %v1143_v46 }
 0x2c7   : > { %v1203_v13 = vsel %vm5842_vm8, %v1187_v1, 0.0 }
 0x2c8   : > { %4999 = vpow2.f32 %v1068_v36  ;;  %v1204_v25 = vsel %vm5855_vm9, %v1188_v20, 0.0 }
 0x2c9   : > { %5001 = vpow2.f32 %v1084_v33 }
 0x2ca   : > { %5003 = vpow2.f32 %v1074_v21  ;;  %v9081_v21 = vsub.f32 %v9079_v4, %v9080_v11  ;;  %v9094_v4 = vld [vmem:[#allocation30_spill] sm:$0xff] }
 0x2cb   : > { %1371 = vperm.xlu2 %4992, %v6208_v58   ;;  %5005 = vpow2.f32 %v1072_v7  ;;  %v9082_v7 = vld [vmem:[#allocation31_spill] sm:$0xff] }
 0x2cc   : > { %1725 = vmax.xlane.f32.xlu0 %v1694_v52  ;;  %v1216_v52 = vadd.f32 %v1215_v2, %v1201_v47  ;;  %v1153_v32 = vpop.permute.xlu2 %1152  ;;  %v1158_v24 = vpop.permute.xlu1 %1157  ;;  %5007 = vpow2.f32 %v1090_v26  ;;  %v1086_v57 = vmul.f32 1.442695, %v9081_v21  ;;  %v9086_v26 = vld [vmem:[#allocation28_spill] sm:$0xff] }
 0x2cd   : > { %5009 = vpow2.f32 %v1080_v54  ;;  %v1190_v0 = vsub.f32 %v5885_v48, %v1153_v32  ;;  %v1191_v33 = vsub.f32 %v5897_v55, %v1158_v24  ;;  %v724_v21 = vld [vmem:[%s5483_s15 + $0x38] sm:$0xff]  }
 0x2ce   : > { %v6231_v9 = vpop.eup %4999  ;;  %v1217_v36 = vadd.f32 %v1216_v52, %v1202_v10  ;;  %5011 = vpow2.f32 %v1076_v42  ;;  %v9083_v52 = vld [vmem:[#allocation32_spill] sm:$0xff] }
 0x2cf   : > { %9071 = vst [vmem:[#allocation57_spill] sm:$0xff] %v6231_v9  ;;  %v6247_v27 = vpop.eup %5001  ;;  %v1206_v46 = vsel %vm5880_vm11, %v1190_v0, 0.0  ;;  %v1207_v48 = vsel %vm5892_vm12, %v1191_v33, 0.0  ;;  %v9084_v59 = vsub.f32 %v9082_v7, %v9083_v52  ;;  %5013 = vpow2.f32 %v1086_v57  ;;  %v9092_v0 = vld [vmem:[#allocation37_spill] sm:$0xff]  ;;  %v740_v57 = vld [vmem:[%s5488_s24 + $0x38] sm:$0xff]  }
 0x2d0   : > { %9074 = vst [vmem:[#allocation58_spill] sm:$0xff] %v6247_v27  ;;  %v1218_v31 = vadd.f32 %v1217_v36, %v1203_v13  ;;  %v6257_v12 = vpop.eup %5003  ;;  %v9085_v36 = vld [vmem:[#allocation26_spill] sm:$0xff]  ;;  %v9087_v13 = vld [vmem:[#allocation40_spill] sm:$0xff] }
 0x2d1   : > { %9076 = vst [vmem:[#allocation59_spill] sm:$0xff] %v6257_v12  ;;  %v6267_v5 = vpop.eup %5005  ;;  %v1082_v1 = vmul.f32 1.442695, %v9084_v59 }
 0x2d2   : > { %v1219_v61 = vadd.f32 %v1218_v31, %v1204_v25  ;;  %v6271_v43 = vpop.eup %5007  ;;  %v9088_v25 = vld [vmem:[#allocation41_spill] sm:$0xff] }
 0x2d3   : > { %1391 = vperm.xlu2 %4992, %v6225_v30   ;;  %9078 = vst [vmem:[#allocation60_spill] sm:$0xff] %v6271_v43  ;;  %5015 = vpow2.f32 %v1082_v1  ;;  %v9089_v32 = vsub.f32 %v9087_v13, %v9088_v25 }
 0x2d4   : > { %v1163_v28 = vpop.permute.xlu0 %1162  ;;  %v1220_v15 = vadd.f32 %v1219_v61, %v1205_v18  ;;  %v1168_v55 = vpop.permute.xlu2 %1167 }
 0x2d5   : > { %1366 = vperm.xlu1 %4991, %v6231_v9   ;;  %v1192_v2 = vsub.f32 %v5910_v63, %v1163_v28  ;;  %v6281_v63 = vpop.eup %5009  ;;  %v1193_v19 = vsub.f32 %v9085_v36, %v1168_v55  ;;  %v1092_v31 = vmul.f32 1.442695, %v9089_v32  ;;  %v9091_v28 = vld [vmem:[#allocation36_spill] sm:$0xff]  ;;  %v772_v55 = vunpack.c.l.bf16 %v740_v57  ;;  %v722_v32 = vld [vmem:[%s5483_s15 + $0x30] sm:$0xff]  }
 0x2d6   : > { %v1221_v47 = vadd.f32 %v1220_v15, %v1206_v46  ;;  %v6291_v49 = vpop.eup %5011  ;;  %v9093_v33 = vsub.f32 %v9091_v28, %v9092_v0  ;;  %v756_v46 = vunpack.c.l.bf16 %v724_v21 }
 0x2d7   : > { %v1208_v10 = vsel %vm9065_vm0, %v1192_v2, 0.0  ;;  %v1209_v24 = vsel %vm5917_vm14, %v1193_v19, 0.0  ;;  %v6301_v42 = vpop.eup %5013  ;;  %5017 = vpow2.f32 %v1092_v31  ;;  %v738_v31 = vld [vmem:[%s5488_s24 + $0x30] sm:$0xff]  }
 0x2d8   : > { %v1222_v20 = vadd.f32 %v1221_v47, %v1207_v48  ;;  %9090 = vst [vmem:[#allocation33_spill] sm:$0xff] %v6301_v42  ;;  %v1088_v15 = vmul.f32 1.442695, %v9093_v33  ;;  %v757_v48 = vunpack.c.h.bf16 %v724_v21  ;;  %v773_v47 = vunpack.c.h.bf16 %v740_v57 }
 0x2d9   : > { %v788_v52 = vmul.f32 %v772_v55, %v756_v46  ;;  %v771_v28 = vunpack.c.h.bf16 %v738_v31  ;;  %v720_v46 = vld [vmem:[%s5483_s15 + $0x28] sm:$0xff]  }
 0x2da   : > { %v1223_v54 = vadd.f32 %v1222_v20, %v1208_v10  ;;  %v6310_v10 = vpop.eup %5015  ;;  %v789_v59 = vmul.f32 %v773_v47, %v757_v48  ;;  %5019 = vpow2.f32 %v1088_v15  ;;  %v736_v48 = vld [vmem:[%s5488_s24 + $0x28] sm:$0xff]   ;;  %v752_v55 = vunpack.c.l.bf16 %v720_v46 }
 0x2db   : > { %1406 = vperm.xlu2 %4992, %v6247_v27   ;;  %9095 = vst [vmem:[#allocation34_spill] sm:$0xff] %v6310_v10  ;;  %v753_v47 = vunpack.c.h.bf16 %v720_v46 }
 0x2dc   : > { %v1224_v38 = vadd.f32 %v1223_v54, %v1209_v24  ;;  %v797_v20 = vpack.c.bf16 %v789_v59, %v788_v52 }
 0x2dd   : > { %1381 = vperm.xlu1 %4991, %v6257_v12   ;;  %v6315_v36 = vpop.eup %5017 }
 0x2de   : > { %9096 = vst [vmem:[#allocation31_spill] sm:$0xff] %v6315_v36  ;;  %2257 = vmatpush.bf16.xpose.msrb.mxu1 %v797_v20  ;;  %2804 = vmatpush.bf16.msrb.mxu3 %v797_v20  ;;  %v9102_v20 = vmov 0 }
 0x2e0   : > { %1376 = vperm.xlu0 %4993, %v6267_v5   ;;  %v6323_v24 = vpop.eup %5019 }
 0x2e1   : > { %9100 = vst [vmem:[#allocation32_spill] sm:$0xff] %v6323_v24 }
 0x2e3   : > { %1421 = vperm.xlu2 %4992, %v6271_v43  }
 0x2e4   : > { %v1173_v17 = vpop.permute.xlu1 %1172 }
 0x2e5   : > { %1396 = vperm.xlu1 %4991, %v6281_v63   ;;  %v1194_v37 = vsub.f32 %v9086_v26, %v1173_v17  ;;  %v9097_v26 = vld [vmem:[#allocation42_spill] sm:$0xff] }
 0x2e7   : > { %v1210_v18 = vsel %vm5930_vm15, %v1194_v37, 0.0  ;;  %v9098_v37 = vld [vmem:[#allocation44_spill] sm:$0xff]  ;;  %vm6347_vm15 = vmpackc.low %vm5842_vm8, %vm5830_vm7 }
 0x2e8   : > { %1386 = vperm.xlu0 %4993, %v6291_v49   ;;  %v1225_v2 = vadd.f32 %v1224_v38, %v1210_v18  ;;  %v9099_v54 = vsub.f32 %v9097_v26, %v9098_v37  ;;  %v754_v18 = vunpack.c.l.bf16 %v722_v32  ;;  %v755_v38 = vunpack.c.h.bf16 %v722_v32  ;;  %v6367_v32 = vld [vmem:[#allocation2 + $0xa0] sm:$0xff] }
 0x2ea   : > { %v1094_v13 = vmul.f32 1.442695, %v9099_v54  ;;  %v787_v15 = vmul.f32 %v771_v28, %v755_v38  ;;  %v9105_v54 = vmov 0  ;;  %v6371_v38 = vld [vmem:[#allocation2 + $0x90] sm:$0xff] }
 0x2eb   : > { %v9106_v54 = vsel %vm6347_vm15, 4294967295, %v9105_v54 }
 0x2ec   : > { %v1178_v61 = vpop.permute.xlu0 %1177  ;;  %5021 = vpow2.f32 %v1094_v13  ;;  %9107 = vst [vmem:[#allocation40_spill] sm:$0xff] %v9106_v54 }
 0x2ed   : > { %v1195_v11 = vsub.f32 %v9094_v4, %v1178_v61  ;;  %1411 = vperm.xlu1 %4991, %v6301_v42   ;;  %v770_v61 = vunpack.c.l.bf16 %v738_v31  ;;  %v718_v31 = vld [vmem:[%s5483_s15 + $0x20] sm:$0xff]   ;;  %v1349_v42 = vld [vmem:[#allocation4 + $0xd0] sm:$0xff] }
 0x2ee   : > { %v751_v28 = vunpack.c.h.bf16 %v718_v31 }
 0x2ef   : > { %v1211_v17 = vsel %vm5947_vm13, %v1195_v11, 0.0  ;;  %v786_v33 = vmul.f32 %v770_v61, %v754_v18  ;;  %vm6337_vm13 = vmpackc.low %vm5766_vm2, %vm5753_vm1  ;;  %vm9108_vm1 = vcmask 7168   ;;  %v734_v18 = vld [vmem:[%s5488_s24 + $0x20] sm:$0xff]   ;;  %v750_v61 = vunpack.c.l.bf16 %v718_v31 }
 0x2f0   : > { %v1226_v7 = vadd.f32 %v1225_v2, %v1211_v17  ;;  %1401 = vperm.xlu0 %4993, %v6310_v10   ;;  %v768_v17 = vunpack.c.l.bf16 %v736_v48  ;;  %v9103_v20 = vsel %vm6337_vm13, 4294967295, %v9102_v20 }
 0x2f1   : > { %v796_v4 = vpack.c.bf16 %v787_v15, %v786_v33  ;;  %9104 = vst [vmem:[#allocation28_spill] sm:$0xff] %v9103_v20  ;;  %v767_v15 = vunpack.c.h.bf16 %v734_v18 }
 0x2f2   : > { %v1227_v1 = vrot.slane %v1226_v7, 4  ;;  %v6326_v57 = vpop.eup %5021  ;;  %v784_v52 = vmul.f32 %v768_v17, %v752_v55  ;;  %v6384_v55 = vld [vmem:[#allocation2 + $0xb8] sm:$0xff] }
 0x2f3   : > { %2258 = vmatpush.bf16.xpose.msrb.mxu1 %v796_v4  ;;  %2805 = vmatpush.bf16.msrb.mxu3 %v796_v4  ;;  %9101 = vst [vmem:[#allocation26_spill] sm:$0xff] %v6326_v57  ;;  %v783_v46 = vmul.f32 %v767_v15, %v751_v28  ;;  %v732_v17 = vld [vmem:[%s5488_s24 + $0x18] sm:$0xff]  }
 0x2f4   : > { %v1228_v19 = vadd.f32 %v1227_v1, %v1226_v7  ;;  %v769_v7 = vunpack.c.h.bf16 %v736_v48  ;;  %v6331_v1 = vld [vmem:[#allocation2 + $0x88] sm:$0xff]  ;;  %9110 = vst [vmem:[#allocation41_spill] sm:$0xff] %v6384_v55  ;;  %v764_v31 = vunpack.c.l.bf16 %v732_v17  ;;  %v765_v28 = vunpack.c.h.bf16 %v732_v17 }
 0x2f5   : > { %1426 = vperm.xlu1 %4991, %v6315_v36  }
 0x2f6   : > { %v1229_v25 = vrot.slane %v1228_v19, 2  ;;  %v785_v59 = vmul.f32 %v769_v7, %v753_v47  ;;  %v716_v47 = vld [vmem:[%s5483_s15 + $0x18] sm:$0xff]   ;;  %v6388_v7 = vld [vmem:[#allocation2 + $0x80] sm:$0xff] }
 0x2f8   : > { %v1230_v0 = vadd.f32 %v1229_v25, %v1228_v19  ;;  %1416 = vperm.xlu0 %4993, %v6323_v24   ;;  %v795_v19 = vpack.c.bf16 %v785_v59, %v784_v52  ;;  %v6390_v52 = vld [vmem:[#allocation2 + $0xa8] sm:$0xff]  ;;  %v9111_v59 = vmov 0 }
 0x2fa   : > { %v1231_v2 = vrot.slane %v1230_v0, 1  ;;  %2806 = vmatpush.bf16.msrb.mxu3 %v795_v19 }
 0x2fb   : > { %2259 = vmatpush.bf16.xpose.msrb.mxu1 %v795_v19  ;;  %v748_v19 = vunpack.c.l.bf16 %v716_v47 }
 0x2fc   : > { %v1232_v11 = vadd.f32 %v1231_v2, %v1230_v0  ;;  %v766_v0 = vunpack.c.l.bf16 %v734_v18 }
 0x2fe   : > { %v1233_v21 = vmul.f32 1.442695, %v1232_v11  ;;  %v782_v11 = vmul.f32 %v766_v0, %v750_v61  ;;  %v9114_v61 = vmov 0 }
 0x300   : > { %5023 = vpow2.f32 %v1233_v21  ;;  %1431 = vperm.xlu0 %4993, %v6326_v57   ;;  %v794_v48 = vpack.c.bf16 %v783_v46, %v782_v11 }
 0x302   : > { %2807 = vmatpush.bf16.msrb.mxu3 %v794_v48 }
 0x303   : > { %2260 = vmatpush.bf16.xpose.msrb.mxu1 %v794_v48 }
 0x306   : > { %v6341_v26 = vpop.eup %5023  ;;  %v1698_v37 = vpop.xlane.xlu2 %1697 }
 0x307   : > { %v6352_v13 = vmax.f32 %v6331_v1, %v1698_v37  ;;  %v6356_v25 = vpack.c.bf16 %v6341_v26, %v6341_v26  ;;  %v749_v37 = vunpack.c.h.bf16 %v716_v47 }
 0x309   : > { %2242 = vst.msk [vmem:[#allocation2 + $0x88] sm:$0xff] %vm9108_vm1, %v6352_v13  ;;  %4664 = vmatmul.msk.bf16.vlgmr.msrb.gmra.mxu0 %vm6337_vm13, %v6356_v25  ;;  %4673 = vmatmul.msk.bf16.vlgmr.msra.gmra.mxu1 %vm6347_vm15, %v6356_v25  ;;  %vm9109_vm15 = vmmov %vm9108_vm1  ;;  %v781_v48 = vmul.f32 %v765_v28, %v749_v37  ;;  %vm9118_vm13 = vcmask 7168   ;;  %v714_v37 = vld [vmem:[%s5483_s15 + $0x10] sm:$0xff]   ;;  %v6440_v28 = vld [vmem:[#allocation2 + $0xc0] sm:$0xff] }
 0x30a   : > { %1798 = vperm.xlu1 %4991, %v6352_v13   ;;  %9122 = vst [vmem:[#allocation44_spill] sm:$0xff] %v6440_v28 }
 0x30e   : > { %v1704_v33 = vpop.xlane.xlu2 %1703 }
 0x30f   : > { %v6374_v2 = vmax.f32 %v6367_v32, %v1704_v33  ;;  %v1700_v4 = vpop.xlane.xlu1 %1699 }
 0x310   : > { %v6377_v21 = vmax.f32 %v6371_v38, %v1700_v4  ;;  %v780_v4 = vmul.f32 %v764_v31, %v748_v19  ;;  %v6434_v19 = vld [vmem:[#allocation2 + $0xd0] sm:$0xff] }
 0x311   : > { %2245 = vst.msk [vmem:[#allocation2 + $0xa0] sm:$0xff] %vm9108_vm1, %v6374_v2  ;;  %vm6396_vm1 = vmpackc.low %vm5792_vm4, %vm5779_vm3  ;;  %v730_v31 = vld [vmem:[%s5488_s24 + $0x10] sm:$0xff]  }
 0x312   : > { %2243 = vst.msk [vmem:[#allocation2 + $0x90] sm:$0xff] %vm9109_vm15, %v6377_v21  ;;  %1803 = vperm.xlu0 %4993, %v6377_v21   ;;  %v9112_v59 = vsel %vm6396_vm1, 4294967295, %v9111_v59  ;;  %vm6404_vm15 = vmpackc.low %vm5867_vm10, %vm5855_vm9  ;;  %v793_v17 = vpack.c.bf16 %v781_v48, %v780_v4  ;;  %v762_v47 = vunpack.c.l.bf16 %v730_v31  ;;  %v763_v4 = vunpack.c.h.bf16 %v730_v31  ;;  %v6466_v31 = vld [vmem:[#allocation2 + $0xe8] sm:$0xff] }
 0x313   : > { %9113 = vst [vmem:[#allocation36_spill] sm:$0xff] %v9112_v59  ;;  %v9115_v61 = vsel %vm6404_vm15, 4294967295, %v9114_v61  ;;  %vm9119_vm9 = vmmov %vm9118_vm13 }
 0x314   : > { %9116 = vst [vmem:[#allocation37_spill] sm:$0xff] %v9115_v61  ;;  %vm9120_vm4 = vmmov %vm9119_vm9  ;;  %2261 = vmatpush.bf16.xpose.msrb.mxu1 %v793_v17  ;;  %2808 = vmatpush.bf16.msrb.mxu3 %v793_v17 }
 0x315   : > { %9121 = vst [vmem:[#allocation42_spill] sm:$0xff] %v6434_v19 }
 0x316   : > { %v1710_v18 = vpop.xlane.xlu2 %1709  ;;  %9127 = vst [vmem:[#allocation63_spill] sm:$0xff] %v6466_v31 }
 0x317   : > { %v6409_v0 = vmax.f32 %v6384_v55, %v1710_v18  ;;  %v1696_v33 = vpop.xlane.xlu0 %1695  ;;  %v1706_v15 = vpop.xlane.xlu1 %1705  ;;  %v6438_v18 = vld [vmem:[#allocation2 + $0x98] sm:$0xff] }
 0x318   : > { %v6412_v11 = vmax.f32 %v6388_v7, %v1696_v33  ;;  %v6415_v46 = vmax.f32 %v6390_v52, %v1706_v15  ;;  %v746_v33 = vunpack.c.l.bf16 %v714_v37  ;;  %v747_v15 = vunpack.c.h.bf16 %v714_v37  ;;  %v6470_v37 = vld [vmem:[#allocation2 + $0xd8] sm:$0xff] }
 0x319   : > { %9117 = vst [vmem:[#allocation30_spill] sm:$0xff] %v6409_v0  ;;  %4667 = vmatmul.msk.bf16.gmra.mxu0 %vm6396_vm1, %v6356_v25  ;;  %4676 = vmatmul.msk.bf16.gmra.mxu1 %vm6404_vm15, %v6356_v25  ;;  %vm9183_vm1 = vnez %v9014_v29 }
 0x31a   : > { %2248 = vst.msk [vmem:[#allocation2 + $0xb8] sm:$0xff] %vm9118_vm13, %v6409_v0  ;;  %1793 = vperm.xlu2 %4992, %v6412_v11   ;;  %1818 = vperm.xlu1 %4991, %v6415_v46   ;;  %v778_v57 = vmul.f32 %v762_v47, %v746_v33  ;;  %v779_v24 = vmul.f32 %v763_v4, %v747_v15  ;;  %vm9126_vm13 = vmmov %vm9120_vm4  ;;  %v728_v47 = vld [vmem:[%s5488_s24 + $0x8] sm:$0xff]   ;;  %v6468_v4 = vld [vmem:[#allocation2 + $0xb0] sm:$0xff] }
 0x31b   : > { %2241 = vst.msk [vmem:[#allocation2 + $0x80] sm:$0xff] %vm9119_vm9, %v6412_v11  ;;  %1813 = vperm.xlu0 %4993, %v6374_v2   ;;  %vm9125_vm9 = vmmov %vm9120_vm4  ;;  %v9328_v3 = vld [vmem:[#allocation36_spill] sm:$0xff] }
 0x31c   : > { %2246 = vst.msk [vmem:[#allocation2 + $0xa8] sm:$0xff] %vm9120_vm4, %v6415_v46  ;;  %vm9139_vm15 = vmmov %vm9126_vm13 }
 0x31d   : > { %9128 = vst [vmem:[#allocation64_spill] sm:$0xff] %v6468_v4 }
 0x31e   : > { %v1716_v55 = vpop.xlane.xlu2 %1715  ;;  %9129 = vst [vmem:[#allocation65_spill] sm:$0xff] %v6470_v37 }
 0x31f   : > { %v6443_v48 = vmax.f32 %v6434_v19, %v1716_v55  ;;  %v1702_v43 = vpop.xlane.xlu0 %1701  ;;  %v1712_v27 = vpop.xlane.xlu1 %1711  ;;  %v761_v55 = vunpack.c.h.bf16 %v728_v47 }
 0x320   : > { %v6446_v30 = vmax.f32 %v6438_v18, %v1702_v43  ;;  %v6449_v17 = vmax.f32 %v6440_v28, %v1712_v27  ;;  %v792_v43 = vpack.c.bf16 %v779_v24, %v778_v57  ;;  %v712_v27 = vld [vmem:[%s5483_s15 + $0x8] sm:$0xff]   ;;  %v9130_v24 = vmov 0 }
 0x321   : > { %9123 = vst [vmem:[#allocation61_spill] sm:$0xff] %v6443_v48  ;;  %v744_v33 = vunpack.c.l.bf16 %v712_v27  ;;  %v745_v15 = vunpack.c.h.bf16 %v712_v27  ;;  %v760_v57 = vunpack.c.l.bf16 %v728_v47 }
 0x322   : > { %9124 = vst [vmem:[#allocation62_spill] sm:$0xff] %v6449_v17  ;;  %1808 = vperm.xlu2 %4992, %v6446_v30   ;;  %1833 = vperm.xlu1 %4991, %v6449_v17  }
 0x323   : > { %2251 = vst.msk [vmem:[#allocation2 + $0xd0] sm:$0xff] %vm9120_vm4, %v6443_v48  ;;  %1828 = vperm.xlu0 %4993, %v6409_v0   ;;  %2262 = vmatpush.bf16.xpose.msrb.mxu1 %v792_v43  ;;  %vm6476_vm4 = vmpackc.low %vm5817_vm6, %vm5805_vm5  ;;  %v776_v0 = vmul.f32 %v760_v57, %v744_v33  ;;  %v777_v12 = vmul.f32 %v761_v55, %v745_v15  ;;  %v726_v33 = vld [vmem:[%s5488_s24] sm:$0xff]   ;;  %v6524_v15 = vld [vmem:[#allocation2 + $0xc8] sm:$0xff] }
 0x324   : > { %2244 = vst.msk [vmem:[#allocation2 + $0x98] sm:$0xff] %vm9125_vm9, %v6446_v30  ;;  %2809 = vmatpush.bf16.msrb.mxu3 %v792_v43  ;;  %v9131_v24 = vsel %vm6476_vm4, 4294967295, %v9130_v24  ;;  %vm6484_vm9 = vmpackc.low %vm5892_vm12, %vm5880_vm11  ;;  %v9133_v43 = vmov 0  ;;  %v1743_v55 = vsub.f32 %v6388_v7, %v6412_v11  ;;  %v6526_v57 = vld [vmem:[#allocation2 + $0xf0] sm:$0xff]  ;;  %v759_v7 = vunpack.c.h.bf16 %v726_v33 }
 0x325   : > { %2249 = vst.msk [vmem:[#allocation2 + $0xc0] sm:$0xff] %vm9126_vm13, %v6449_v17  ;;  %v9134_v43 = vsel %vm6484_vm9, 4294967295, %v9133_v43 }
 0x326   : > { %9132 = vst [vmem:[#allocation66_spill] sm:$0xff] %v9131_v24  ;;  %v1722_v19 = vpop.xlane.xlu2 %1721  ;;  %v1759_v11 = vmul.f32 1.442695, %v1743_v55  ;;  %v9175_v24 = vld [vmem:[#allocation16_spill] sm:$0xff] }
 0x327   : > { %9135 = vst [vmem:[#allocation67_spill] sm:$0xff] %v9134_v43  ;;  %v6489_v27 = vmax.f32 %v6466_v31, %v1722_v19  ;;  %v1708_v17 = vpop.xlane.xlu0 %1707  ;;  %v1718_v28 = vpop.xlane.xlu1 %1717  ;;  %v791_v19 = vpack.c.bf16 %v777_v12, %v776_v0  ;;  %v1745_v12 = vsub.f32 %v6371_v38, %v6377_v21  ;;  %v710_v0 = vld [vmem:[%s5483_s15] sm:$0xff]  }
 0x328   : > { %v6492_v36 = vmax.f32 %v6468_v4, %v1708_v17  ;;  %v6495_v47 = vmax.f32 %v6470_v37, %v1718_v28  ;;  %9140 = vst [vmem:[#allocation71_spill] sm:$0xff] %v6524_v15  ;;  %v742_v10 = vunpack.c.l.bf16 %v710_v0  ;;  %v743_v17 = vunpack.c.h.bf16 %v710_v0 }
 0x329   : > { %9136 = vst [vmem:[#allocation68_spill] sm:$0xff] %v6489_v27  ;;  %4670 = vmatmul.msk.bf16.gmra.mxu0 %vm6476_vm4, %v6356_v25  ;;  %4679 = vmatmul.msk.bf16.gmra.mxu1 %vm6484_vm9, %v6356_v25  ;;  %v758_v28 = vunpack.c.l.bf16 %v726_v33  ;;  %5025 = vpow2.f32 %v1759_v11  ;;  %v6580_v33 = vld [vmem:[#allocation2 + $0xf8] sm:$0xff]  ;;  %v9154_v11 = vld [vmem:[#allocation49_spill] sm:$0xff]  ;;  %vm9161_vm9 = vnez %v9036_v34  ;;  %v1242_v4 = vsel %vm5842_vm8, %v6341_v26, 0.0 }
 0x32a   : > { %9137 = vst [vmem:[#allocation69_spill] sm:$0xff] %v6492_v36  ;;  %1823 = vperm.xlu2 %4992, %v6492_v36   ;;  %1848 = vperm.xlu1 %4991, %v6495_v47   ;;  %v775_v21 = vmul.f32 %v759_v7, %v743_v17  ;;  %v9153_v7 = vld [vmem:[#allocation48_spill] sm:$0xff] }
 0x32b   : > { %9138 = vst [vmem:[#allocation70_spill] sm:$0xff] %v6495_v47  ;;  %1843 = vperm.xlu0 %4993, %v6443_v48   ;;  %2810 = vmatpush.bf16.msrb.mxu3 %v791_v19  ;;  %v774_v37 = vmul.f32 %v758_v28, %v742_v10  ;;  %v1763_v48 = vmul.f32 1.442695, %v1745_v12  ;;  %v1748_v12 = vsub.f32 %v6390_v52, %v6415_v46  ;;  %v9162_v46 = vmov 0 }
 0x32c   : > { %2254 = vst.msk [vmem:[#allocation2 + $0xe8] sm:$0xff] %vm9126_vm13, %v6489_v27  ;;  %2263 = vmatpush.bf16.xpose.msrb.mxu1 %v791_v19  ;;  %v1744_v19 = vsub.f32 %v6331_v1, %v6352_v13  ;;  %v1746_v1 = vsub.f32 %v6438_v18, %v6446_v30  ;;  %v6551_v13 = vld [vmem:[#allocation2 + $0xe0] sm:$0xff] }
 0x32d   : > { %2247 = vst.msk [vmem:[#allocation2 + $0xb0] sm:$0xff] %vm9139_vm15, %v6492_v36  ;;  %vm9144_vm15 = vmmov %vm9126_vm13  ;;  %5027 = vpow2.f32 %v1763_v48 }
 0x32e   : > { %2252 = vst.msk [vmem:[#allocation2 + $0xd8] sm:$0xff] %vm9126_vm13, %v6495_v47  ;;  %v1761_v28 = vmul.f32 1.442695, %v1744_v19  ;;  %v1765_v17 = vmul.f32 1.442695, %v1746_v1 }
 0x32f   : > { %9141 = vst [vmem:[#allocation72_spill] sm:$0xff] %v6526_v57  ;;  %v1714_v31 = vpop.xlane.xlu0 %1713  ;;  %v1724_v47 = vpop.xlane.xlu1 %1723 }
 0x330   : > { %v6529_v36 = vmax.f32 %v6524_v15, %v1714_v31  ;;  %v6532_v38 = vmax.f32 %v6526_v57, %v1724_v47  ;;  %v790_v31 = vpack.c.bf16 %v775_v21, %v774_v37  ;;  %v1747_v47 = vsub.f32 %v6367_v32, %v6374_v2  ;;  %9145 = vst [vmem:[#allocation75_spill] sm:$0xff] %v6551_v13  ;;  %v6564_v30 = vpop.eup %5025 }
 0x331   : > { %v9146_v32 = vmov 0  ;;  %9150 = vst [vmem:[#allocation78_spill] sm:$0xff] %v6564_v30  ;;  %5029 = vpow2.f32 %v1761_v28  ;;  %v9155_v21 = vsub.f32 %v9153_v7, %v9154_v11 }
 0x332   : > { %9142 = vst [vmem:[#allocation73_spill] sm:$0xff] %v6529_v36  ;;  %1838 = vperm.xlu2 %4992, %v6529_v36   ;;  %1863 = vperm.xlu1 %4991, %v6532_v38   ;;  %v1767_v2 = vmul.f32 1.442695, %v1747_v47 }
 0x333   : > { %9143 = vst [vmem:[#allocation74_spill] sm:$0xff] %v6532_v38  ;;  %1858 = vperm.xlu0 %4993, %v6489_v27   ;;  %2811 = vmatpush.bf16.msrb.mxu3 %v790_v31  ;;  %v6569_v18 = vpop.eup %5027  ;;  %v1098_v19 = vmul.f32 1.442695, %v9155_v21  ;;  %v9173_v27 = vld [vmem:[#allocation15_spill] sm:$0xff] }
 0x334   : > { %2250 = vst.msk [vmem:[#allocation2 + $0xc8] sm:$0xff] %vm9144_vm15, %v6529_v36  ;;  %2264 = vmatpush.bf16.xpose.msrb.mxu1 %v790_v31  ;;  %vm6557_vm15 = vmpackc.low %vm5917_vm14, %vm9065_vm0  ;;  %5031 = vpow2.f32 %v1767_v2  ;;  %v1769_v31 = vmul.f32 1.442695, %v1748_v12  ;;  %v9166_v12 = vld [vmem:[#allocation46_spill] sm:$0xff] }
 0x335   : > { %2255 = vst.msk [vmem:[#allocation2 + $0xf0] sm:$0xff] %vm9126_vm13, %v6532_v38  ;;  %v9147_v32 = vsel %vm6557_vm15, 4294967295, %v9146_v32  ;;  %5033 = vpow2.f32 %v1765_v17  ;;  %v9165_v17 = vld [vmem:[#allocation45_spill] sm:$0xff]  ;;  %v1236_v38 = vsel %vm5766_vm2, %v6341_v26, 0.0 }
 0x336   : > { %9148 = vst [vmem:[#allocation76_spill] sm:$0xff] %v9147_v32  ;;  %5035 = vpow2.f32 %v1098_v19  ;;  %v9167_v7 = vsub.f32 %v9165_v17, %v9166_v12 }
 0x337   : > { %v1720_v37 = vpop.xlane.xlu0 %1719  ;;  %9151 = vst [vmem:[#allocation79_spill] sm:$0xff] %v6569_v18  ;;  %v6585_v1 = vpop.eup %5029  ;;  %5037 = vpow2.f32 %v1769_v31 }
 0x338   : > { %v6562_v48 = vmax.f32 %v6551_v13, %v1720_v37  ;;  %9152 = vst [vmem:[#allocation80_spill] sm:$0xff] %v6580_v33  ;;  %v1096_v11 = vmul.f32 1.442695, %v9167_v7  ;;  %v6621_v31 = vpop.permute.xlu2 %1371  ;;  %v9171_v7 = vld [vmem:[#allocation13_spill] sm:$0xff]  ;;  %v1237_v13 = vsel %vm5779_vm3, %v6341_v26, 0.0 }
 0x339   : > { %4682 = vmatmul.msk.bf16.gmra.mxu1 %vm6557_vm15, %v6356_v25  ;;  %9156 = vst [vmem:[#allocation48_spill] sm:$0xff] %v6585_v1  ;;  %vm9160_vm15 = vnez %v9032_v16 }
 0x33a   : > { %9149 = vst [vmem:[#allocation77_spill] sm:$0xff] %v6562_v48  ;;  %1853 = vperm.xlu2 %4992, %v6562_v48   ;;  %2058 = vperm.xlu1 %4991, %v6564_v30   ;;  %v6590_v2 = vpop.eup %5031  ;;  %vm6605_vm4 = vmpackc.low %vm9161_vm9, %vm9160_vm15  ;;  %5039 = vpow2.f32 %v1096_v11 }
 0x33b   : > { %2253 = vst.msk [vmem:[#allocation2 + $0xe0] sm:$0xff] %vm9126_vm13, %v6562_v48  ;;  %2068 = vperm.xlu0 %4993, %v6569_v18   ;;  %v6592_v37 = vpop.eup %5033  ;;  %v9163_v46 = vsel %vm6605_vm4, 4294967295, %v9162_v46 }
 0x33c   : > { %9158 = vst [vmem:[#allocation81_spill] sm:$0xff] %v6590_v2  ;;  %v6612_v21 = vpop.eup %5035 }
 0x33d   : > { %9159 = vst [vmem:[#allocation82_spill] sm:$0xff] %v6592_v37  ;;  %v6614_v19 = vpop.eup %5037 }
 0x33e   : > { %9164 = vst [vmem:[#allocation83_spill] sm:$0xff] %v9163_v46 }
 0x33f   : > { %v1726_v47 = vpop.xlane.xlu0 %1725  ;;  %9168 = vst [vmem:[#allocation45_spill] sm:$0xff] %v6612_v21 }
 0x340   : > { %v6588_v28 = vmax.f32 %v6580_v33, %v1726_v47  ;;  %9169 = vst [vmem:[#allocation46_spill] sm:$0xff] %v6614_v19  ;;  %v6623_v47 = vpop.eup %5039  ;;  %v6628_v12 = vpop.permute.xlu2 %1391  ;;  %v9172_v33 = vld [vmem:[#allocation14_spill] sm:$0xff] }
 0x341   : > { %9170 = vst [vmem:[#allocation84_spill] sm:$0xff] %v6623_v47 }
 0x342   : > { %9157 = vst [vmem:[#allocation49_spill] sm:$0xff] %v6588_v28  ;;  %2063 = vperm.xlu2 %4992, %v6585_v1   ;;  %2078 = vperm.xlu1 %4991, %v6590_v2   ;;  %v1348_v2 = vld [vmem:[#allocation4 + $0xb0] sm:$0xff] }
 0x343   : > { %2256 = vst.msk [vmem:[#allocation2 + $0xf8] sm:$0xff] %vm9126_vm13, %v6588_v28  ;;  %2073 = vperm.xlu0 %4993, %v6592_v37   ;;  %vm9174_vm13 = vnez %v8998_v44 }
 0x347   : > { %v1367_v52 = vpop.permute.xlu1 %1366 }
 0x348   : > { %v6636_v11 = vpop.permute.xlu2 %1406  ;;  %v1444_v1 = vmul.f32 %v1367_v52, %v1348_v2  ;;  %v1355_v2 = vld [vmem:[#allocation4 + $0x178] sm:$0xff] }
 0x349   : > { %4685 = vmatmul.msk.bf16.gmra.mxu1 %vm6605_vm4, %v6356_v25  ;;  %vm9176_vm4 = vnez %v9004_v62 }
 0x34a   : > { %2083 = vperm.xlu2 %4992, %v6614_v19   ;;  %1441 = vperm.xlu1 %4991, %v6612_v21   ;;  %v1354_v19 = vld [vmem:[#allocation4 + $0x40] sm:$0xff] }
 0x34f   : > { %v6632_v25 = vpop.permute.xlu1 %1381 }
 0x350   : > { %v6639_v48 = vpop.permute.xlu2 %1421 }
 0x352   : > { %1436 = vperm.xlu2 %4992, %v6623_v47   ;;  %v6626_v17 = vpop.permute.xlu0 %1376 }
 0x357   : > { %v1397_v10 = vpop.permute.xlu1 %1396 }
 0x358   : > { %v1450_v18 = vmul.f32 %v1397_v10, %v1354_v19  ;;  %v1445_v10 = vmul.f32 %v6621_v31, %v1349_v42  ;;  %v9178_v19 = vld [vmem:[#allocation38_spill] sm:$0xff]  ;;  %v1240_v31 = vsel %vm5817_vm6, %v6341_v26, 0.0 }
 0x359   : > { %2265 = vmatmul.bf16.vlgmr.msrb.gmra.mxu1 %v9171_v7  ;;  %v1356_v42 = vld [vmem:[#allocation4 + $0x108] sm:$0xff] }
 0x35a   : > { %1868 = vperm.xlu2 %4992, %v6588_v28   ;;  %v6634_v55 = vpop.permute.xlu0 %1386 }
 0x35f   : > { %v6644_v7 = vpop.permute.xlu1 %1411 }
 0x362   : > { %v1402_v0 = vpop.permute.xlu0 %1401 }
 0x367   : > { %v6655_v36 = vpop.permute.xlu1 %1426 }
 0x369   : > { %2270 = vmatmul.bf16.gmra.mxu1 %v9172_v33  ;;  %v1241_v33 = vsel %vm5830_vm7, %v6341_v26, 0.0 }
 0x36a   : > { %v6646_v28 = vpop.permute.xlu0 %1416 }
 0x36d   : > { %1287 = vadd.xlane.f32.xlu0 %v1237_v13  ;;  %v1239_v13 = vsel %vm5805_vm5, %v6341_v26, 0.0 }
 0x372   : > { %v6660_v15 = vpop.permute.xlu0 %1431 }
 0x374   : > { %v1794_v57 = vpop.permute.xlu2 %1793  ;;  %1285 = vadd.xlane.f32.xlu1 %v1236_v38  ;;  %v1244_v38 = vsel %vm5867_vm10, %v6341_v26, 0.0 }
 0x375   : > { %1295 = vadd.xlane.f32.xlu0 %v1241_v33 }
 0x379   : > { %2275 = vmatmul.bf16.gmra.mxu1 %v9173_v27  ;;  %v1235_v27 = vsel %vm9174_vm13, %v6341_v26, 0.0 }
 0x37c   : > { %v1809_v37 = vpop.permute.xlu2 %1808  ;;  %1291 = vadd.xlane.f32.xlu1 %v1239_v13  ;;  %v1799_v33 = vpop.permute.xlu1 %1798  ;;  %v1247_v13 = vsel %vm9065_vm0, %v6341_v26, 0.0 }
 0x37d   : > { %1301 = vadd.xlane.f32.xlu0 %v1244_v38  ;;  %v1872_v47 = vsub.f32 %v6025_v23, %v1799_v33  ;;  %v1238_v23 = vsel %vm9176_vm4, %v6341_v26, 0.0 }
 0x383   : > { %1283 = vadd.xlane.f32.xlu2 %v1235_v27  ;;  %v1871_v27 = vsub.f32 %v6013_v40, %v1794_v57 }
 0x384   : > { %v6671_v30 = vpop.permute.xlu2 %1823  ;;  %1297 = vadd.xlane.f32.xlu1 %v1242_v4  ;;  %v1804_v38 = vpop.permute.xlu0 %1803  ;;  %v1888_v4 = vsel %vm5766_vm2, %v1872_v47, 0.0 }
 0x385   : > { %1307 = vadd.xlane.f32.xlu0 %v1247_v13  ;;  %v1873_v21 = vsub.f32 %v6039_v39, %v1804_v38  ;;  %v1887_v40 = vsel %vm9174_vm13, %v1871_v27, 0.0 }
 0x386   : > { %v1477_v46 = vpop.f32.mrf.mxu0  ;;  %v1492_v32 = vpop.f32.mrf.mxu1  ;;  %v1903_v57 = vadd.f32 %v1888_v4, %v1887_v40 }
 0x387   : > { %v1517_v9 = vadd.f32 %v1477_v46, %v1444_v1  ;;  %v1523_v43 = vadd.f32 %v1492_v32, %v1450_v18  ;;  %v1889_v39 = vsel %vm5779_vm3, %v1873_v21, 0.0  ;;  %v1451_v32 = vmul.f32 %v1402_v0, %v1355_v2  ;;  %v9177_v18 = vld [vmem:[#allocation35_spill] sm:$0xff] }
 0x388   : > { %v1874_v1 = vsub.f32 %v9177_v18, %v1809_v37  ;;  %v1904_v21 = vadd.f32 %v1903_v57, %v1889_v39  ;;  %v1350_v0 = vld [vmem:[#allocation4 + $0x10] sm:$0xff]  ;;  %v1248_v39 = vsel %vm5917_vm14, %v6341_v26, 0.0 }
 0x389   : > { %1533 = vst [vmem:[#allocation4 + $0xb0] sm:$0xff] %v1517_v9  ;;  %2280 = vmatmul.bf16.gmra.mxu1 %v9175_v24  ;;  %v1245_v9 = vsel %vm5880_vm11, %v6341_v26, 0.0  ;;  %v9179_v2 = vld [vmem:[#allocation39_spill] sm:$0xff] }
 0x38a   : > { %1539 = vst [vmem:[#allocation4 + $0x40] sm:$0xff] %v1523_v43  ;;  %v1250_v43 = vsel %vm9161_vm9, %v6341_v26, 0.0  ;;  %v1890_v4 = vsel %vm9176_vm4, %v1874_v1, 0.0  ;;  %v9180_v18 = vld [vmem:[#allocation43_spill] sm:$0xff] }
 0x38b   : > { %1289 = vadd.xlane.f32.xlu2 %v1238_v23  ;;  %v1905_v37 = vadd.f32 %v1904_v21, %v1890_v4  ;;  %v1877_v1 = vsub.f32 %v9180_v18, %v6671_v30  ;;  %v9182_v4 = vld [vmem:[#allocation17_spill] sm:$0xff]  ;;  %v1243_v30 = vsel %vm9183_vm1, %v6341_v26, 0.0 }
 0x38c   : > { %v6692_v24 = vpop.permute.xlu2 %1838  ;;  %1303 = vadd.xlane.f32.xlu1 %v1245_v9  ;;  %v1819_v52 = vpop.permute.xlu1 %1818 }
 0x38d   : > { %1313 = vadd.xlane.f32.xlu0 %v1250_v43  ;;  %v1814_v46 = vpop.permute.xlu0 %1813  ;;  %v1876_v40 = vsub.f32 %v9179_v2, %v1819_v52  ;;  %v1452_v43 = vmul.f32 %v6636_v11, %v1356_v42  ;;  %v1351_v11 = vld [vmem:[#allocation4 + $0x48] sm:$0xff] }
 0x38e   : > { %v1875_v47 = vsub.f32 %v9178_v19, %v1814_v46  ;;  %v1479_v33 = vpop.f32.mrf.mxu0  ;;  %v1494_v13 = vpop.f32.mrf.mxu1  ;;  %v9181_v19 = vld [vmem:[#allocation47_spill] sm:$0xff] }
 0x38f   : > { %v1518_v38 = vadd.f32 %v1479_v33, %v1445_v10  ;;  %v1524_v27 = vadd.f32 %v1494_v13, %v1451_v32  ;;  %v1446_v10 = vmul.f32 %v6626_v17, %v1350_v0  ;;  %v1892_v52 = vsel %vm5817_vm6, %v1876_v40, 0.0  ;;  %v1357_v17 = vld [vmem:[#allocation4 + $0x110] sm:$0xff]  ;;  %v9184_v40 = vld [vmem:[#allocation50_spill] sm:$0xff] }
 0x390   : > { %v1891_v23 = vsel %vm5805_vm5, %v1875_v47, 0.0  ;;  %v1453_v2 = vmul.f32 %v6644_v7, %v1357_v17 }
 0x391   : > { %1534 = vst [vmem:[#allocation4 + $0xd0] sm:$0xff] %v1518_v38  ;;  %v1906_v9 = vadd.f32 %v1905_v37, %v1891_v23  ;;  %v1893_v23 = vsel %vm5830_vm7, %v1877_v1, 0.0  ;;  %v9185_v1 = vld [vmem:[#allocation51_spill] sm:$0xff] }
 0x392   : > { %1540 = vst [vmem:[#allocation4 + $0x178] sm:$0xff] %v1524_v27 }
 0x393   : > { %1293 = vadd.xlane.f32.xlu2 %v1240_v31  ;;  %v1907_v38 = vadd.f32 %v1906_v9, %v1892_v52  ;;  %v1447_v31 = vmul.f32 %v6632_v25, %v1351_v11  ;;  %v1352_v25 = vld [vmem:[#allocation4 + $0x160] sm:$0xff] }
 0x394   : > { %v6711_v57 = vpop.permute.xlu2 %1853  ;;  %1309 = vadd.xlane.f32.xlu1 %v1248_v39  ;;  %v1834_v27 = vpop.permute.xlu1 %1833 }
 0x395   : > { %v1829_v32 = vpop.permute.xlu0 %1828  ;;  %v1908_v0 = vadd.f32 %v1907_v38, %v1893_v23  ;;  %v1879_v39 = vsub.f32 %v9184_v40, %v1834_v27  ;;  %v1246_v38 = vsel %vm5892_vm12, %v6341_v26, 0.0 }
 0x396   : > { %v1482_v46 = vpop.f32.mrf.mxu0  ;;  %v1497_v21 = vpop.f32.mrf.mxu1  ;;  %v1878_v47 = vsub.f32 %v9181_v19, %v1829_v32  ;;  %v9186_v19 = vld [vmem:[#allocation52_spill] sm:$0xff] }
 0x397   : > { %v1519_v33 = vadd.f32 %v1482_v46, %v1446_v10  ;;  %v1525_v13 = vadd.f32 %v1497_v21, %v1452_v43  ;;  %v1880_v21 = vsub.f32 %v9185_v1, %v6692_v24  ;;  %v1895_v52 = vsel %vm9183_vm1, %v1879_v39, 0.0 }
 0x398   : > { %v1894_v42 = vsel %vm5842_vm8, %v1878_v47, 0.0  ;;  %v1448_v24 = vmul.f32 %v6634_v55, %v1352_v25  ;;  %v1353_v55 = vld [vmem:[#allocation4 + $0x128] sm:$0xff] }
 0x399   : > { %1535 = vst [vmem:[#allocation4 + $0x10] sm:$0xff] %v1519_v33  ;;  %2285 = vmatmul.bf16.gmra.mxu1 %v9182_v4  ;;  %v1909_v43 = vadd.f32 %v1908_v0, %v1894_v42  ;;  %v1358_v33 = vld [vmem:[#allocation4 + $0x90] sm:$0xff]  ;;  %v1896_v11 = vsel %vm5867_vm10, %v1880_v21, 0.0  ;;  %v9187_v0 = vld [vmem:[#allocation53_spill] sm:$0xff] }
 0x39a   : > { %1541 = vst [vmem:[#allocation4 + $0x108] sm:$0xff] %v1525_v13  ;;  %v1454_v4 = vmul.f32 %v6646_v28, %v1358_v33  ;;  %v1359_v28 = vld [vmem:[#allocation4 + $0x118] sm:$0xff] }
 0x39b   : > { %1299 = vadd.xlane.f32.xlu2 %v1243_v30  ;;  %v1910_v7 = vadd.f32 %v1909_v43, %v1895_v52  ;;  %v9188_v43 = vld [vmem:[#allocation18_spill] sm:$0xff]  ;;  %v1455_v25 = vmul.f32 %v6639_v48, %v1359_v28 }
 0x39c   : > { %v6728_v37 = vpop.permute.xlu2 %2063  ;;  %v1849_v13 = vpop.permute.xlu1 %1848 }
 0x39d   : > { %v1844_v9 = vpop.permute.xlu0 %1843  ;;  %v1911_v30 = vadd.f32 %v1910_v7, %v1896_v11  ;;  %v1360_v11 = vld [vmem:[#allocation4 + $0x148] sm:$0xff] }
 0x39e   : > { %v1484_v10 = vpop.f32.mrf.mxu0  ;;  %v1499_v32 = vpop.f32.mrf.mxu1  ;;  %v1881_v47 = vsub.f32 %v9186_v19, %v1844_v9  ;;  %v1456_v48 = vmul.f32 %v6655_v36, %v1360_v11 }
 0x39f   : > { %v1520_v18 = vadd.f32 %v1484_v10, %v1447_v31  ;;  %v1526_v46 = vadd.f32 %v1499_v32, %v1453_v2  ;;  %v1882_v31 = vsub.f32 %v9187_v0, %v1849_v13  ;;  %v1249_v10 = vsel %vm9160_vm15, %v6341_v26, 0.0 }
 0x3a0   : > { %v1897_v17 = vsel %vm5880_vm11, %v1881_v47, 0.0  ;;  %v1883_v32 = vsub.f32 %v6149_v51, %v6711_v57  ;;  %v1449_v47 = vmul.f32 %v6628_v12, %v1353_v55 }
 0x3a1   : > { %1536 = vst [vmem:[#allocation4 + $0x48] sm:$0xff] %v1520_v18  ;;  %v1912_v39 = vadd.f32 %v1911_v30, %v1897_v17  ;;  %v1898_v18 = vsel %vm5892_vm12, %v1882_v31, 0.0 }
 0x3a2   : > { %1542 = vst [vmem:[#allocation4 + $0x110] sm:$0xff] %v1526_v46  ;;  %v9189_v46 = vld [vmem:[#allocation54_spill] sm:$0xff]  ;;  %v1899_v26 = vsel %vm9065_vm0, %v1883_v32, 0.0 }
 0x3a3   : > { %1305 = vadd.xlane.f32.xlu2 %v1246_v38  ;;  %v1913_v21 = vadd.f32 %v1912_v39, %v1898_v18 }
 0x3a4   : > { %v6741_v27 = vpop.permute.xlu2 %2083  ;;  %v1864_v52 = vpop.permute.xlu1 %1863 }
 0x3a5   : > { %v1859_v9 = vpop.permute.xlu0 %1858  ;;  %v1914_v38 = vadd.f32 %v1913_v21, %v1899_v26  ;;  %v9192_v26 = vld [vmem:[#allocation20_spill] sm:$0xff] }
 0x3a6   : > { %v1487_v23 = vpop.f32.mrf.mxu0  ;;  %v1502_v42 = vpop.f32.mrf.mxu1  ;;  %v1884_v1 = vsub.f32 %v9189_v46, %v1859_v9  ;;  %v9191_v9 = vld [vmem:[#allocation19_spill] sm:$0xff] }
 0x3a7   : > { %v1521_v2 = vadd.f32 %v1487_v23, %v1448_v24  ;;  %v1527_v40 = vadd.f32 %v1502_v42, %v1454_v4  ;;  %v9190_v24 = vld [vmem:[#allocation55_spill] sm:$0xff] }
 0x3a8   : > { %v1900_v51 = vsel %vm5917_vm14, %v1884_v1, 0.0  ;;  %v1885_v4 = vsub.f32 %v9190_v24, %v1864_v52  ;;  %v1362_v1 = vld [vmem:[#allocation4 + $0x58] sm:$0xff] }
 0x3a9   : > { %1537 = vst [vmem:[#allocation4 + $0x160] sm:$0xff] %v1521_v2  ;;  %2290 = vmatmul.bf16.gmra.mxu1 %v9188_v43  ;;  %v1915_v17 = vadd.f32 %v1914_v38, %v1900_v51  ;;  %v1361_v43 = vld [vmem:[#allocation4 + $0x100] sm:$0xff]  ;;  %v1363_v51 = vld [vmem:[#allocation4 + $0xd8] sm:$0xff] }
 0x3aa   : > { %1543 = vst [vmem:[#allocation4 + $0x90] sm:$0xff] %v1527_v40  ;;  %v1901_v30 = vsel %vm9160_vm15, %v1885_v4, 0.0  ;;  %v1457_v28 = vmul.f32 %v6660_v15, %v1361_v43 }
 0x3ab   : > { %1311 = vadd.xlane.f32.xlu2 %v1249_v10  ;;  %v1916_v0 = vadd.f32 %v1915_v17, %v1901_v30 }
 0x3ac   : > { %v1437_v19 = vpop.permute.xlu2 %1436  ;;  %v6770_v42 = vpop.permute.xlu1 %2058 }
 0x3ad   : > { %v6781_v38 = vpop.permute.xlu0 %2068 }
 0x3ae   : > { %v1489_v33 = vpop.f32.mrf.mxu0  ;;  %v1504_v7 = vpop.f32.mrf.mxu1 }
 0x3af   : > { %v1522_v57 = vadd.f32 %v1489_v33, %v1449_v47  ;;  %v1528_v13 = vadd.f32 %v1504_v7, %v1455_v25  ;;  %v1458_v47 = vmul.f32 %v1437_v19, %v1362_v1 }
 0x3b1   : > { %1538 = vst [vmem:[#allocation4 + $0x128] sm:$0xff] %v1522_v57 }
 0x3b2   : > { %1544 = vst [vmem:[#allocation4 + $0x118] sm:$0xff] %v1528_v13 }
 0x3b4   : > { %v1869_v12 = vpop.permute.xlu2 %1868  ;;  %v6776_v18 = vpop.permute.xlu1 %2078 }
 0x3b5   : > { %v1886_v23 = vsub.f32 %v6196_v41, %v1869_v12 }
 0x3b6   : > { %v1507_v31 = vpop.f32.mrf.mxu1 }
 0x3b7   : > { %v1902_v2 = vsel %vm9161_vm9, %v1886_v23, 0.0  ;;  %v1529_v40 = vadd.f32 %v1507_v31, %v1456_v48  ;;  %vm9193_vm9 = vnez %v9103_v20  ;;  %v9274_v20 = vld [vmem:[#allocation75_spill] sm:$0xff] }
 0x3b8   : > { %v1917_v39 = vadd.f32 %v1916_v0, %v1902_v2  ;;  %v6810_v0 = vpop.permute.xlu0 %2073  ;;  %v1253_v2 = vld [vmem:[#allocation3 + $0x10] sm:$0xff] }
 0x3b9   : > { %1545 = vst [vmem:[#allocation4 + $0x148] sm:$0xff] %v1529_v40  ;;  %2295 = vmatmul.bf16.gmra.mxu1 %v9191_v9 }
 0x3ba   : > { %v1918_v55 = vrot.slane %v1917_v39, 4 }
 0x3bc   : > { %v1919_v36 = vadd.f32 %v1918_v55, %v1917_v39  ;;  %v1442_v15 = vpop.permute.xlu1 %1441  ;;  %v1269_v39 = vmul.f32 %v6267_v5, %v1253_v2  ;;  %v1252_v5 = vld [vmem:[#allocation3 + $0x8] sm:$0xff]  ;;  %v1251_v2 = vld [vmem:[#allocation3] sm:$0xff] }
 0x3bd   : > { %v1459_v57 = vmul.f32 %v1442_v15, %v1363_v51 }
 0x3be   : > { %v1920_v10 = vrot.slane %v1919_v36, 2  ;;  %v1509_v32 = vpop.f32.mrf.mxu1 }
 0x3bf   : > { %v1530_v41 = vadd.f32 %v1509_v32, %v1457_v28 }
 0x3c0   : > { %v1921_v46 = vadd.f32 %v1920_v10, %v1919_v36  ;;  %v1257_v10 = vld [vmem:[#allocation3 + $0x30] sm:$0xff] }
 0x3c1   : > { %1546 = vst [vmem:[#allocation4 + $0x100] sm:$0xff] %v1530_v41  ;;  %v1268_v41 = vmul.f32 %v6208_v58, %v1252_v5  ;;  %v1273_v1 = vmul.f32 %v6281_v63, %v1257_v10  ;;  %v1255_v63 = vld [vmem:[#allocation3 + $0x20] sm:$0xff]  ;;  %v9207_v5 = vld [vmem:[#allocation34_spill] sm:$0xff] }
 0x3c2   : > { %v1922_v21 = vrot.slane %v1921_v46, 1  ;;  %v1271_v51 = vmul.f32 %v6291_v49, %v1255_v63 }
 0x3c4   : > { %v1923_v52 = vadd.f32 %v1922_v21, %v1921_v46 }
 0x3c6   : > { %v1924_v25 = vmul.f32 1.442695, %v1923_v52  ;;  %v1512_v33 = vpop.f32.mrf.mxu1 }
 0x3c7   : > { %v1531_v7 = vadd.f32 %v1512_v33, %v1458_v47 }
 0x3c8   : > { %5041 = vpow2.f32 %v1924_v25 }
 0x3c9   : > { %1547 = vst [vmem:[#allocation4 + $0x58] sm:$0xff] %v1531_v7  ;;  %2300 = vmatmul.bf16.gmra.mxu1 %v9192_v26  ;;  %v1260_v7 = vld [vmem:[#allocation3 + $0x48] sm:$0xff] }
 0x3ce   : > { %v6779_v13 = vpop.eup %5041  ;;  %v1514_v24 = vpop.f32.mrf.mxu1 }
 0x3cf   : > { %v1532_v4 = vadd.f32 %v1514_v24, %v1459_v57  ;;  %v1928_v19 = vsel %vm5779_vm3, %v6779_v13, 0.0  ;;  %v1927_v11 = vsel %vm5766_vm2, %v6779_v13, 0.0  ;;  %v1926_v17 = vsel %vm9174_vm13, %v6779_v13, 0.0  ;;  %v9199_v57 = vld [vmem:[#allocation33_spill] sm:$0xff] }
 0x3d0   : > { %1979 = vadd.xlane.f32.xlu2 %v1928_v19  ;;  %1977 = vadd.xlane.f32.xlu1 %v1927_v11  ;;  %v6794_v12 = vpack.c.bf16 %v6779_v13, %v6779_v13  ;;  %vm9194_vm3 = vnez %v9106_v54  ;;  %v1931_v30 = vsel %vm5817_vm6, %v6779_v13, 0.0  ;;  %v1930_v23 = vsel %vm5805_vm5, %v6779_v13, 0.0 }
 0x3d1   : > { %1548 = vst [vmem:[#allocation4 + $0xd8] sm:$0xff] %v1532_v4  ;;  %1975 = vadd.xlane.f32.xlu0 %v1926_v17  ;;  %v1929_v31 = vsel %vm9176_vm4, %v6779_v13, 0.0  ;;  %v1934_v9 = vsel %vm9183_vm1, %v6779_v13, 0.0  ;;  %v1933_v43 = vsel %vm5842_vm8, %v6779_v13, 0.0  ;;  %v1932_v36 = vsel %vm5830_vm7, %v6779_v13, 0.0 }
 0x3d2   : > { %4720 = vmatmul.msk.bf16.vlgmr.msrb.gmra.mxu2 %vm9193_vm9, %v6794_v12  ;;  %4729 = vmatmul.msk.bf16.vlgmr.msra.gmra.mxu3 %vm9194_vm3, %v6794_v12  ;;  %vm9195_vm3 = vnez %v9112_v59  ;;  %vm9196_vm9 = vnez %v9115_v61  ;;  %vm9197_vm1 = vcmask 7168   ;;  %v1937_v21 = vsel %vm5892_vm12, %v6779_v13, 0.0  ;;  %v9246_v61 = vld [vmem:[#allocation64_spill] sm:$0xff] }
 0x3d3   : > { %v1936_v52 = vsel %vm5880_vm11, %v6779_v13, 0.0  ;;  %v1935_v33 = vsel %vm5867_vm10, %v6779_v13, 0.0  ;;  %v1276_v24 = vmul.f32 %v9199_v57, %v1260_v7  ;;  %v1940_v4 = vsel %vm9160_vm15, %v6779_v13, 0.0  ;;  %v1254_v7 = vld [vmem:[#allocation3 + $0x18] sm:$0xff]  ;;  %v9214_v57 = vld [vmem:[#allocation59_spill] sm:$0xff] }
 0x3d4   : > { %v1939_v19 = vsel %vm5917_vm14, %v6779_v13, 0.0 }
 0x3d6   : > { %v6802_v48 = vpop.f32.mrf.mxu1 }
 0x3d8   : > { %1985 = vadd.xlane.f32.xlu2 %v1931_v30  ;;  %1983 = vadd.xlane.f32.xlu1 %v1930_v23  ;;  %v1938_v30 = vsel %vm9065_vm0, %v6779_v13, 0.0  ;;  %v9201_v23 = vld [vmem:[#allocation66_spill] sm:$0xff] }
 0x3d9   : > { %1981 = vadd.xlane.f32.xlu0 %v1929_v31  ;;  %v9203_v31 = vld [vmem:[#allocation67_spill] sm:$0xff] }
 0x3de   : > { %v6815_v40 = vpop.f32.mrf.mxu1 }
 0x3e0   : > { %v1288_v55 = vpop.xlane.xlu0 %1287  ;;  %1991 = vadd.xlane.f32.xlu2 %v1934_v9  ;;  %1989 = vadd.xlane.f32.xlu1 %v1933_v43  ;;  %v1263_v9 = vld [vmem:[#allocation3 + $0x60] sm:$0xff] }
 0x3e1   : > { %v1317_v28 = vadd.f32 %v1288_v55, %v1269_v39  ;;  %1987 = vadd.xlane.f32.xlu0 %v1932_v36  ;;  %v1258_v39 = vld [vmem:[#allocation3 + $0x38] sm:$0xff]  ;;  %v9206_v43 = vld [vmem:[#allocation57_spill] sm:$0xff] }
 0x3e2   : > { %4723 = vmatmul.msk.bf16.gmra.mxu2 %vm9195_vm3, %v6794_v12  ;;  %4732 = vmatmul.msk.bf16.gmra.mxu3 %vm9196_vm9, %v6794_v12  ;;  %vm9198_vm9 = vmmov %vm9197_vm1  ;;  %vm9204_vm3 = vnez %v9203_v31  ;;  %v1267_v55 = vmul.f32 %v9206_v43, %v1251_v2  ;;  %v1274_v10 = vmul.f32 %v9207_v5, %v1258_v39 }
 0x3e3   : > { %1334 = vst.msk [vmem:[#allocation3 + $0x10] sm:$0xff] %vm9197_vm1, %v1317_v28 }
 0x3e6   : > { %v6834_v32 = vpop.f32.mrf.mxu1 }
 0x3e7   : > { %v1286_v46 = vpop.xlane.xlu1 %1285 }
 0x3e8   : > { %v1316_v47 = vadd.f32 %v1286_v46, %v1268_v41  ;;  %v1296_v25 = vpop.xlane.xlu0 %1295  ;;  %1997 = vadd.xlane.f32.xlu2 %v1937_v21  ;;  %1995 = vadd.xlane.f32.xlu1 %v1936_v52  ;;  %v2324_v52 = vsel %vm5766_vm2, %v6815_v40, -1e+30 }
 0x3e9   : > { %v1321_v58 = vadd.f32 %v1296_v25, %v1273_v1  ;;  %1993 = vadd.xlane.f32.xlu0 %v1935_v33  ;;  %v9208_v1 = vld [vmem:[#allocation31_spill] sm:$0xff] }
 0x3ea   : > { %1333 = vst.msk [vmem:[#allocation3 + $0x8] sm:$0xff] %vm9197_vm1, %v1316_v47  ;;  %v1279_v21 = vmul.f32 %v9208_v1, %v1263_v9  ;;  %v9222_v1 = vld [vmem:[#allocation56_spill] sm:$0xff] }
 0x3eb   : > { %1338 = vst.msk [vmem:[#allocation3 + $0x30] sm:$0xff] %vm9198_vm9, %v1321_v58  ;;  %vm9200_vm9 = vmmov %vm9197_vm1  ;;  %vm9202_vm1 = vnez %v9201_v23 }
 0x3ec   : > { %vm9205_vm15 = vmmov %vm9200_vm9 }
 0x3ee   : > { %v6849_v26 = vpop.f32.mrf.mxu1 }
 0x3ef   : > { %v1292_v15 = vpop.xlane.xlu1 %1291 }
 0x3f0   : > { %v1319_v11 = vadd.f32 %v1292_v15, %v1271_v51  ;;  %v1302_v17 = vpop.xlane.xlu0 %1301  ;;  %2003 = vadd.xlane.f32.xlu2 %v1940_v4  ;;  %2001 = vadd.xlane.f32.xlu1 %v1939_v19  ;;  %v1261_v51 = vld [vmem:[#allocation3 + $0x50] sm:$0xff]  ;;  %v1266_v15 = vld [vmem:[#allocation3 + $0x78] sm:$0xff] }
 0x3f1   : > { %v1324_v49 = vadd.f32 %v1302_v17, %v1276_v24  ;;  %1999 = vadd.xlane.f32.xlu0 %v1938_v30  ;;  %v1270_v24 = vmul.f32 %v9214_v57, %v1254_v7  ;;  %v9225_v57 = vld [vmem:[#allocation58_spill] sm:$0xff] }
 0x3f2   : > { %1336 = vst.msk [vmem:[#allocation3 + $0x20] sm:$0xff] %vm9200_vm9, %v1319_v11  ;;  %4726 = vmatmul.msk.bf16.gmra.mxu2 %vm9202_vm1, %v6794_v12  ;;  %4735 = vmatmul.msk.bf16.gmra.mxu3 %vm9204_vm3, %v6794_v12  ;;  %vm9210_vm9 = vnez %v9036_v34  ;;  %vm9211_vm3 = vcmask 7168   ;;  %v9215_v11 = vld [vmem:[#allocation32_spill] sm:$0xff]  ;;  %v9275_v34 = vld [vmem:[#allocation77_spill] sm:$0xff] }
 0x3f3   : > { %1341 = vst.msk [vmem:[#allocation3 + $0x48] sm:$0xff] %vm9205_vm15, %v1324_v49  ;;  %vm9209_vm15 = vnez %v9002_v56  ;;  %v1941_v58 = vsel %vm9210_vm9, %v6779_v13, 0.0  ;;  %vm9212_vm1 = vmmov %vm9211_vm3  ;;  %v1277_v13 = vmul.f32 %v9215_v11, %v1261_v51  ;;  %v9216_v49 = vld [vmem:[#allocation45_spill] sm:$0xff]  ;;  %v2326_v51 = vsel %vm9176_vm4, %v6849_v26, -1e+30 }
 0x3f4   : > { %v2325_v47 = vsel %vm9209_vm15, %v6834_v32, -1e+30  ;;  %vm9213_vm2 = vmmov %vm9212_vm1  ;;  %v1282_v2 = vmul.f32 %v9216_v49, %v1266_v15  ;;  %v1259_v15 = vld [vmem:[#allocation3 + $0x40] sm:$0xff]  ;;  %v9227_v49 = vld [vmem:[#allocation83_spill] sm:$0xff] }
 0x3f6   : > { %v1284_v36 = vpop.xlane.xlu2 %1283  ;;  %v6871_v28 = vpop.f32.mrf.mxu1 }
 0x3f7   : > { %v1315_v41 = vadd.f32 %v1284_v36, %v1267_v55  ;;  %v1298_v46 = vpop.xlane.xlu1 %1297  ;;  %v2327_v39 = vsel %vm5805_vm5, %v6871_v28, -1e+30  ;;  %v2323_v36 = vsel %vm9174_vm13, %v6802_v48, -1e+30 }
 0x3f8   : > { %v1322_v25 = vadd.f32 %v1298_v46, %v1274_v10  ;;  %v1308_v33 = vpop.xlane.xlu0 %1307  ;;  %2341 = vmax.xlane.f32.xlu1 %v2324_v52  ;;  %2343 = vmax.xlane.f32.xlu2 %v2325_v47  ;;  %v9219_v10 = vld [vmem:[#allocation76_spill] sm:$0xff]  ;;  %v1264_v46 = vld [vmem:[#allocation3 + $0x68] sm:$0xff] }
 0x3f9   : > { %1332 = vst.msk [vmem:[#allocation3] sm:$0xff] %vm9211_vm3, %v1315_v41  ;;  %v1327_v63 = vadd.f32 %v1308_v33, %v1279_v21  ;;  %2005 = vadd.xlane.f32.xlu0 %v1941_v58  ;;  %vm9218_vm3 = vmmov %vm9212_vm1  ;;  %v1256_v41 = vld [vmem:[#allocation3 + $0x28] sm:$0xff] }
 0x3fa   : > { %1339 = vst.msk [vmem:[#allocation3 + $0x38] sm:$0xff] %vm9212_vm1, %v1322_v25  ;;  %v1272_v21 = vmul.f32 %v9222_v1, %v1256_v41  ;;  %v9223_v25 = vld [vmem:[#allocation26_spill] sm:$0xff]  ;;  %v1265_v41 = vld [vmem:[#allocation3 + $0x70] sm:$0xff] }
 0x3fb   : > { %1344 = vst.msk [vmem:[#allocation3 + $0x60] sm:$0xff] %vm9213_vm2, %v1327_v63  ;;  %vm9217_vm2 = vmmov %vm9212_vm1  ;;  %vm9220_vm1 = vnez %v9219_v10  ;;  %v1280_v33 = vmul.f32 %v9223_v25, %v1264_v46  ;;  %v9232_v46 = vld [vmem:[#allocation84_spill] sm:$0xff] }
 0x3fc   : > { %v1281_v1 = vmul.f32 %v9232_v46, %v1265_v41  ;;  %v9240_v46 = vld [vmem:[#allocation41_spill] sm:$0xff] }
 0x3fe   : > { %v1290_v4 = vpop.xlane.xlu2 %1289  ;;  %v6888_v19 = vpop.f32.mrf.mxu1 }
 0x3ff   : > { %v1318_v17 = vadd.f32 %v1290_v4, %v1270_v24  ;;  %v1304_v30 = vpop.xlane.xlu1 %1303  ;;  %v2328_v9 = vsel %vm5817_vm6, %v6888_v19, -1e+30  ;;  %vm9221_vm6 = vmmov %vm9217_vm2  ;;  %v1275_v24 = vmul.f32 %v9225_v57, %v1259_v15 }
 0x400   : > { %v1325_v43 = vadd.f32 %v1304_v30, %v1277_v13  ;;  %v1314_v55 = vpop.xlane.xlu0 %1313  ;;  %2347 = vmax.xlane.f32.xlu1 %v2327_v39  ;;  %2349 = vmax.xlane.f32.xlu2 %v2328_v9  ;;  %v9229_v39 = vld [vmem:[#allocation60_spill] sm:$0xff] }
 0x401   : > { %1335 = vst.msk [vmem:[#allocation3 + $0x18] sm:$0xff] %vm9217_vm2, %v1318_v17  ;;  %v1330_v5 = vadd.f32 %v1314_v55, %v1282_v2  ;;  %2339 = vmax.xlane.f32.xlu0 %v2323_v36  ;;  %v1262_v2 = vld [vmem:[#allocation3 + $0x58] sm:$0xff] }
 0x402   : > { %1342 = vst.msk [vmem:[#allocation3 + $0x50] sm:$0xff] %vm9218_vm3, %v1325_v43  ;;  %4738 = vmatmul.msk.bf16.gmra.mxu3 %vm9220_vm1, %v6794_v12  ;;  %vm9224_vm3 = vmmov %vm9217_vm2  ;;  %v1278_v9 = vmul.f32 %v9229_v39, %v1262_v2  ;;  %v9238_v39 = vld [vmem:[#allocation48_spill] sm:$0xff] }
 0x403   : > { %1347 = vst.msk [vmem:[#allocation3 + $0x78] sm:$0xff] %vm9221_vm6, %v1330_v5  ;;  %vm9226_vm6 = vmmov %vm9217_vm2 }
 0x404   : > { %vm9231_vm1 = vmmov %vm9226_vm6 }
 0x406   : > { %v1294_v52 = vpop.xlane.xlu2 %1293  ;;  %v6908_v47 = vpop.f32.mrf.mxu1 }
 0x407   : > { %v1320_v58 = vadd.f32 %v1294_v52, %v1272_v21  ;;  %v1310_v63 = vpop.xlane.xlu1 %1309  ;;  %v2329_v30 = vsel %vm5830_vm7, %v6908_v47, -1e+30 }
 0x408   : > { %v1328_v7 = vadd.f32 %v1310_v63, %v1280_v33 }
 0x409   : > { %1337 = vst.msk [vmem:[#allocation3 + $0x28] sm:$0xff] %vm9217_vm2, %v1320_v58  ;;  %2345 = vmax.xlane.f32.xlu0 %v2326_v51  ;;  %vm9228_vm2 = vnez %v9227_v49  ;;  %v9244_v49 = vld [vmem:[#allocation62_spill] sm:$0xff] }
 0x40a   : > { %1345 = vst.msk [vmem:[#allocation3 + $0x68] sm:$0xff] %vm9224_vm3, %v1328_v7  ;;  %vm9230_vm3 = vnez %v9014_v29 }
 0x40e   : > { %v1300_v4 = vpop.xlane.xlu2 %1299  ;;  %v6917_v11 = vpop.f32.mrf.mxu1 }
 0x40f   : > { %v1323_v13 = vadd.f32 %v1300_v4, %v1275_v24  ;;  %v2330_v17 = vsel %vm5842_vm8, %v6917_v11, -1e+30  ;;  %v1945_v4 = vld [vmem:[#allocation3 + $0x90] sm:$0xff] }
 0x410   : > { %2353 = vmax.xlane.f32.xlu1 %v2330_v17  ;;  %v1943_v17 = vld [vmem:[#allocation3 + $0x80] sm:$0xff] }
 0x411   : > { %1340 = vst.msk [vmem:[#allocation3 + $0x40] sm:$0xff] %vm9226_vm6, %v1323_v13  ;;  %2351 = vmax.xlane.f32.xlu0 %v2329_v30  ;;  %vm9233_vm6 = vmmov %vm9231_vm1  ;;  %v1944_v13 = vld [vmem:[#allocation3 + $0x88] sm:$0xff]  ;;  %v9237_v30 = vld [vmem:[#allocation79_spill] sm:$0xff] }
 0x412   : > { %4741 = vmatmul.msk.bf16.gmra.mxu3 %vm9228_vm2, %v6794_v12  ;;  %v1961_v2 = vmul.f32 %v9237_v30, %v1945_v4  ;;  %v9247_v4 = vld [vmem:[#allocation69_spill] sm:$0xff]  ;;  %vm9251_vm2 = vnez %v9032_v16 }
 0x413   : > { %v9248_v30 = vsub.f32 %v9246_v61, %v9247_v4  ;;  %v9253_v61 = vld [vmem:[#allocation46_spill] sm:$0xff] }
 0x416   : > { %v1306_v43 = vpop.xlane.xlu2 %1305  ;;  %v6930_v55 = vpop.f32.mrf.mxu1 }
 0x417   : > { %v1326_v36 = vadd.f32 %v1306_v43, %v1278_v9  ;;  %v2331_v5 = vsel %vm9230_vm3, %v6930_v55, -1e+30  ;;  %v1960_v9 = vmul.f32 %v9238_v39, %v1944_v13  ;;  %v1771_v13 = vmul.f32 1.442695, %v9248_v30  ;;  %v9260_v30 = vld [vmem:[#allocation70_spill] sm:$0xff] }
 0x418   : > { %2355 = vmax.xlane.f32.xlu2 %v2331_v5  ;;  %v9239_v5 = vld [vmem:[#allocation78_spill] sm:$0xff] }
 0x419   : > { %1343 = vst.msk [vmem:[#allocation3 + $0x58] sm:$0xff] %vm9231_vm1, %v1326_v36  ;;  %v1959_v41 = vmul.f32 %v9239_v5, %v1943_v17 }
 0x41e   : > { %v1312_v21 = vpop.xlane.xlu2 %1311  ;;  %v6937_v52 = vpop.f32.mrf.mxu1 }
 0x41f   : > { %v1329_v12 = vadd.f32 %v1312_v21, %v1281_v1  ;;  %v2332_v25 = vsel %vm5867_vm10, %v6937_v52, -1e+30  ;;  %v9241_v1 = vld [vmem:[#allocation30_spill] sm:$0xff] }
 0x420   : > { %2357 = vmax.xlane.f32.xlu0 %v2332_v25  ;;  %v9242_v21 = vsub.f32 %v9240_v46, %v9241_v1  ;;  %v9255_v46 = vld [vmem:[#allocation82_spill] sm:$0xff] }
 0x421   : > { %1346 = vst.msk [vmem:[#allocation3 + $0x70] sm:$0xff] %vm9233_vm6, %v1329_v12  ;;  %vm9250_vm6 = vmmov %vm9231_vm1 }
 0x422   : > { %v1773_v12 = vmul.f32 1.442695, %v9242_v21  ;;  %v9256_v21 = vld [vmem:[#allocation42_spill] sm:$0xff] }
 0x424   : > { %5043 = vpow2.f32 %v1773_v12 }
 0x426   : > { %v6943_v33 = vpop.f32.mrf.mxu1 }
 0x427   : > { %v2333_v58 = vsel %vm5880_vm11, %v6943_v33, -1e+30 }
 0x428   : > { %2359 = vmax.xlane.f32.xlu1 %v2333_v58 }
 0x42a   : > { %v6992_v54 = vpop.eup %5043 }
 0x42e   : > { %v6948_v63 = vpop.f32.mrf.mxu1 }
 0x42f   : > { %9234 = vst [vmem:[#allocation13_spill] sm:$0xff] %v6948_v63  ;;  %v2334_v7 = vsel %vm5892_vm12, %v6948_v63, -1e+30 }
 0x430   : > { %2361 = vmax.xlane.f32.xlu2 %v2334_v7 }
 0x436   : > { %v6953_v51 = vpop.f32.mrf.mxu1 }
 0x437   : > { %9235 = vst [vmem:[#allocation14_spill] sm:$0xff] %v6953_v51  ;;  %v2335_v15 = vsel %vm9065_vm0, %v6953_v51, -1e+30 }
 0x438   : > { %2363 = vmax.xlane.f32.xlu0 %v2335_v15  ;;  %v9243_v15 = vld [vmem:[#allocation44_spill] sm:$0xff] }
 0x439   : > { %v9245_v10 = vsub.f32 %v9243_v15, %v9244_v49 }
 0x43e   : > { %v6958_v57 = vpop.f32.mrf.mxu1 }
 0x43f   : > { %9236 = vst [vmem:[#allocation15_spill] sm:$0xff] %v6958_v57  ;;  %v2336_v24 = vsel %vm5917_vm14, %v6958_v57, -1e+30  ;;  %vm9252_vm14 = vmmov %vm9231_vm1 }
 0x440   : > { %2365 = vmax.xlane.f32.xlu1 %v2336_v24  ;;  %v1775_v24 = vmul.f32 1.442695, %v9245_v10  ;;  %v1946_v10 = vld [vmem:[#allocation3 + $0x98] sm:$0xff] }
 0x441   : > { %v1962_v1 = vmul.f32 %v9255_v46, %v1946_v10 }
 0x442   : > { %5045 = vpow2.f32 %v1775_v24 }
 0x443   : > { %v1980_v43 = vpop.xlane.xlu2 %1979  ;;  %v1978_v36 = vpop.xlane.xlu1 %1977  ;;  %5047 = vpow2.f32 %v1771_v13 }
 0x444   : > { %v2009_v25 = vadd.f32 %v1980_v43, %v1961_v2  ;;  %v2008_v58 = vadd.f32 %v1978_v36, %v1960_v9  ;;  %v1976_v7 = vpop.xlane.xlu0 %1975  ;;  %v1948_v2 = vld [vmem:[#allocation3 + $0xa8] sm:$0xff]  ;;  %v1947_v9 = vld [vmem:[#allocation3 + $0xa0] sm:$0xff] }
 0x445   : > { %v2007_v31 = vadd.f32 %v1976_v7, %v1959_v41  ;;  %v1964_v49 = vmul.f32 %v9253_v61, %v1948_v2  ;;  %v9254_v43 = vld [vmem:[#allocation81_spill] sm:$0xff]  ;;  %v9262_v2 = vld [vmem:[#allocation71_spill] sm:$0xff] }
 0x446   : > { %2025 = vst.msk [vmem:[#allocation3 + $0x90] sm:$0xff] %vm9231_vm1, %v2009_v25  ;;  %v6976_v39 = vpop.f32.mrf.mxu1  ;;  %v1963_v36 = vmul.f32 %v9254_v43, %v1947_v9  ;;  %v9257_v25 = vld [vmem:[#allocation61_spill] sm:$0xff] }
 0x447   : > { %9249 = vst [vmem:[#allocation16_spill] sm:$0xff] %v6976_v39  ;;  %v2337_v17 = vsel %vm9251_vm2, %v6976_v39, -1e+30  ;;  %v9263_v9 = vld [vmem:[#allocation73_spill] sm:$0xff] }
 0x448   : > { %2024 = vst.msk [vmem:[#allocation3 + $0x88] sm:$0xff] %vm9250_vm6, %v2008_v58  ;;  %2367 = vmax.xlane.f32.xlu2 %v2337_v17  ;;  %v9258_v58 = vsub.f32 %v9256_v21, %v9257_v25  ;;  %v9264_v61 = vsub.f32 %v9262_v2, %v9263_v9  ;;  %v7000_v46 = vpop.eup %5045  ;;  %vm9267_vm6 = vmmov %vm9231_vm1  ;;  %v2040_v21 = vld [vmem:[#allocation4 + $0x80] sm:$0xff] }
 0x449   : > { %2023 = vst.msk [vmem:[#allocation3 + $0x80] sm:$0xff] %vm9252_vm14, %v2007_v31  ;;  %v9259_v31 = vld [vmem:[#allocation65_spill] sm:$0xff]  ;;  %vm9265_vm14 = vmmov %vm9231_vm1 }
 0x44a   : > { %v1779_v7 = vmul.f32 1.442695, %v9258_v58  ;;  %v9261_v17 = vsub.f32 %v9259_v31, %v9260_v30  ;;  %v1777_v43 = vmul.f32 1.442695, %v9264_v61  ;;  %v9268_v31 = vld [vmem:[#allocation63_spill] sm:$0xff]  ;;  %v9269_v30 = vld [vmem:[#allocation68_spill] sm:$0xff] }
 0x44b   : > { %v1986_v5 = vpop.xlane.xlu2 %1985  ;;  %v1984_v41 = vpop.xlane.xlu1 %1983 }
 0x44c   : > { %v2012_v15 = vadd.f32 %v1986_v5, %v1964_v49  ;;  %v2011_v12 = vadd.f32 %v1984_v41, %v1963_v36  ;;  %v1982_v4 = vpop.xlane.xlu0 %1981  ;;  %v1781_v24 = vmul.f32 1.442695, %v9261_v17  ;;  %v1951_v36 = vld [vmem:[#allocation3 + $0xc0] sm:$0xff]  ;;  %v1950_v5 = vld [vmem:[#allocation3 + $0xb8] sm:$0xff]  ;;  %v7006_v41 = vpop.eup %5047  ;;  %5049 = vpow2.f32 %v1779_v7 }
 0x44d   : > { %v2010_v13 = vadd.f32 %v1982_v4, %v1962_v1  ;;  %v1949_v1 = vld [vmem:[#allocation3 + $0xb0] sm:$0xff]  ;;  %v1967_v25 = vmul.f32 %v7000_v46, %v1951_v36  ;;  %v1966_v58 = vmul.f32 %v6992_v54, %v1950_v5  ;;  %v9270_v17 = vsub.f32 %v9268_v31, %v9269_v30 }
 0x44e   : > { %2028 = vst.msk [vmem:[#allocation3 + $0xa8] sm:$0xff] %vm9265_vm14, %v2012_v15  ;;  %v6998_v10 = vpop.f32.mrf.mxu1  ;;  %5051 = vpow2.f32 %v1781_v24  ;;  %v1965_v4 = vmul.f32 %v7006_v41, %v1949_v1  ;;  %v2136_v7 = vmul.f32 %v6770_v42, %v2040_v21  ;;  %v9271_v24 = vld [vmem:[#allocation72_spill] sm:$0xff]  ;;  %v9276_v1 = vsub.f32 %v9274_v20, %v9275_v34  ;;  %vm9277_vm14 = vmmov %vm9231_vm1  ;;  %v1953_v21 = vld [vmem:[#allocation3 + $0xd0] sm:$0xff] }
 0x44f   : > { %9266 = vst [vmem:[#allocation35_spill] sm:$0xff] %v6998_v10  ;;  %v2338_v49 = vsel %vm9210_vm9, %v6998_v10, -1e+30  ;;  %5053 = vpow2.f32 %v1777_v43  ;;  %v1785_v2 = vmul.f32 1.442695, %v9270_v17  ;;  %v1954_v42 = vld [vmem:[#allocation3 + $0xd8] sm:$0xff] }
 0x450   : > { %2027 = vst.msk [vmem:[#allocation3 + $0xa0] sm:$0xff] %vm9231_vm1, %v2011_v12  ;;  %2369 = vmax.xlane.f32.xlu0 %v2338_v49  ;;  %v9272_v49 = vld [vmem:[#allocation74_spill] sm:$0xff]  ;;  %v1783_v16 = vmul.f32 1.442695, %v9276_v1 }
 0x451   : > { %2026 = vst.msk [vmem:[#allocation3 + $0x98] sm:$0xff] %vm9267_vm6, %v2010_v13  ;;  %v9273_v43 = vsub.f32 %v9271_v24, %v9272_v49  ;;  %5055 = vpow2.f32 %v1785_v2  ;;  %vm9278_vm6 = vmmov %vm9231_vm1  ;;  %v9280_v49 = vld [vmem:[#allocation49_spill] sm:$0xff] }
 0x452   : > { %v7019_v5 = vpop.eup %5049 }
 0x453   : > { %v1992_v15 = vpop.xlane.xlu2 %1991  ;;  %v1990_v12 = vpop.xlane.xlu1 %1989  ;;  %v1787_v23 = vmul.f32 1.442695, %v9273_v43  ;;  %v1969_v20 = vmul.f32 %v7019_v5, %v1953_v21  ;;  %v1955_v21 = vld [vmem:[#allocation3 + $0xe0] sm:$0xff] }
 0x454   : > { %v2015_v13 = vadd.f32 %v1992_v15, %v1967_v25  ;;  %v2014_v9 = vadd.f32 %v1990_v12, %v1966_v58  ;;  %v1988_v61 = vpop.xlane.xlu0 %1987  ;;  %v7025_v30 = vpop.eup %5051  ;;  %v1952_v58 = vld [vmem:[#allocation3 + $0xc8] sm:$0xff]  ;;  %v2041_v15 = vld [vmem:[#allocation4 + $0x130] sm:$0xff] }
 0x455   : > { %v2013_v36 = vadd.f32 %v1988_v61, %v1965_v4  ;;  %v2169_v59 = vpop.f32.mrf.mxu2  ;;  %v7028_v25 = vpop.eup %5053  ;;  %5057 = vpow2.f32 %v1787_v23  ;;  %v1970_v34 = vmul.f32 %v7025_v30, %v1954_v42  ;;  %v2137_v17 = vmul.f32 %v6728_v37, %v2041_v15  ;;  %v9279_v23 = vld [vmem:[#allocation80_spill] sm:$0xff]  ;;  %v1956_v37 = vld [vmem:[#allocation3 + $0xe8] sm:$0xff] }
 0x456   : > { %2031 = vst.msk [vmem:[#allocation3 + $0xc0] sm:$0xff] %vm9277_vm14, %v2015_v13  ;;  %v2209_v31 = vadd.f32 %v2169_v59, %v2136_v7  ;;  %5059 = vpow2.f32 %v1783_v16  ;;  %v1968_v4 = vmul.f32 %v7028_v25, %v1952_v58  ;;  %v9281_v16 = vsub.f32 %v9279_v23, %v9280_v49  ;;  %vm9282_vm14 = vmmov %vm9231_vm1  ;;  %v2042_v58 = vld [vmem:[#allocation4 + $0x138] sm:$0xff] }
 0x457   : > { %2030 = vst.msk [vmem:[#allocation3 + $0xb8] sm:$0xff] %vm9231_vm1, %v2014_v9  ;;  %v7035_v24 = vpop.eup %5055  ;;  %v1958_v49 = vld [vmem:[#allocation3 + $0xf8] sm:$0xff] }
 0x458   : > { %2029 = vst.msk [vmem:[#allocation3 + $0xb0] sm:$0xff] %vm9278_vm6, %v2013_v36  ;;  %v1789_v43 = vmul.f32 1.442695, %v9281_v16  ;;  %vm9283_vm6 = vmmov %vm9231_vm1  ;;  %v2043_v16 = vld [vmem:[#allocation4 + $0x120] sm:$0xff] }
 0x459   : > { %2225 = vst [vmem:[#allocation4 + $0x80] sm:$0xff] %v2209_v31  ;;  %v1957_v31 = vld [vmem:[#allocation3 + $0xf0] sm:$0xff] }
 0x45a   : > { %5061 = vpow2.f32 %v1789_v43  ;;  %v7056_v43 = vld [vmem:[#allocation2 + $0x108] sm:$0xff] }
 0x45b   : > { %v1998_v59 = vpop.xlane.xlu2 %1997  ;;  %v1996_v12 = vpop.xlane.xlu1 %1995 }
 0x45c   : > { %v2018_v7 = vadd.f32 %v1998_v59, %v1970_v34  ;;  %v2017_v13 = vadd.f32 %v1996_v12, %v1969_v20  ;;  %v1994_v2 = vpop.xlane.xlu0 %1993  ;;  %v7041_v1 = vpop.eup %5057  ;;  %v1972_v34 = vmul.f32 %v7035_v24, %v1956_v37 }
 0x45d   : > { %v2016_v9 = vadd.f32 %v1994_v2, %v1968_v4  ;;  %v2171_v61 = vpop.f32.mrf.mxu2  ;;  %v7044_v42 = vpop.eup %5059  ;;  %v1973_v15 = vmul.f32 %v7041_v1, %v1957_v31  ;;  %v2138_v4 = vmul.f32 %v6781_v38, %v2042_v58  ;;  %v7058_v38 = vld [vmem:[#allocation2 + $0x110] sm:$0xff] }
 0x45e   : > { %2034 = vst.msk [vmem:[#allocation3 + $0xd8] sm:$0xff] %vm9282_vm14, %v2018_v7  ;;  %v2210_v36 = vadd.f32 %v2171_v61, %v2137_v17  ;;  %v1971_v12 = vmul.f32 %v7044_v42, %v1955_v21  ;;  %vm9284_vm14 = vmmov %vm9231_vm1  ;;  %v2139_v21 = vmul.f32 %v6810_v0, %v2043_v16  ;;  %v2044_v0 = vld [vmem:[#allocation4 + $0xe0] sm:$0xff] }
 0x45f   : > { %2033 = vst.msk [vmem:[#allocation3 + $0xd0] sm:$0xff] %vm9231_vm1, %v2017_v13 }
 0x460   : > { %2032 = vst.msk [vmem:[#allocation3 + $0xc8] sm:$0xff] %vm9283_vm6, %v2016_v9  ;;  %v7053_v23 = vpop.eup %5061  ;;  %vm9285_vm6 = vmmov %vm9231_vm1 }
 0x461   : > { %2226 = vst [vmem:[#allocation4 + $0x130] sm:$0xff] %v2210_v36  ;;  %v1974_v36 = vmul.f32 %v7053_v23, %v1958_v49  ;;  %v2140_v49 = vmul.f32 %v6776_v18, %v2044_v0  ;;  %v7109_v0 = vld [vmem:[#allocation2 + $0x118] sm:$0xff] }
 0x463   : > { %v2004_v20 = vpop.xlane.xlu2 %2003  ;;  %v2002_v59 = vpop.xlane.xlu1 %2001 }
 0x464   : > { %v2021_v17 = vadd.f32 %v2004_v20, %v1973_v15  ;;  %v2020_v7 = vadd.f32 %v2002_v59, %v1972_v34  ;;  %v2000_v13 = vpop.xlane.xlu0 %1999 }
 0x465   : > { %v2019_v2 = vadd.f32 %v2000_v13, %v1971_v12  ;;  %v2174_v61 = vpop.f32.mrf.mxu2  ;;  %v7081_v13 = vld [vmem:[#allocation2 + $0x128] sm:$0xff] }
 0x466   : > { %2037 = vst.msk [vmem:[#allocation3 + $0xf0] sm:$0xff] %vm9284_vm14, %v2021_v17  ;;  %v2211_v9 = vadd.f32 %v2174_v61, %v2138_v4  ;;  %vm9286_vm14 = vmmov %vm9231_vm1 }
 0x467   : > { %2036 = vst.msk [vmem:[#allocation3 + $0xe8] sm:$0xff] %vm9231_vm1, %v2020_v7  ;;  %v7079_v7 = vld [vmem:[#allocation2 + $0x120] sm:$0xff] }
 0x468   : > { %2035 = vst.msk [vmem:[#allocation3 + $0xe0] sm:$0xff] %vm9285_vm6, %v2019_v2  ;;  %vm9287_vm6 = vmmov %vm9231_vm1  ;;  %v7083_v2 = vld [vmem:[#allocation2 + $0x100] sm:$0xff] }
 0x469   : > { %2227 = vst [vmem:[#allocation4 + $0x138] sm:$0xff] %v2211_v9 }
 0x46b   : > { %v2342_v31 = vpop.xlane.xlu1 %2341  ;;  %v2344_v37 = vpop.xlane.xlu2 %2343 }
 0x46c   : > { %v2006_v58 = vpop.xlane.xlu0 %2005  ;;  %v7063_v15 = vmax.f32 %v7056_v43, %v2342_v31  ;;  %v7066_v34 = vmax.f32 %v7058_v38, %v2344_v37 }
 0x46d   : > { %v2022_v20 = vadd.f32 %v2006_v58, %v1974_v36  ;;  %v2176_v59 = vpop.f32.mrf.mxu2 }
 0x46e   : > { %2886 = vst.msk [vmem:[#allocation2 + $0x108] sm:$0xff] %vm9286_vm14, %v7063_v15  ;;  %v2212_v17 = vadd.f32 %v2176_v59, %v2139_v21  ;;  %2442 = vperm.xlu2 %4992, %v7063_v15   ;;  %2447 = vperm.xlu0 %4993, %v7066_v34   ;;  %vm9288_vm14 = vmmov %vm9231_vm1  ;;  %v9299_v63 = vsub.f32 %v7058_v38, %v7066_v34 }
 0x46f   : > { %2038 = vst.msk [vmem:[#allocation3 + $0xf8] sm:$0xff] %vm9231_vm1, %v2022_v20 }
 0x470   : > { %2887 = vst.msk [vmem:[#allocation2 + $0x110] sm:$0xff] %vm9287_vm6, %v7066_v34  ;;  %vm9289_vm6 = vmmov %vm9231_vm1 }
 0x471   : > { %2228 = vst [vmem:[#allocation4 + $0x120] sm:$0xff] %v2212_v17  ;;  %v2045_v17 = vld [vmem:[#allocation4 + $0xa8] sm:$0xff] }
 0x473   : > { %v2348_v61 = vpop.xlane.xlu1 %2347  ;;  %v2350_v9 = vpop.xlane.xlu2 %2349 }
 0x474   : > { %v2340_v16 = vpop.xlane.xlu0 %2339  ;;  %v7087_v36 = vmax.f32 %v7079_v7, %v2348_v61  ;;  %v7090_v31 = vmax.f32 %v7081_v13, %v2350_v9  ;;  %v2141_v61 = vmul.f32 %v6741_v27, %v2045_v17  ;;  %v7123_v27 = vld [vmem:[#allocation2 + $0x130] sm:$0xff] }
 0x475   : > { %v7093_v37 = vmax.f32 %v7083_v2, %v2340_v16  ;;  %v2179_v21 = vpop.f32.mrf.mxu2 }
 0x476   : > { %2889 = vst.msk [vmem:[#allocation2 + $0x120] sm:$0xff] %vm9288_vm14, %v7087_v36  ;;  %v2213_v20 = vadd.f32 %v2179_v21, %v2140_v49  ;;  %2462 = vperm.xlu0 %4993, %v7090_v31   ;;  %vm9290_vm14 = vmmov %vm9231_vm1 }
 0x477   : > { %2885 = vst.msk [vmem:[#allocation2 + $0x100] sm:$0xff] %vm9231_vm1, %v7093_v37  ;;  %2437 = vperm.xlu1 %4991, %v7093_v37  }
 0x478   : > { %2890 = vst.msk [vmem:[#allocation2 + $0x128] sm:$0xff] %vm9289_vm6, %v7090_v31  ;;  %vm9291_vm6 = vmmov %vm9231_vm1 }
 0x479   : > { %2229 = vst [vmem:[#allocation4 + $0xe0] sm:$0xff] %v2213_v20  ;;  %v7121_v20 = vld [vmem:[#allocation2 + $0x138] sm:$0xff] }
 0x47c   : > { %v2346_v9 = vpop.xlane.xlu0 %2345 }
 0x47d   : > { %v7113_v49 = vmax.f32 %v7109_v0, %v2346_v9  ;;  %v2181_v16 = vpop.f32.mrf.mxu2 }
 0x47e   : > { %v2214_v21 = vadd.f32 %v2181_v16, %v2141_v61 }
 0x47f   : > { %2888 = vst.msk [vmem:[#allocation2 + $0x118] sm:$0xff] %vm9290_vm14, %v7113_v49  ;;  %2457 = vperm.xlu1 %4991, %v7087_v36   ;;  %2452 = vperm.xlu2 %4992, %v7113_v49   ;;  %vm9292_vm14 = vmmov %vm9231_vm1 }
 0x480   : > { %2230 = vst [vmem:[#allocation4 + $0xa8] sm:$0xff] %v2214_v21  ;;  %v7151_v21 = vld [vmem:[#allocation2 + $0x148] sm:$0xff] }
 0x483   : > { %v2354_v17 = vpop.xlane.xlu1 %2353 }
 0x484   : > { %v2352_v9 = vpop.xlane.xlu0 %2351  ;;  %v7126_v18 = vmax.f32 %v7121_v20, %v2354_v17  ;;  %v7141_v17 = vld [vmem:[#allocation2 + $0x140] sm:$0xff] }
 0x485   : > { %v7129_v61 = vmax.f32 %v7123_v27, %v2352_v9 }
 0x486   : > { %2892 = vst.msk [vmem:[#allocation2 + $0x138] sm:$0xff] %vm9231_vm1, %v7126_v18 }
 0x487   : > { %2891 = vst.msk [vmem:[#allocation2 + $0x130] sm:$0xff] %vm9291_vm6, %v7129_v61  ;;  %2472 = vperm.xlu1 %4991, %v7126_v18   ;;  %2467 = vperm.xlu2 %4992, %v7129_v61   ;;  %vm9293_vm6 = vmmov %vm9231_vm1 }
 0x48b   : > { %v2356_v9 = vpop.xlane.xlu2 %2355 }
 0x48c   : > { %v7144_v59 = vmax.f32 %v7141_v17, %v2356_v9  ;;  %v7161_v9 = vld [vmem:[#allocation2 + $0x150] sm:$0xff] }
 0x48e   : > { %2893 = vst.msk [vmem:[#allocation2 + $0x140] sm:$0xff] %vm9292_vm14, %v7144_v59  ;;  %2477 = vperm.xlu0 %4993, %v7144_v59   ;;  %vm9294_vm14 = vmmov %vm9231_vm1  ;;  %v9304_v38 = vsub.f32 %v7141_v17, %v7144_v59 }
 0x493   : > { %v2358_v58 = vpop.xlane.xlu0 %2357 }
 0x494   : > { %v7154_v4 = vmax.f32 %v7151_v21, %v2358_v58  ;;  %v7171_v58 = vld [vmem:[#allocation2 + $0x158] sm:$0xff] }
 0x496   : > { %2894 = vst.msk [vmem:[#allocation2 + $0x148] sm:$0xff] %vm9231_vm1, %v7154_v4  ;;  %2482 = vperm.xlu2 %4992, %v7154_v4  }
 0x49b   : > { %v2360_v16 = vpop.xlane.xlu1 %2359 }
 0x49c   : > { %v7164_v39 = vmax.f32 %v7161_v9, %v2360_v16  ;;  %v7181_v16 = vld [vmem:[#allocation2 + $0x160] sm:$0xff] }
 0x49e   : > { %2895 = vst.msk [vmem:[#allocation2 + $0x150] sm:$0xff] %vm9293_vm6, %v7164_v39  ;;  %2487 = vperm.xlu1 %4991, %v7164_v39   ;;  %vm9296_vm6 = vmmov %vm9231_vm1 }
 0x4a3   : > { %v2362_v12 = vpop.xlane.xlu2 %2361 }
 0x4a4   : > { %v7174_v6 = vmax.f32 %v7171_v58, %v2362_v12  ;;  %v7191_v12 = vld [vmem:[#allocation2 + $0x168] sm:$0xff] }
 0x4a6   : > { %2896 = vst.msk [vmem:[#allocation2 + $0x158] sm:$0xff] %vm9294_vm14, %v7174_v6  ;;  %2492 = vperm.xlu0 %4993, %v7174_v6   ;;  %vm9297_vm14 = vmmov %vm9231_vm1 }
 0x4ab   : > { %v2364_v10 = vpop.xlane.xlu0 %2363 }
 0x4ac   : > { %v7184_v57 = vmax.f32 %v7181_v16, %v2364_v10  ;;  %v7201_v10 = vld [vmem:[#allocation2 + $0x170] sm:$0xff] }
 0x4ae   : > { %2897 = vst.msk [vmem:[#allocation2 + $0x160] sm:$0xff] %vm9231_vm1, %v7184_v57  ;;  %2497 = vperm.xlu2 %4992, %v7184_v57  }
 0x4b3   : > { %v2366_v60 = vpop.xlane.xlu1 %2365 }
 0x4b4   : > { %v7194_v53 = vmax.f32 %v7191_v12, %v2366_v60  ;;  %v7212_v60 = vld [vmem:[#allocation2 + $0x178] sm:$0xff] }
 0x4b6   : > { %9295 = vst [vmem:[#allocation38_spill] sm:$0xff] %v7194_v53  ;;  %2502 = vperm.xlu1 %4991, %v7194_v53  }
 0x4b7   : > { %2898 = vst.msk [vmem:[#allocation2 + $0x168] sm:$0xff] %vm9296_vm6, %v7194_v53  ;;  %vm9311_vm6 = vnez %v9000_v50 }
 0x4bb   : > { %v2368_v51 = vpop.xlane.xlu2 %2367 }
 0x4bc   : > { %v7204_v35 = vmax.f32 %v7201_v10, %v2368_v51  ;;  %v2407_v51 = vmul.f32 1.442695, %v9299_v63  ;;  %v9302_v63 = vsub.f32 %v7083_v2, %v7093_v37  ;;  %v7273_v37 = vpop.f32.mrf.mxu3 }
 0x4be   : > { %2899 = vst.msk [vmem:[#allocation2 + $0x170] sm:$0xff] %vm9297_vm14, %v7204_v35  ;;  %2088 = vperm.xlu1 %4991, %v7006_v41   ;;  %2507 = vperm.xlu0 %4993, %v7204_v35   ;;  %vm9312_vm14 = vnez %v9008_v8 }
 0x4c3   : > { %v2370_v45 = vpop.xlane.xlu0 %2369 }
 0x4c4   : > { %v7215_v53 = vmax.f32 %v7212_v60, %v2370_v45  ;;  %v9298_v45 = vsub.f32 %v7056_v43, %v7063_v15  ;;  %v2403_v43 = vmul.f32 1.442695, %v9302_v63  ;;  %v2419_v15 = vmul.f32 1.442695, %v9304_v38 }
 0x4c6   : > { %2900 = vst.msk [vmem:[#allocation2 + $0x178] sm:$0xff] %vm9231_vm1, %v7215_v53  ;;  %2103 = vperm.xlu1 %4991, %v7028_v25   ;;  %2093 = vperm.xlu0 %4993, %v6992_v54   ;;  %v2405_v41 = vmul.f32 1.442695, %v9298_v45  ;;  %v9300_v54 = vsub.f32 %v7079_v7, %v7087_v36  ;;  %v9305_v7 = vsub.f32 %v7109_v0, %v7113_v49 }
 0x4c7   : > { %2512 = vperm.xlu2 %4992, %v7215_v53   ;;  %v9308_v49 = vsub.f32 %v7123_v27, %v7129_v61 }
 0x4c8   : > { %5063 = vpow2.f32 %v2405_v41  ;;  %v2443_v45 = vpop.permute.xlu2 %2442  ;;  %v9310_v41 = vsub.f32 %v7181_v16, %v7184_v57 }
 0x4c9   : > { %5065 = vpow2.f32 %v2407_v51  ;;  %v2516_v57 = vsub.f32 %v6815_v40, %v2443_v45 }
 0x4cb   : > { %v2532_v38 = vsel %vm9311_vm6, %v2516_v57, 0.0 }
 0x4ce   : > { %2118 = vperm.xlu1 %4991, %v7044_v42   ;;  %2108 = vperm.xlu0 %4993, %v7019_v5   ;;  %v9301_v5 = vsub.f32 %v7081_v13, %v7090_v31  ;;  %v7242_v42 = vpop.eup %5063  ;;  %v2409_v13 = vmul.f32 1.442695, %v9305_v7 }
 0x4cf   : > { %2098 = vperm.xlu2 %4992, %v7000_v46   ;;  %v2411_v46 = vmul.f32 1.442695, %v9300_v54  ;;  %v2427_v54 = vmul.f32 1.442695, %v9310_v41 }
 0x4d0   : > { %v2413_v25 = vmul.f32 1.442695, %v9301_v5 }
 0x4d1   : > { %5067 = vpow2.f32 %v2411_v46 }
 0x4d2   : > { %5069 = vpow2.f32 %v2413_v25 }
 0x4d3   : > { %5071 = vpow2.f32 %v2403_v43 }
 0x4d6   : > { %2133 = vperm.xlu1 %4991, %v7053_v23   ;;  %2123 = vperm.xlu0 %4993, %v7035_v24   ;;  %v7247_v23 = vpop.eup %5065 }
 0x4d7   : > { %2113 = vperm.xlu2 %4992, %v7025_v30   ;;  %v9303_v30 = vsub.f32 %v7121_v20, %v7126_v18  ;;  %v7258_v34 = vpop.eup %5067  ;;  %v9307_v18 = vsub.f32 %v7171_v58, %v7174_v6  ;;  %v2415_v20 = vmul.f32 1.442695, %v9308_v49 }
 0x4d8   : > { %v7263_v2 = vpop.eup %5069 }
 0x4d9   : > { %v2417_v24 = vmul.f32 1.442695, %v9303_v30  ;;  %v7265_v36 = vpop.eup %5071  ;;  %v2425_v59 = vmul.f32 1.442695, %v9307_v18  ;;  %v2453_v46 = vpop.permute.xlu2 %2452 }
 0x4db   : > { %5073 = vpow2.f32 %v2417_v24 }
 0x4dc   : > { %5075 = vpow2.f32 %v2419_v15 }
 0x4dd   : > { %5077 = vpow2.f32 %v2409_v13 }
 0x4de   : > { %2707 = vperm.xlu1 %4991, %v7242_v42   ;;  %2712 = vperm.xlu0 %4993, %v7247_v23  }
 0x4df   : > { %2128 = vperm.xlu2 %4992, %v7041_v1   ;;  %v9306_v1 = vsub.f32 %v7161_v9, %v7164_v39  ;;  %v9309_v39 = vsub.f32 %v7151_v21, %v7154_v4  ;;  %v7297_v9 = vpop.f32.mrf.mxu3 }
 0x4e0   : > { %v2448_v43 = vpop.permute.xlu0 %2447 }
 0x4e1   : > { %v2423_v31 = vmul.f32 1.442695, %v9306_v1  ;;  %v7278_v0 = vpop.eup %5073  ;;  %v2421_v27 = vmul.f32 1.442695, %v9309_v39  ;;  %v2468_v16 = vpop.permute.xlu2 %2467  ;;  %v2517_v15 = vsub.f32 %v6834_v32, %v2448_v43 }
 0x4e2   : > { %v7283_v17 = vpop.eup %5075 }
 0x4e3   : > { %v7285_v51 = vpop.eup %5077  ;;  %5079 = vpow2.f32 %v2423_v31  ;;  %v2533_v1 = vsel %vm9209_vm15, %v2517_v15, 0.0 }
 0x4e4   : > { %5081 = vpow2.f32 %v2425_v59 }
 0x4e5   : > { %5083 = vpow2.f32 %v2415_v20 }
 0x4e6   : > { %2727 = vperm.xlu1 %4991, %v7263_v2   ;;  %2722 = vperm.xlu0 %4993, %v7258_v34   ;;  %5085 = vpow2.f32 %v2421_v27 }
 0x4e7   : > { %2702 = vperm.xlu2 %4992, %v7265_v36   ;;  %v7309_v21 = vpop.f32.mrf.mxu3  ;;  %5087 = vpow2.f32 %v2427_v54 }
 0x4e8   : > { %v2463_v59 = vpop.permute.xlu0 %2462 }
 0x4e9   : > { %v7290_v6 = vpop.eup %5079  ;;  %v2438_v5 = vpop.permute.xlu1 %2437  ;;  %v2520_v27 = vsub.f32 %v6888_v19, %v2463_v59 }
 0x4ea   : > { %v7295_v61 = vpop.eup %5081  ;;  %v2515_v63 = vsub.f32 %v6802_v48, %v2438_v5  ;;  %v2518_v48 = vsub.f32 %v6849_v26, %v2453_v46 }
 0x4eb   : > { %v7299_v58 = vpop.eup %5083  ;;  %v2536_v46 = vsel %vm9312_vm14, %v2520_v27, 0.0  ;;  %v2048_v27 = vld [vmem:[#allocation4 + $0xe8] sm:$0xff] }
 0x4ec   : > { %v7307_v4 = vpop.eup %5085  ;;  %v2531_v24 = vsel %vm9174_vm13, %v2515_v63, 0.0  ;;  %v2534_v20 = vsel %vm9176_vm4, %v2518_v48, 0.0 }
 0x4ed   : > { %v7312_v25 = vpop.eup %5087  ;;  %v2547_v7 = vadd.f32 %v2532_v38, %v2531_v24 }
 0x4ee   : > { %2742 = vperm.xlu1 %4991, %v7283_v17   ;;  %2737 = vperm.xlu0 %4993, %v7278_v0  }
 0x4ef   : > { %2717 = vperm.xlu2 %4992, %v7285_v51   ;;  %v7316_v30 = vpop.f32.mrf.mxu3  ;;  %v2548_v40 = vadd.f32 %v2547_v7, %v2533_v1 }
 0x4f0   : > { %v2483_v18 = vpop.permute.xlu2 %2482 }
 0x4f1   : > { %v2458_v13 = vpop.permute.xlu1 %2457  ;;  %v2549_v39 = vadd.f32 %v2548_v40, %v2534_v20 }
 0x4f2   : > { %v2519_v31 = vsub.f32 %v6871_v28, %v2458_v13  ;;  %v2521_v28 = vsub.f32 %v6908_v47, %v2468_v16 }
 0x4f4   : > { %v2535_v32 = vsel %vm5805_vm5, %v2519_v31, 0.0  ;;  %v2537_v24 = vsel %vm5830_vm7, %v2521_v28, 0.0 }
 0x4f5   : > { %v2550_v26 = vadd.f32 %v2549_v39, %v2535_v32  ;;  %v9330_v32 = vld [vmem:[#allocation66_spill] sm:$0xff] }
 0x4f6   : > { %2757 = vperm.xlu1 %4991, %v7295_v61   ;;  %2752 = vperm.xlu0 %4993, %v7290_v6  }
 0x4f7   : > { %2732 = vperm.xlu2 %4992, %v7299_v58   ;;  %v7328_v49 = vpop.f32.mrf.mxu3  ;;  %v2551_v63 = vadd.f32 %v2550_v26, %v2536_v46  ;;  %v9317_v46 = vld [vmem:[#allocation14_spill] sm:$0xff] }
 0x4f9   : > { %v2473_v45 = vpop.permute.xlu1 %2472  ;;  %v2552_v38 = vadd.f32 %v2551_v63, %v2537_v24  ;;  %v9318_v63 = vld [vmem:[#allocation15_spill] sm:$0xff] }
 0x4fa   : > { %v2522_v5 = vsub.f32 %v6917_v11, %v2473_v45  ;;  %v2524_v11 = vsub.f32 %v6937_v52, %v2483_v18 }
 0x4fc   : > { %v2538_v19 = vsel %vm5842_vm8, %v2522_v5, 0.0  ;;  %v2540_v20 = vsel %vm5867_vm10, %v2524_v11, 0.0  ;;  %v2051_v11 = vld [vmem:[#allocation4 + $0x88] sm:$0xff] }
 0x4fd   : > { %v2553_v7 = vadd.f32 %v2552_v38, %v2538_v19  ;;  %v2046_v38 = vld [vmem:[#allocation4 + $0xb8] sm:$0xff] }
 0x4ff   : > { %2747 = vperm.xlu2 %4992, %v7307_v4   ;;  %v2196_v43 = vpop.f32.mrf.mxu3 }
 0x500   : > { %v2478_v54 = vpop.permute.xlu0 %2477 }
 0x501   : > { %v2523_v57 = vsub.f32 %v6930_v55, %v2478_v54  ;;  %v9313_v55 = vld [vmem:[#allocation13_spill] sm:$0xff] }
 0x503   : > { %v2539_v47 = vsel %vm9230_vm3, %v2523_v57, 0.0 }
 0x504   : > { %v2554_v1 = vadd.f32 %v2553_v7, %v2539_v47  ;;  %v9320_v7 = vld [vmem:[#allocation25_spill] sm:$0xff] }
 0x505   : > { %vm9321_vm1 = vnez %v9320_v7  ;;  %v9334_v7 = vsub.f32 %v7201_v10, %v7204_v35 }
 0x506   : > { %v2555_v26 = vadd.f32 %v2554_v1, %v2540_v20  ;;  %v9322_v20 = vld [vmem:[#allocation35_spill] sm:$0xff] }
 0x507   : > { %2762 = vperm.xlu2 %4992, %v7312_v25   ;;  %v7349_v40 = vpop.f32.mrf.mxu3 }
 0x508   : > { %v2498_v41 = vpop.permute.xlu2 %2497 }
 0x509   : > { %v2527_v5 = vsub.f32 %v9317_v46, %v2498_v41 }
 0x50b   : > { %v2543_v47 = vsel %vm9065_vm0, %v2527_v5, 0.0 }
 0x510   : > { %v2488_v15 = vpop.permute.xlu1 %2487 }
 0x511   : > { %v2525_v48 = vsub.f32 %v6943_v33, %v2488_v15  ;;  %v9335_v15 = vld [vmem:[#allocation40_spill] sm:$0xff] }
 0x513   : > { %v2541_v39 = vsel %vm5880_vm11, %v2525_v48, 0.0 }
 0x514   : > { %v2556_v18 = vadd.f32 %v2555_v26, %v2541_v39  ;;  %v9323_v26 = vld [vmem:[#allocation16_spill] sm:$0xff] }
 0x518   : > { %v2493_v13 = vpop.permute.xlu0 %2492 }
 0x519   : > { %v2526_v31 = vsub.f32 %v9313_v55, %v2493_v13 }
 0x51b   : > { %v2542_v28 = vsel %vm5892_vm12, %v2526_v31, 0.0  ;;  %v2201_v31 = vpop.f32.mrf.mxu3 }
 0x51c   : > { %v2557_v24 = vadd.f32 %v2556_v18, %v2542_v28  ;;  %v9333_v18 = vsub.f32 %v7212_v60, %v7215_v53  ;;  %v9339_v53 = vld [vmem:[#allocation37_spill] sm:$0xff] }
 0x51e   : > { %v2558_v48 = vadd.f32 %v2557_v24, %v2543_v47 }
 0x521   : > { %v2513_v16 = vpop.permute.xlu2 %2512 }
 0x522   : > { %v2530_v41 = vsub.f32 %v9322_v20, %v2513_v16  ;;  %v2049_v16 = vld [vmem:[#allocation4 + $0xf8] sm:$0xff] }
 0x528   : > { %v2503_v45 = vpop.permute.xlu1 %2502 }
 0x529   : > { %v2099_v52 = vpop.permute.xlu2 %2098  ;;  %v2528_v57 = vsub.f32 %v9318_v63, %v2503_v45  ;;  %v9325_v63 = vld [vmem:[#allocation29_spill] sm:$0xff] }
 0x52a   : > { %v2144_v33 = vmul.f32 %v2099_v52, %v2048_v27 }
 0x52b   : > { %v2544_v13 = vsel %vm9321_vm1, %v2528_v57, 0.0  ;;  %v2546_v57 = vsel %vm9210_vm9, %v2530_v41, 0.0 }
 0x52c   : > { %v2217_v19 = vadd.f32 %v7309_v21, %v2144_v33  ;;  %v2559_v21 = vadd.f32 %v2558_v48, %v2544_v13 }
 0x52e   : > { %2233 = vst [vmem:[#allocation4 + $0xe8] sm:$0xff] %v2217_v19  ;;  %v2047_v19 = vld [vmem:[#allocation4 + $0x168] sm:$0xff] }
 0x530   : > { %v2089_v1 = vpop.permute.xlu1 %2088  ;;  %v2508_v55 = vpop.permute.xlu0 %2507 }
 0x531   : > { %v2142_v39 = vmul.f32 %v2089_v1, %v2046_v38  ;;  %v2114_v27 = vpop.permute.xlu2 %2113  ;;  %v2529_v45 = vsub.f32 %v9323_v26, %v2508_v55  ;;  %v2054_v38 = vld [vmem:[#allocation4 + $0xf0] sm:$0xff] }
 0x532   : > { %v2147_v28 = vmul.f32 %v2114_v27, %v2051_v11 }
 0x533   : > { %v2215_v52 = vadd.f32 %v7273_v37, %v2142_v39  ;;  %v2545_v33 = vsel %vm9251_vm2, %v2529_v45, 0.0  ;;  %v2204_v39 = vpop.f32.mrf.mxu3 }
 0x534   : > { %v2220_v46 = vadd.f32 %v2196_v43, %v2147_v28  ;;  %v2560_v5 = vadd.f32 %v2559_v21, %v2545_v33  ;;  %v2052_v21 = vld [vmem:[#allocation4 + $0xa0] sm:$0xff] }
 0x535   : > { %2231 = vst [vmem:[#allocation4 + $0xb8] sm:$0xff] %v2215_v52  ;;  %v2050_v28 = vld [vmem:[#allocation4 + $0x20] sm:$0xff] }
 0x536   : > { %2236 = vst [vmem:[#allocation4 + $0x88] sm:$0xff] %v2220_v46  ;;  %v2561_v24 = vadd.f32 %v2560_v5, %v2546_v57 }
 0x538   : > { %v2562_v47 = vrot.slane %v2561_v24, 4  ;;  %v2104_v1 = vpop.permute.xlu1 %2103  ;;  %v2094_v13 = vpop.permute.xlu0 %2093 }
 0x539   : > { %v2145_v11 = vmul.f32 %v2104_v1, %v2049_v16  ;;  %v2129_v48 = vpop.permute.xlu2 %2128  ;;  %v2143_v37 = vmul.f32 %v2094_v13, %v2047_v19 }
 0x53a   : > { %v2563_v55 = vadd.f32 %v2562_v47, %v2561_v24  ;;  %v2150_v20 = vmul.f32 %v2129_v48, %v2054_v38  ;;  %v2053_v38 = vld [vmem:[#allocation4 + $0x170] sm:$0xff] }
 0x53b   : > { %v2218_v43 = vadd.f32 %v7316_v30, %v2145_v11  ;;  %v2216_v27 = vadd.f32 %v7297_v9, %v2143_v37  ;;  %v2055_v9 = vld [vmem:[#allocation4 + $0x140] sm:$0xff]  ;;  %v2206_v48 = vpop.f32.mrf.mxu3 }
 0x53c   : > { %v2564_v41 = vrot.slane %v2563_v55, 2  ;;  %v2223_v26 = vadd.f32 %v2204_v39, %v2150_v20 }
 0x53d   : > { %2234 = vst [vmem:[#allocation4 + $0xf8] sm:$0xff] %v2218_v43 }
 0x53e   : > { %v2565_v45 = vadd.f32 %v2564_v41, %v2563_v55  ;;  %2239 = vst [vmem:[#allocation4 + $0xf0] sm:$0xff] %v2223_v26 }
 0x53f   : > { %2232 = vst [vmem:[#allocation4 + $0x168] sm:$0xff] %v2216_v27  ;;  %v9326_v27 = vld [vmem:[#allocation28_spill] sm:$0xff] }
 0x540   : > { %v2566_v52 = vrot.slane %v2565_v45, 1  ;;  %v2119_v33 = vpop.permute.xlu1 %2118  ;;  %v2109_v46 = vpop.permute.xlu0 %2108  ;;  %vm9327_vm9 = vnez %v9326_v27 }
 0x541   : > { %v2148_v5 = vmul.f32 %v2119_v33, %v2052_v21  ;;  %v2146_v57 = vmul.f32 %v2109_v46, %v2050_v28  ;;  %v2431_v21 = vmul.f32 1.442695, %v9334_v7  ;;  %v9337_v28 = vld [vmem:[#allocation38_spill] sm:$0xff] }
 0x542   : > { %v2567_v24 = vadd.f32 %v2566_v52, %v2565_v45  ;;  %v2433_v45 = vmul.f32 1.442695, %v9333_v18  ;;  %v9338_v52 = vsub.f32 %v7191_v12, %v9337_v28  ;;  %v2703_v12 = vpop.permute.xlu2 %2702  ;;  %v2684_v18 = vld [vmem:[#allocation4 + $0x60] sm:$0xff] }
 0x543   : > { %v2221_v16 = vadd.f32 %v7349_v40, %v2148_v5  ;;  %v2219_v30 = vadd.f32 %v7328_v49, %v2146_v57  ;;  %v9341_v57 = vld [vmem:[#allocation67_spill] sm:$0xff]  ;;  %v2780_v7 = vmul.f32 %v2703_v12, %v2684_v18 }
 0x544   : > { %v2568_v19 = vmul.f32 1.442695, %v2567_v24  ;;  %v2429_v33 = vmul.f32 1.442695, %v9338_v52 }
 0x545   : > { %2237 = vst [vmem:[#allocation4 + $0xa0] sm:$0xff] %v2221_v16 }
 0x546   : > { %5089 = vpow2.f32 %v2568_v19  ;;  %2235 = vst [vmem:[#allocation4 + $0x20] sm:$0xff] %v2219_v30 }
 0x547   : > { %5091 = vpow2.f32 %v2433_v45 }
 0x548   : > { %v2134_v47 = vpop.permute.xlu1 %2133  ;;  %v2124_v1 = vpop.permute.xlu0 %2123  ;;  %5093 = vpow2.f32 %v2431_v21 }
 0x549   : > { %v2151_v13 = vmul.f32 %v2134_v47, %v2055_v9  ;;  %v2149_v11 = vmul.f32 %v2124_v1, %v2053_v38  ;;  %5095 = vpow2.f32 %v2429_v33  ;;  %v9343_v38 = vld [vmem:[#allocation76_spill] sm:$0xff] }
 0x54a   : > { %v7442_v10 = vpop.permute.xlu2 %2717 }
 0x54b   : > { %v2224_v37 = vadd.f32 %v2206_v48, %v2151_v13  ;;  %v2222_v55 = vadd.f32 %v2201_v31, %v2149_v11  ;;  %v2589_v48 = vld [vmem:[#allocation3 + $0x110] sm:$0xff] }
 0x54c   : > { %v5090_v20 = vpop.eup %5089 }
 0x54d   : > { %2240 = vst [vmem:[#allocation4 + $0x140] sm:$0xff] %v2224_v37  ;;  %v2572_v40 = vsel %vm9209_vm15, %v5090_v20, 0.0  ;;  %v2571_v49 = vsel %vm9311_vm6, %v5090_v20, 0.0  ;;  %v2570_v39 = vsel %vm9174_vm13, %v5090_v20, 0.0  ;;  %v7381_v43 = vpack.c.bf16 %v5090_v20, %v5090_v20  ;;  %v2588_v37 = vld [vmem:[#allocation3 + $0x108] sm:$0xff] }
 0x54e   : > { %2238 = vst [vmem:[#allocation4 + $0x170] sm:$0xff] %v2222_v55  ;;  %2623 = vadd.xlane.f32.xlu1 %v2572_v40  ;;  %2621 = vadd.xlane.f32.xlu2 %v2571_v49  ;;  %v2575_v56 = vsel %vm9312_vm14, %v5090_v20, 0.0  ;;  %v2574_v50 = vsel %vm5805_vm5, %v5090_v20, 0.0  ;;  %v2573_v44 = vsel %vm9176_vm4, %v5090_v20, 0.0  ;;  %v2578_v31 = vsel %vm9230_vm3, %v5090_v20, 0.0  ;;  %v2587_v55 = vld [vmem:[#allocation3 + $0x100] sm:$0xff] }
 0x54f   : > { %2619 = vadd.xlane.f32.xlu0 %v2570_v39  ;;  %4744 = vmatmul.msk.bf16.vlgmr.msrb.gmra.mxu3 %vm9327_vm9, %v7381_v43  ;;  %v2577_v41 = vsel %vm5842_vm8, %v5090_v20, 0.0  ;;  %v2576_v8 = vsel %vm5830_vm7, %v5090_v20, 0.0  ;;  %vm9329_vm5 = vnez %v9328_v3  ;;  %v2581_v62 = vsel %vm5892_vm12, %v5090_v20, 0.0  ;;  %v2591_v3 = vld [vmem:[#allocation3 + $0x120] sm:$0xff] }
 0x550   : > { %v2580_v29 = vsel %vm5880_vm11, %v5090_v20, 0.0  ;;  %v2579_v22 = vsel %vm5867_vm10, %v5090_v20, 0.0  ;;  %v2584_v14 = vsel %vm9251_vm2, %v5090_v20, 0.0  ;;  %v2583_v26 = vsel %vm9321_vm1, %v5090_v20, 0.0  ;;  %v7444_v60 = vpop.permute.xlu1 %2707  ;;  %v7446_v5 = vpop.permute.xlu0 %2712 }
 0x551   : > { %v2582_v54 = vsel %vm9065_vm0, %v5090_v20, 0.0  ;;  %vm9331_vm7 = vnez %v9330_v32  ;;  %vm9332_vm8 = vnez %v9325_v63  ;;  %vm9336_vm10 = vnez %v9335_v15  ;;  %v7430_v63 = vpop.eup %5091  ;;  %v2595_v32 = vld [vmem:[#allocation3 + $0x140] sm:$0xff] }
 0x552   : > { %v2585_v59 = vsel %vm9332_vm8, %v5090_v20, 0.0  ;;  %v7432_v46 = vpop.eup %5093  ;;  %vm9340_vm11 = vnez %v9339_v53  ;;  %vm9342_vm12 = vnez %v9341_v57  ;;  %v7451_v24 = vpop.permute.xlu2 %2732  ;;  %vm9344_vm0 = vnez %v9343_v38  ;;  %v9345_v20 = vld [vmem:[#allocation83_spill] sm:$0xff] }
 0x553   : > { %v7436_v35 = vpop.eup %5095  ;;  %vm9346_vm4 = vnez %v9345_v20  ;;  %v2605_v40 = vmul.f32 %v7247_v23, %v2589_v48  ;;  %v2604_v49 = vmul.f32 %v7242_v42, %v2588_v37  ;;  %vm9347_vm13 = vcmask 7168   ;;  %v2598_v48 = vld [vmem:[#allocation3 + $0x158] sm:$0xff]  ;;  %v2597_v37 = vld [vmem:[#allocation3 + $0x150] sm:$0xff] }
 0x554   : > { %vm9348_vm15 = vmmov %vm9347_vm13  ;;  %v2607_v42 = vmul.f32 %v7258_v34, %v2591_v3  ;;  %v2611_v34 = vmul.f32 %v7283_v17, %v2595_v32  ;;  %v2685_v17 = vld [vmem:[#allocation4 + $0xc8] sm:$0xff]  ;;  %v2614_v12 = vmul.f32 %v7295_v61, %v2598_v48  ;;  %v2692_v48 = vld [vmem:[#allocation4] sm:$0xff] }
 0x555   : > { %vm9349_vm9 = vmmov %vm9347_vm13  ;;  %v2600_v61 = vld [vmem:[#allocation3 + $0x168] sm:$0xff] }
 0x556   : > { %2629 = vadd.xlane.f32.xlu1 %v2575_v56  ;;  %2627 = vadd.xlane.f32.xlu2 %v2574_v50  ;;  %v2603_v56 = vmul.f32 %v7265_v36, %v2587_v55  ;;  %vm9350_vm2 = vmmov %vm9349_vm9  ;;  %v2781_v55 = vmul.f32 %v7444_v60, %v2685_v17 }
 0x557   : > { %2625 = vadd.xlane.f32.xlu0 %v2573_v44  ;;  %vm9351_vm3 = vmmov %vm9350_vm2 }
 0x558   : > { %v7453_v16 = vpop.permute.xlu1 %2727  ;;  %v7455_v30 = vpop.permute.xlu0 %2722  ;;  %vm9352_vm6 = vmmov %vm9350_vm2 }
 0x559   : > { %vm9353_vm14 = vmmov %vm9350_vm2 }
 0x55a   : > { %v7457_v19 = vpop.permute.xlu2 %2747  ;;  %vm9354_vm1 = vmmov %vm9350_vm2 }
 0x55b   : > { %vm9357_vm8 = vmmov %vm9354_vm1 }
 0x55e   : > { %2635 = vadd.xlane.f32.xlu1 %v2578_v31  ;;  %2633 = vadd.xlane.f32.xlu2 %v2577_v41 }
 0x55f   : > { %2631 = vadd.xlane.f32.xlu0 %v2576_v8  ;;  %4747 = vmatmul.msk.bf16.gmra.mxu3 %vm9329_vm5, %v7381_v43  ;;  %v2592_v8 = vld [vmem:[#allocation3 + $0x128] sm:$0xff]  ;;  %vm9355_vm5 = vmmov %vm9354_vm1 }
 0x560   : > { %v7459_v9 = vpop.permute.xlu1 %2742  ;;  %v7464_v47 = vpop.permute.xlu0 %2737  ;;  %v2608_v23 = vmul.f32 %v7263_v2, %v2592_v8  ;;  %v2593_v2 = vld [vmem:[#allocation3 + $0x130] sm:$0xff]  ;;  %v2686_v8 = vld [vmem:[#allocation4 + $0x28] sm:$0xff] }
 0x561   : > { %v2609_v15 = vmul.f32 %v7299_v58, %v2593_v2  ;;  %v2613_v58 = vmul.f32 %v7290_v6, %v2597_v37  ;;  %v2599_v6 = vld [vmem:[#allocation3 + $0x160] sm:$0xff]  ;;  %v2782_v3 = vmul.f32 %v7446_v5, %v2686_v8  ;;  %v2788_v37 = vmul.f32 %v7459_v9, %v2692_v48 }
 0x562   : > { %v7466_v1 = vpop.permute.xlu2 %2762  ;;  %v2688_v2 = vld [vmem:[#allocation4 + $0xc0] sm:$0xff] }
 0x566   : > { %2641 = vadd.xlane.f32.xlu1 %v2581_v62  ;;  %2639 = vadd.xlane.f32.xlu2 %v2580_v29 }
 0x567   : > { %2637 = vadd.xlane.f32.xlu0 %v2579_v22 }
 0x568   : > { %v7468_v13 = vpop.permute.xlu1 %2757  ;;  %v7470_v11 = vpop.permute.xlu0 %2752 }
 0x56e   : > { %2647 = vadd.xlane.f32.xlu1 %v2584_v14  ;;  %2645 = vadd.xlane.f32.xlu2 %v2583_v26 }
 0x56f   : > { %2643 = vadd.xlane.f32.xlu0 %v2582_v54  ;;  %4750 = vmatmul.msk.bf16.gmra.mxu3 %vm9331_vm7, %v7381_v43  ;;  %vm9356_vm7 = vmmov %vm9354_vm1 }
 0x577   : > { %2649 = vadd.xlane.f32.xlu0 %v2585_v59  ;;  %v2594_v59 = vld [vmem:[#allocation3 + $0x138] sm:$0xff] }
 0x578   : > { %v2610_v45 = vmul.f32 %v7278_v0, %v2594_v59  ;;  %v2596_v0 = vld [vmem:[#allocation3 + $0x148] sm:$0xff] }
 0x57f   : > { %4753 = vmatmul.msk.bf16.gmra.mxu3 %vm9336_vm10, %v7381_v43  ;;  %vm9358_vm10 = vmmov %vm9354_vm1 }
 0x586   : > { %2777 = vperm.xlu2 %4992, %v7430_v63  }
 0x587   : > { %2772 = vperm.xlu1 %4991, %v7432_v46  }
 0x58b   : > { %2767 = vperm.xlu0 %4993, %v7436_v35  }
 0x58f   : > { %4756 = vmatmul.msk.bf16.gmra.mxu3 %vm9340_vm11, %v7381_v43  ;;  %vm9359_vm11 = vmmov %vm9354_vm1 }
 0x59f   : > { %4759 = vmatmul.msk.bf16.gmra.mxu3 %vm9342_vm12, %v7381_v43  ;;  %vm9360_vm12 = vmmov %vm9354_vm1 }
 0x5af   : > { %4762 = vmatmul.msk.bf16.gmra.mxu3 %vm9344_vm0, %v7381_v43  ;;  %vm9361_vm0 = vmmov %vm9354_vm1 }
 0x5bf   : > { %4765 = vmatmul.msk.bf16.gmra.mxu3 %vm9346_vm4, %v7381_v43  ;;  %v2590_v43 = vld [vmem:[#allocation3 + $0x118] sm:$0xff]  ;;  %vm9362_vm4 = vmmov %vm9361_vm0 }
 0x5c0   : > { %v2606_v36 = vmul.f32 %v7285_v51, %v2590_v43 }
 0x5c1   : > { %v2624_v39 = vpop.xlane.xlu1 %2623  ;;  %v2622_v27 = vpop.xlane.xlu2 %2621 }
 0x5c2   : > { %v2653_v50 = vadd.f32 %v2624_v39, %v2605_v40  ;;  %v2652_v44 = vadd.f32 %v2622_v27, %v2604_v49  ;;  %v2620_v31 = vpop.xlane.xlu0 %2619  ;;  %v2612_v49 = vmul.f32 %v7307_v4, %v2596_v0  ;;  %v2616_v4 = vmul.f32 %v7436_v35, %v2600_v61  ;;  %v2693_v0 = vld [vmem:[#allocation4 + $0x78] sm:$0xff] }
 0x5c3   : > { %v2651_v41 = vadd.f32 %v2620_v31, %v2603_v56 }
 0x5c4   : > { %2669 = vst.msk [vmem:[#allocation3 + $0x110] sm:$0xff] %vm9347_vm13, %v2653_v50 }
 0x5c5   : > { %2668 = vst.msk [vmem:[#allocation3 + $0x108] sm:$0xff] %vm9348_vm15, %v2652_v44 }
 0x5c6   : > { %2667 = vst.msk [vmem:[#allocation3 + $0x100] sm:$0xff] %vm9349_vm9, %v2651_v41  ;;  %v2601_v41 = vld [vmem:[#allocation3 + $0x170] sm:$0xff] }
 0x5c7   : > { %v2617_v60 = vmul.f32 %v7432_v46, %v2601_v41  ;;  %v2602_v46 = vld [vmem:[#allocation3 + $0x178] sm:$0xff] }
 0x5c8   : > { %v2618_v5 = vmul.f32 %v7430_v63, %v2602_v46  ;;  %v2690_v63 = vld [vmem:[#allocation4 + $0x98] sm:$0xff] }
 0x5c9   : > { %v2630_v62 = vpop.xlane.xlu1 %2629  ;;  %v2628_v29 = vpop.xlane.xlu2 %2627 }
 0x5ca   : > { %v2656_v22 = vadd.f32 %v2630_v62, %v2608_v23  ;;  %v2655_v14 = vadd.f32 %v2628_v29, %v2607_v42  ;;  %v2626_v26 = vpop.xlane.xlu0 %2625  ;;  %v2615_v42 = vmul.f32 %v7312_v25, %v2599_v6  ;;  %v2698_v6 = vld [vmem:[#allocation4 + $0x158] sm:$0xff] }
 0x5cb   : > { %v2654_v54 = vadd.f32 %v2626_v26, %v2606_v36 }
 0x5cc   : > { %2672 = vst.msk [vmem:[#allocation3 + $0x128] sm:$0xff] %vm9350_vm2, %v2656_v22 }
 0x5cd   : > { %2671 = vst.msk [vmem:[#allocation3 + $0x120] sm:$0xff] %vm9351_vm3, %v2655_v14 }
 0x5ce   : > { %2670 = vst.msk [vmem:[#allocation3 + $0x118] sm:$0xff] %vm9352_vm6, %v2654_v54  ;;  %v2687_v54 = vld [vmem:[#allocation4 + $0x38] sm:$0xff] }
 0x5cf   : > { %v2783_v35 = vmul.f32 %v7442_v10, %v2687_v54 }
 0x5d1   : > { %v2636_v51 = vpop.xlane.xlu1 %2635  ;;  %v2634_v21 = vpop.xlane.xlu2 %2633 }
 0x5d2   : > { %v2659_v28 = vadd.f32 %v2636_v51, %v2611_v34  ;;  %v2658_v52 = vadd.f32 %v2634_v21, %v2610_v45  ;;  %v2632_v33 = vpop.xlane.xlu0 %2631  ;;  %v2813_v53 = vpop.f32.mrf.mxu3  ;;  %v2784_v34 = vmul.f32 %v7455_v30, %v2688_v2  ;;  %v2689_v51 = vld [vmem:[#allocation4 + $0x18] sm:$0xff] }
 0x5d3   : > { %v2657_v57 = vadd.f32 %v2632_v33, %v2609_v15  ;;  %v2853_v38 = vadd.f32 %v2813_v53, %v2780_v7  ;;  %v2785_v21 = vmul.f32 %v7453_v16, %v2689_v51  ;;  %v2691_v53 = vld [vmem:[#allocation4 + $0x8] sm:$0xff] }
 0x5d4   : > { %2675 = vst.msk [vmem:[#allocation3 + $0x140] sm:$0xff] %vm9353_vm14, %v2659_v28  ;;  %v2786_v28 = vmul.f32 %v7451_v24, %v2690_v63 }
 0x5d5   : > { %2674 = vst.msk [vmem:[#allocation3 + $0x138] sm:$0xff] %vm9354_vm1, %v2658_v52 }
 0x5d6   : > { %2673 = vst.msk [vmem:[#allocation3 + $0x130] sm:$0xff] %vm9355_vm5, %v2657_v57  ;;  %v2787_v57 = vmul.f32 %v7464_v47, %v2691_v53 }
 0x5d7   : > { %2869 = vst [vmem:[#allocation4 + $0x60] sm:$0xff] %v2853_v38 }
 0x5d9   : > { %v2642_v20 = vpop.xlane.xlu1 %2641  ;;  %v2640_v40 = vpop.xlane.xlu2 %2639 }
 0x5da   : > { %v2662_v39 = vadd.f32 %v2642_v20, %v2614_v12  ;;  %v2661_v27 = vadd.f32 %v2640_v40, %v2613_v58  ;;  %v2638_v56 = vpop.xlane.xlu0 %2637  ;;  %v2815_v50 = vpop.f32.mrf.mxu3  ;;  %v2789_v12 = vmul.f32 %v7457_v19, %v2693_v0 }
 0x5db   : > { %v2660_v44 = vadd.f32 %v2638_v56, %v2612_v49  ;;  %v2854_v31 = vadd.f32 %v2815_v50, %v2781_v55  ;;  %v2694_v55 = vld [vmem:[#allocation4 + $0x50] sm:$0xff]  ;;  %v2695_v49 = vld [vmem:[#allocation4 + $0x68] sm:$0xff] }
 0x5dc   : > { %2678 = vst.msk [vmem:[#allocation3 + $0x158] sm:$0xff] %vm9356_vm7, %v2662_v39  ;;  %v2790_v20 = vmul.f32 %v7470_v11, %v2694_v55  ;;  %v2791_v39 = vmul.f32 %v7468_v13, %v2695_v49  ;;  %v2696_v56 = vld [vmem:[#allocation4 + $0x70] sm:$0xff] }
 0x5dd   : > { %2677 = vst.msk [vmem:[#allocation3 + $0x150] sm:$0xff] %vm9357_vm8, %v2661_v27  ;;  %v2792_v50 = vmul.f32 %v7466_v1, %v2696_v56 }
 0x5de   : > { %2676 = vst.msk [vmem:[#allocation3 + $0x148] sm:$0xff] %vm9358_vm10, %v2660_v44 }
 0x5df   : > { %2870 = vst [vmem:[#allocation4 + $0xc8] sm:$0xff] %v2854_v31  ;;  %v2697_v31 = vld [vmem:[#allocation4 + $0x30] sm:$0xff] }
 0x5e1   : > { %v2648_v43 = vpop.xlane.xlu1 %2647  ;;  %v2646_v23 = vpop.xlane.xlu2 %2645 }
 0x5e2   : > { %v2665_v62 = vadd.f32 %v2648_v43, %v2617_v60  ;;  %v2664_v29 = vadd.f32 %v2646_v23, %v2616_v4  ;;  %v2644_v36 = vpop.xlane.xlu0 %2643  ;;  %v2818_v22 = vpop.f32.mrf.mxu3  ;;  %v2699_v43 = vld [vmem:[#allocation4 + $0x150] sm:$0xff] }
 0x5e3   : > { %v2663_v14 = vadd.f32 %v2644_v36, %v2615_v42  ;;  %v2855_v26 = vadd.f32 %v2818_v22, %v2782_v3 }
 0x5e4   : > { %2681 = vst.msk [vmem:[#allocation3 + $0x170] sm:$0xff] %vm9359_vm11, %v2665_v62 }
 0x5e5   : > { %2680 = vst.msk [vmem:[#allocation3 + $0x168] sm:$0xff] %vm9360_vm12, %v2664_v29 }
 0x5e6   : > { %2679 = vst.msk [vmem:[#allocation3 + $0x160] sm:$0xff] %vm9361_vm0, %v2663_v14 }
 0x5e7   : > { %2871 = vst [vmem:[#allocation4 + $0x28] sm:$0xff] %v2855_v26 }
 0x5e9   : > { %v2778_v23 = vpop.permute.xlu2 %2777 }
 0x5ea   : > { %v2650_v25 = vpop.xlane.xlu0 %2649  ;;  %v2820_v32 = vpop.f32.mrf.mxu3  ;;  %v2795_v42 = vmul.f32 %v2778_v23, %v2699_v43 }
 0x5eb   : > { %v2666_v59 = vadd.f32 %v2650_v25, %v2618_v5  ;;  %v2856_v18 = vadd.f32 %v2820_v32, %v2783_v35 }
 0x5ed   : > { %2682 = vst.msk [vmem:[#allocation3 + $0x178] sm:$0xff] %vm9362_vm4, %v2666_v59 }
 0x5ee   : > { %2872 = vst [vmem:[#allocation4 + $0x38] sm:$0xff] %v2856_v18 }
 0x5f2   : > { %v2823_v45 = vpop.f32.mrf.mxu3 }
 0x5f3   : > { %v2857_v7 = vadd.f32 %v2823_v45, %v2784_v34 }
 0x5f5   : > { %2873 = vst [vmem:[#allocation4 + $0xc0] sm:$0xff] %v2857_v7 }
 0x5f9   : > { %v2773_v60 = vpop.permute.xlu1 %2772 }
 0x5fa   : > { %v2825_v15 = vpop.f32.mrf.mxu3  ;;  %v2794_v4 = vmul.f32 %v2773_v60, %v2698_v6 }
 0x5fb   : > { %v2858_v10 = vadd.f32 %v2825_v15, %v2785_v21 }
 0x5fd   : > { %2874 = vst [vmem:[#allocation4 + $0x18] sm:$0xff] %v2858_v10  ;;  %v2768_v41 = vpop.permute.xlu0 %2767 }
 0x5fe   : > { %v2793_v61 = vmul.f32 %v2768_v41, %v2697_v31 }
 0x602   : > { %v2828_v52 = vpop.f32.mrf.mxu3 }
 0x603   : > { %v2859_v33 = vadd.f32 %v2828_v52, %v2786_v28 }
 0x605   : > { %2875 = vst [vmem:[#allocation4 + $0x98] sm:$0xff] %v2859_v33 }
 0x60a   : > { %v2830_v38 = vpop.f32.mrf.mxu3 }
 0x60b   : > { %v2860_v30 = vadd.f32 %v2830_v38, %v2787_v57 }
 0x60d   : > { %2876 = vst [vmem:[#allocation4 + $0x8] sm:$0xff] %v2860_v30 }
 0x612   : > { %v2833_v17 = vpop.f32.mrf.mxu3 }
 0x613   : > { %v2861_v16 = vadd.f32 %v2833_v17, %v2788_v37 }
 0x615   : > { %2877 = vst [vmem:[#allocation4] sm:$0xff] %v2861_v16 }
 0x61a   : > { %v2835_v58 = vpop.f32.mrf.mxu3 }
 0x61b   : > { %v2862_v24 = vadd.f32 %v2835_v58, %v2789_v12 }
 0x61d   : > { %2878 = vst [vmem:[#allocation4 + $0x78] sm:$0xff] %v2862_v24 }
 0x622   : > { %v2838_v40 = vpop.f32.mrf.mxu3 }
 0x623   : > { %v2863_v47 = vadd.f32 %v2838_v40, %v2790_v20 }
 0x625   : > { %2879 = vst [vmem:[#allocation4 + $0x50] sm:$0xff] %v2863_v47 }
 0x62a   : > { %v2840_v27 = vpop.f32.mrf.mxu3 }
 0x62b   : > { %v2864_v9 = vadd.f32 %v2840_v27, %v2791_v39 }
 0x62d   : > { %2880 = vst [vmem:[#allocation4 + $0x68] sm:$0xff] %v2864_v9 }
 0x632   : > { %v2843_v44 = vpop.f32.mrf.mxu3 }
 0x633   : > { %v2865_v19 = vadd.f32 %v2843_v44, %v2792_v50 }
 0x635   : > { %2881 = vst [vmem:[#allocation4 + $0x70] sm:$0xff] %v2865_v19 }
 0x63a   : > { %v2845_v8 = vpop.f32.mrf.mxu3 }
 0x63b   : > { %v2866_v11 = vadd.f32 %v2845_v8, %v2793_v61 }
 0x63d   : > { %2882 = vst [vmem:[#allocation4 + $0x30] sm:$0xff] %v2866_v11 }
 0x642   : > { %v2848_v3 = vpop.f32.mrf.mxu3 }
 0x643   : > { %v2867_v13 = vadd.f32 %v2848_v3, %v2794_v4 }
 0x645   : > { %2883 = vst [vmem:[#allocation4 + $0x158] sm:$0xff] %v2867_v13 }
 0x64a   : > { %v2850_v62 = vpop.f32.mrf.mxu3 }
 0x64b   : > { %v2868_v1 = vadd.f32 %v2850_v62, %v2795_v42 }
 0x64d   : > { %2884 = vst [vmem:[#allocation4 + $0x150] sm:$0xff] %v2868_v1 }
 0x64e PF: > { %p4766_p3 = scmp.ne.s32.totalorder %s5340_s17, 2 }
 0x650   : > { %2904 = sbr.rel (%p4766_p3) target bundleno = 2066 (0x812), region = 60 }
 0x655   : > { %v2934_v29 = vld [vmem:[#allocation3 + $0x68] sm:$0xff]  ;;  %v2923_v36 = vld [vmem:[#allocation3 + $0x10] sm:$0xff]  ;;  %v2921_v22 = vld [vmem:[#allocation3] sm:$0xff]  ;;  %v5363_v14 = vmov 0  }
 0x656   : > { %5099 = vset.pattern.permute.xlu2 %v5363_v14  ;;  %5098 = vset.pattern.permute.xlu1 %v5363_v14  ;;  %v2950_v26 = vmax.f32 %v2934_v29, 1e-30  ;;  %v2939_v54 = vmax.f32 %v2923_v36, 1e-30  ;;  %v7520_v46 = vmax.f32 %v2921_v22, 1e-30 }
 0x657   : > { %5097 = vset.pattern.permute.xlu0 %v5363_v14  ;;  %v3966_v32 = vld [vmem:[#allocation3 + $0x100] sm:$0xff]  ;;  %v2922_v45 = vld [vmem:[#allocation3 + $0x8] sm:$0xff]  ;;  %v3445_v11 = vld [vmem:[#allocation3 + $0x90] sm:$0xff] }
 0x658   : > { %5100 = vrcp.f32 %v2950_v26  ;;  %v3144_v35 = vand.u32 2147483647, %v2950_v26  ;;  %v3146_v5 = vand.u32 2147483648, %v2950_v26  ;;  %v2992_v25 = vand.u32 2147483648, %v2939_v54  ;;  %v2933_v59 = vld [vmem:[#allocation3 + $0x60] sm:$0xff]  ;;  %v3444_v7 = vld [vmem:[#allocation3 + $0x88] sm:$0xff] }
 0x659   : > { %5102 = vrcp.f32 %v2939_v54  ;;  %v2990_v18 = vand.u32 2147483647, %v2939_v54  ;;  %v2962_v2 = vand.u32 2147483647, %v7520_v46  ;;  %v2964_v34 = vand.u32 2147483648, %v7520_v46  ;;  %v3443_v15 = vld [vmem:[#allocation3 + $0x80] sm:$0xff] }
 0x65a   : > { %5104 = vrcp.f32 %v7520_v46  ;;  %vm3140_vm13 = vweird.f32 %v2950_v26  ;;  %vm2986_vm15 = vweird.f32 %v2939_v54  ;;  %v7525_v51 = vmax.f32 %v3966_v32, 1e-30 }
 0x65b   : > { %v7527_v21 = vmax.f32 %v2933_v59, 1e-30  ;;  %vm7529_vm9 = vcmp.eq.f32.partialorder %v3144_v35, 8.507059e+37  ;;  %v3147_v63 = vor.u32 1.1754944e-38, %v3146_v5  ;;  %v2993_v28 = vor.u32 1.1754944e-38, %v2992_v25 }
 0x65c   : > { %vm2958_vm2 = vweird.f32 %v7520_v46  ;;  %vm7534_vm3 = vcmp.eq.f32.partialorder %v2990_v18, 8.507059e+37  ;;  %v2965_v53 = vor.u32 1.1754944e-38, %v2964_v34  ;;  %5106 = vrcp.f32 %v7525_v51 }
 0x65d   : > { %v7539_v57 = vmax.f32 %v2922_v45, 1e-30  ;;  %v7541_v38 = vmax.f32 %v3444_v7, 1e-30  ;;  %vm7543_vm6 = vcmp.eq.f32.partialorder %v2962_v2, 8.507059e+37  ;;  %5108 = vrcp.f32 %v7527_v21 }
 0x65e   : > { %v5101_v52 = vpop.eup %5100  ;;  %v4007_v17 = vand.u32 2147483647, %v7525_v51  ;;  %v7549_v16 = vmax.f32 %v3443_v15, 1e-30  ;;  %vm4003_vm1 = vweird.f32 %v7525_v51  ;;  %v4009_v58 = vand.u32 2147483648, %v7525_v51 }
 0x65f   : > { %v5103_v30 = vpop.eup %5102  ;;  %v3136_v48 = vmul.f32 %v5101_v52, %v2950_v26  ;;  %vm3141_vm14 = vweird.f32 %v5101_v52  ;;  %vm3126_vm5 = vweird.f32 %v7527_v21  ;;  %v3130_v20 = vand.u32 2147483647, %v7527_v21 }
 0x660   : > { %v5105_v0 = vpop.eup %5104  ;;  %v2982_v12 = vmul.f32 %v5103_v30, %v2939_v54  ;;  %vm2987_vm7 = vweird.f32 %v5103_v30  ;;  %v3132_v47 = vand.u32 2147483648, %v7527_v21  ;;  %5110 = vrcp.f32 %v7539_v57  ;;  %vm7564_vm11 = vmor %vm3140_vm13, %vm3141_vm14 }
 0x661   : > { %v3137_v24 = vsub.f32 1.0, %v3136_v48  ;;  %v2954_v55 = vmul.f32 %v5105_v0, %v7520_v46  ;;  %vm2959_vm8 = vweird.f32 %v5105_v0  ;;  %vm7558_vm10 = vcmp.eq.f32.partialorder %v4007_v17, 8.507059e+37  ;;  %vm7572_vm0 = vmor %vm2986_vm15, %vm2987_vm7 }
 0x662   : > { %v2983_v40 = vsub.f32 1.0, %v2982_v12  ;;  %v5107_v9 = vpop.eup %5106  ;;  %v4010_v44 = vor.u32 1.1754944e-38, %v4009_v58  ;;  %vm2972_vm12 = vweird.f32 %v7539_v57  ;;  %5112 = vrcp.f32 %v7541_v38  ;;  %vm7584_vm13 = vmor %vm2958_vm2, %vm2959_vm8 }
 0x663   : > { %v3138_v49 = vmul.f32 %v5101_v52, %v3137_v24  ;;  %v2955_v39 = vsub.f32 1.0, %v2954_v55  ;;  %v5109_v19 = vpop.eup %5108  ;;  %v3999_v8 = vmul.f32 %v5107_v9, %v7525_v51  ;;  %vm7577_vm4 = vcmp.eq.f32.partialorder %v3130_v20, 8.507059e+37 }
 0x664   : > { %v2984_v50 = vmul.f32 %v5103_v30, %v2983_v40  ;;  %v3122_v4 = vmul.f32 %v5109_v19, %v7527_v21  ;;  %v3133_v3 = vor.u32 1.1754944e-38, %v3132_v47  ;;  %v2976_v13 = vand.u32 2147483647, %v7539_v57 }
 0x665   : > { %v3139_v31 = vadd.f32 %v5101_v52, %v3138_v49  ;;  %v2956_v61 = vmul.f32 %v5105_v0, %v2955_v39  ;;  %v4000_v42 = vsub.f32 1.0, %v3999_v8  ;;  %vm4004_vm15 = vweird.f32 %v5107_v9 }
 0x666   : > { %v2985_v6 = vadd.f32 %v5103_v30, %v2984_v50  ;;  %v5111_v62 = vpop.eup %5110  ;;  %v3123_v36 = vsub.f32 1.0, %v3122_v4  ;;  %vm3127_vm2 = vweird.f32 %v5109_v19  ;;  %v2978_v32 = vand.u32 2147483648, %v7539_v57 }
 0x667   : > { %v3143_v43 = vsel %vm7564_vm11, %v5101_v52, %v3139_v31  ;;  %v2957_v23 = vadd.f32 %v5105_v0, %v2956_v61  ;;  %v4001_v26 = vmul.f32 %v5107_v9, %v4000_v42  ;;  %v2968_v54 = vmul.f32 %v5111_v62, %v7539_v57  ;;  %vm7616_vm14 = vmor %vm3126_vm5, %vm3127_vm2  ;;  %v2935_v31 = vld [vmem:[#allocation3 + $0x70] sm:$0xff] }
 0x668   : > { %v3148_v1 = vsel %vm7529_vm9, %v3147_v63, %v3143_v43  ;;  %v2989_v29 = vsel %vm7572_vm0, %v5103_v30, %v2985_v6  ;;  %v7601_v46 = vpop.eup %5112  ;;  %vm7607_vm9 = vmor %vm4003_vm1, %vm4004_vm15  ;;  %v3124_v25 = vmul.f32 %v5109_v19, %v3123_v36  ;;  %v3498_v7 = vand.u32 2147483647, %v7541_v38  ;;  %v3967_v63 = vld [vmem:[#allocation3 + $0x108] sm:$0xff] }
 0x669   : > { %3260 = vperm.xlu2 %5099, %v3148_v1   ;;  %v2994_v22 = vsel %vm7534_vm3, %v2993_v28, %v2989_v29  ;;  %v2961_v14 = vsel %vm7584_vm13, %v5105_v0, %v2957_v23  ;;  %vm3494_vm3 = vweird.f32 %v7541_v38  ;;  %v4002_v59 = vadd.f32 %v5107_v9, %v4001_v26  ;;  %v3968_v28 = vld [vmem:[#allocation3 + $0x110] sm:$0xff]  ;;  %v2936_v0 = vld [vmem:[#allocation3 + $0x78] sm:$0xff] }
 0x66a   : > { %3205 = vperm.xlu1 %5098, %v2994_v22   ;;  %v2966_v35 = vsel %vm7543_vm6, %v2965_v53, %v2961_v14  ;;  %v2969_v2 = vsub.f32 1.0, %v2968_v54  ;;  %vm2973_vm6 = vweird.f32 %v5111_v62  ;;  %v3490_v34 = vmul.f32 %v7601_v46, %v7541_v38  ;;  %v2924_v23 = vld [vmem:[#allocation3 + $0x18] sm:$0xff] }
 0x66b   : > { %3195 = vperm.xlu0 %5097, %v2966_v35   ;;  %v3125_v45 = vadd.f32 %v5109_v19, %v3124_v25  ;;  %vm3495_vm1 = vweird.f32 %v7601_v46  ;;  %5114 = vrcp.f32 %v7549_v16  ;;  %v4006_v51 = vsel %vm7607_vm9, %v5107_v9, %v4002_v59  ;;  %vm7634_vm5 = vmor %vm2972_vm12, %vm2973_vm6 }
 0x66c   : > { %v2970_v21 = vmul.f32 %v5111_v62, %v2969_v2  ;;  %v3491_v15 = vsub.f32 1.0, %v3490_v34  ;;  %v3500_v10 = vand.u32 2147483648, %v7541_v38  ;;  %v4011_v52 = vsel %vm7558_vm10, %v4010_v44, %v4006_v51  ;;  %vm7645_vm8 = vmor %vm3494_vm3, %vm3495_vm1 }
 0x66d   : > { %v3129_v33 = vsel %vm7616_vm14, %v5109_v19, %v3125_v45  ;;  %v2979_v30 = vor.u32 1.1754944e-38, %v2978_v32  ;;  %vm2977_vm7 = vcmp.eq.f32.partialorder %v2976_v13, 8.507059e+37  ;;  %v3484_v57 = vand.u32 2147483647, %v7549_v16 }
 0x66e   : > { %v3134_v48 = vsel %vm7577_vm4, %v3133_v3, %v3129_v33  ;;  %v2971_v37 = vadd.f32 %v5111_v62, %v2970_v21  ;;  %v3492_v17 = vmul.f32 %v7601_v46, %v3491_v15  ;;  %v7650_v58 = vmax.f32 %v3967_v63, 1e-30 }
 0x66f   : > { %v7652_v24 = vmax.f32 %v3968_v28, 1e-30  ;;  %vm7657_vm10 = vcmp.eq.f32.partialorder %v3498_v7, 8.507059e+37  ;;  %v3501_v38 = vor.u32 1.1754944e-38, %v3500_v10  ;;  %v3486_v39 = vand.u32 2147483648, %v7549_v16 }
 0x670   : > { %v2975_v55 = vsel %vm7634_vm5, %v5111_v62, %v2971_v37  ;;  %v3493_v20 = vadd.f32 %v7601_v46, %v3492_v17  ;;  %5116 = vrcp.f32 %v7650_v58  ;;  %v7663_v27 = vmax.f32 %v2936_v0, 1e-30 }
 0x671   : > { %4241 = vperm.xlu2 %5099, %v4011_v52   ;;  %v5115_v47 = vpop.eup %5114  ;;  %v2980_v49 = vsel %vm2977_vm7, %v2979_v30, %v2975_v55  ;;  %v4021_v50 = vand.u32 2147483647, %v7650_v58  ;;  %v4023_v44 = vand.u32 2147483648, %v7650_v58  ;;  %vm3480_vm11 = vweird.f32 %v7549_v16 }
 0x672   : > { %3255 = vperm.xlu1 %5098, %v3134_v48   ;;  %v3497_v9 = vsel %vm7645_vm8, %v7601_v46, %v3493_v20  ;;  %v3476_v56 = vmul.f32 %v5115_v47, %v7549_v16  ;;  %vm7672_vm12 = vcmp.eq.f32.partialorder %v3484_v57, 8.507059e+37  ;;  %5118 = vrcp.f32 %v7652_v24  ;;  %v3456_v20 = vld [vmem:[#allocation3 + $0xe8] sm:$0xff] }
 0x673   : > { %3200 = vperm.xlu0 %5097, %v2980_v49   ;;  %vm3481_vm0 = vweird.f32 %v5115_v47  ;;  %v4035_v61 = vand.u32 2147483647, %v7652_v24  ;;  %v4037_v8 = vand.u32 2147483648, %v7652_v24  ;;  %v3502_v6 = vsel %vm7657_vm10, %v3501_v38, %v3497_v9 }
 0x674   : > { %v3477_v41 = vsub.f32 1.0, %v3476_v56  ;;  %v3487_v60 = vor.u32 1.1754944e-38, %v3486_v39  ;;  %vm4017_vm4 = vweird.f32 %v7650_v58  ;;  %5120 = vrcp.f32 %v7663_v27  ;;  %vm7693_vm2 = vmor %vm3480_vm11, %vm3481_vm0 }
 0x675   : > { %vm7683_vm13 = vcmp.eq.f32.partialorder %v4021_v50, 8.507059e+37  ;;  %v4024_v13 = vor.u32 1.1754944e-38, %v4023_v44  ;;  %vm4031_vm15 = vweird.f32 %v7652_v24  ;;  %v7688_v43 = vmax.f32 %v2935_v31, 1e-30 }
 0x676   : > { %v3478_v4 = vmul.f32 %v5115_v47, %v3477_v41  ;;  %v5117_v42 = vpop.eup %5116  ;;  %vm3168_vm9 = vweird.f32 %v7663_v27  ;;  %v3172_v1 = vand.u32 2147483647, %v7663_v27  ;;  %v3174_v29 = vand.u32 2147483648, %v7663_v27 }
 0x677   : > { %v7700_v36 = vmax.f32 %v3445_v11, 1e-30  ;;  %v4013_v14 = vmul.f32 %v5117_v42, %v7650_v58  ;;  %vm7703_vm3 = vcmp.eq.f32.partialorder %v4035_v61, 8.507059e+37  ;;  %v4038_v16 = vor.u32 1.1754944e-38, %v4037_v8 }
 0x678   : > { %v3479_v22 = vadd.f32 %v5115_v47, %v3478_v4  ;;  %5122 = vrcp.f32 %v7688_v43  ;;  %v5119_v54 = vpop.eup %5118  ;;  %v3158_v46 = vand.u32 2147483647, %v7688_v43  ;;  %v3160_v35 = vand.u32 2147483648, %v7688_v43 }
 0x679   : > { %3723 = vperm.xlu2 %5099, %v3502_v6   ;;  %5124 = vrcp.f32 %v7700_v36  ;;  %v7711_v5 = vmax.f32 %v2924_v23, 1e-30  ;;  %v4014_v32 = vsub.f32 1.0, %v4013_v14  ;;  %vm4018_vm14 = vweird.f32 %v5117_v42 }
 0x67a   : > { %v3483_v25 = vsel %vm7693_vm2, %v5115_v47, %v3479_v22  ;;  %v4027_v59 = vmul.f32 %v5119_v54, %v7652_v24  ;;  %v5121_v18 = vpop.eup %5120  ;;  %vm7718_vm6 = vcmp.eq.f32.partialorder %v3172_v1, 8.507059e+37  ;;  %v3175_v45 = vor.u32 1.1754944e-38, %v3174_v29  ;;  %vm7726_vm7 = vmor %vm4017_vm4, %vm4018_vm14  ;;  %v3969_v24 = vld [vmem:[#allocation3 + $0x118] sm:$0xff]  ;;  %v3455_v29 = vld [vmem:[#allocation3 + $0xe0] sm:$0xff] }
 0x67b   : > { %v3488_v2 = vsel %vm7672_vm12, %v3487_v60, %v3483_v25  ;;  %vm3154_vm1 = vweird.f32 %v7688_v43  ;;  %v4015_v7 = vmul.f32 %v5117_v42, %v4014_v32  ;;  %vm4032_vm5 = vweird.f32 %v5119_v54  ;;  %v2925_v25 = vld [vmem:[#allocation3 + $0x20] sm:$0xff] }
 0x67c   : > { %3718 = vperm.xlu1 %5098, %v3488_v2   ;;  %v4028_v51 = vsub.f32 1.0, %v4027_v59  ;;  %v3164_v21 = vmul.f32 %v5121_v18, %v7663_v27  ;;  %vm7730_vm8 = vcmp.eq.f32.partialorder %v3158_v46, 8.507059e+37  ;;  %v3161_v63 = vor.u32 1.1754944e-38, %v3160_v35  ;;  %vm7738_vm12 = vmor %vm4031_vm15, %vm4032_vm5 }
 0x67d   : > { %vm3508_vm10 = vweird.f32 %v7700_v36  ;;  %5126 = vrcp.f32 %v7711_v5  ;;  %v4016_v52 = vadd.f32 %v5117_v42, %v4015_v7  ;;  %vm3169_vm11 = vweird.f32 %v5121_v18 }
 0x67e   : > { %v5123_v28 = vpop.eup %5122  ;;  %v4029_v33 = vmul.f32 %v5119_v54, %v4028_v51  ;;  %v3165_v53 = vsub.f32 1.0, %v3164_v21  ;;  %v3512_v17 = vand.u32 2147483647, %v7700_v36  ;;  %v3514_v0 = vand.u32 2147483648, %v7700_v36  ;;  %vm7753_vm4 = vmor %vm3168_vm9, %vm3169_vm11 }
 0x67f   : > { %v5125_v30 = vpop.eup %5124  ;;  %v3150_v37 = vmul.f32 %v5123_v28, %v7688_v43  ;;  %vm3000_vm0 = vweird.f32 %v7711_v5  ;;  %v4020_v12 = vsel %vm7726_vm7, %v5117_v42, %v4016_v52  ;;  %vm3155_vm15 = vweird.f32 %v5123_v28 }
 0x680   : > { %v4030_v57 = vadd.f32 %v5119_v54, %v4029_v33  ;;  %v3166_v58 = vmul.f32 %v5121_v18, %v3165_v53  ;;  %v3504_v55 = vmul.f32 %v5125_v30, %v7700_v36  ;;  %v4025_v40 = vsel %vm7683_vm13, %v4024_v13, %v4020_v12  ;;  %vm7770_vm13 = vmor %vm3154_vm1, %vm3155_vm15  ;;  %v3446_v36 = vld [vmem:[#allocation3 + $0x98] sm:$0xff] }
 0x681   : > { %v3151_v47 = vsub.f32 1.0, %v3150_v37  ;;  %v3004_v49 = vand.u32 2147483647, %v7711_v5  ;;  %4246 = vperm.xlu0 %5097, %v4025_v40   ;;  %vm3509_vm2 = vweird.f32 %v5125_v30  ;;  %v7762_v19 = vmax.f32 %v3969_v24, 1e-30  ;;  %v3970_v37 = vld [vmem:[#allocation3 + $0x120] sm:$0xff] }
 0x682   : > { %v4034_v39 = vsel %vm7738_vm12, %v5119_v54, %v4030_v57  ;;  %v3167_v9 = vadd.f32 %v5121_v18, %v3166_v58  ;;  %v3505_v56 = vsub.f32 1.0, %v3504_v55  ;;  %v7764_v31 = vmax.f32 %v3456_v20, 1e-30  ;;  %vm7779_vm9 = vmor %vm3508_vm10, %vm3509_vm2 }
 0x683   : > { %v5127_v50 = vpop.eup %5126  ;;  %v4039_v44 = vsel %vm7703_vm3, %v4038_v16, %v4034_v39  ;;  %v3152_v27 = vmul.f32 %v5123_v28, %v3151_v47  ;;  %v3515_v11 = vor.u32 1.1754944e-38, %v3514_v0  ;;  %v3006_v13 = vand.u32 2147483648, %v7711_v5 }
 0x684   : > { %4251 = vperm.xlu2 %5099, %v4039_v44   ;;  %v3171_v41 = vsel %vm7753_vm4, %v5121_v18, %v3167_v9  ;;  %v3506_v8 = vmul.f32 %v5125_v30, %v3505_v56  ;;  %v2996_v6 = vmul.f32 %v5127_v50, %v7711_v5  ;;  %5128 = vrcp.f32 %v7762_v19  ;;  %v3971_v5 = vld [vmem:[#allocation3 + $0x128] sm:$0xff] }
 0x685   : > { %v3176_v60 = vsel %vm7718_vm6, %v3175_v45, %v3171_v41  ;;  %v3153_v4 = vadd.f32 %v5123_v28, %v3152_v27  ;;  %vm3513_vm3 = vcmp.eq.f32.partialorder %v3512_v17, 8.507059e+37  ;;  %vm3001_vm14 = vweird.f32 %v5127_v50 }
 0x686   : > { %3270 = vperm.xlu1 %5098, %v3176_v60   ;;  %v3507_v43 = vadd.f32 %v5125_v30, %v3506_v8  ;;  %v2997_v23 = vsub.f32 1.0, %v2996_v6  ;;  %v4049_v62 = vand.u32 2147483647, %v7762_v19  ;;  %v4051_v1 = vand.u32 2147483648, %v7762_v19  ;;  %vm7796_vm6 = vmor %vm3000_vm0, %vm3001_vm14 }
 0x687   : > { %v3157_v42 = vsel %vm7770_vm13, %v5123_v28, %v3153_v4  ;;  %5130 = vrcp.f32 %v7764_v31  ;;  %vm7800_vm1 = vcmp.eq.f32.partialorder %v3004_v49, 8.507059e+37  ;;  %v3007_v35 = vor.u32 1.1754944e-38, %v3006_v13 }
 0x688   : > { %v3162_v22 = vsel %vm7730_vm8, %v3161_v63, %v3157_v42  ;;  %v3511_v14 = vsel %vm7779_vm9, %v5125_v30, %v3507_v43  ;;  %v2998_v26 = vmul.f32 %v5127_v50, %v2997_v23  ;;  %vm4045_vm5 = vweird.f32 %v7762_v19 }
 0x689   : > { %v3516_v16 = vsel %vm3513_vm3, %v3515_v11, %v3511_v14  ;;  %3265 = vperm.xlu0 %5097, %v3162_v22   ;;  %vm3662_vm7 = vweird.f32 %v7764_v31  ;;  %v7806_v59 = vmax.f32 %v3455_v29, 1e-30  ;;  %v7808_v18 = vmax.f32 %v3446_v36, 1e-30 }
 0x68a   : > { %v2999_v32 = vadd.f32 %v5127_v50, %v2998_v26  ;;  %v5129_v2 = vpop.eup %5128  ;;  %vm7810_vm8 = vcmp.eq.f32.partialorder %v4049_v62, 8.507059e+37  ;;  %v4052_v45 = vor.u32 1.1754944e-38, %v4051_v1  ;;  %v3666_v7 = vand.u32 2147483647, %v7764_v31  ;;  %v3448_v62 = vld [vmem:[#allocation3 + $0xa8] sm:$0xff] }
 0x68b   : > { %v3668_v51 = vand.u32 2147483648, %v7764_v31  ;;  %v4041_v15 = vmul.f32 %v5129_v2, %v7762_v19  ;;  %5132 = vrcp.f32 %v7806_v59  ;;  %v7820_v10 = vmax.f32 %v2925_v25, 1e-30 }
 0x68c   : > { %3728 = vperm.xlu2 %5099, %v3516_v16   ;;  %v3003_v21 = vsel %vm7796_vm6, %v5127_v50, %v2999_v32  ;;  %v3652_v52 = vand.u32 2147483647, %v7806_v59  ;;  %v3654_v33 = vand.u32 2147483648, %v7806_v59  ;;  %v7826_v53 = vmax.f32 %v3971_v5, 1e-30  ;;  %v3458_v50 = vld [vmem:[#allocation3 + $0xf8] sm:$0xff] }
 0x68d   : > { %v5131_v63 = vpop.eup %5130  ;;  %v3008_v28 = vsel %vm7800_vm1, %v3007_v35, %v3003_v21  ;;  %v4042_v30 = vsub.f32 1.0, %v4041_v15  ;;  %vm4046_vm10 = vweird.f32 %v5129_v2  ;;  %5134 = vrcp.f32 %v7808_v18  ;;  %v3447_v21 = vld [vmem:[#allocation3 + $0xa0] sm:$0xff] }
 0x68e   : > { %3210 = vperm.xlu1 %5098, %v3008_v28   ;;  %v3658_v48 = vmul.f32 %v5131_v63, %v7764_v31  ;;  %vm3663_vm11 = vweird.f32 %v5131_v63  ;;  %vm7830_vm12 = vcmp.eq.f32.partialorder %v3666_v7, 8.507059e+37  ;;  %v3669_v0 = vor.u32 1.1754944e-38, %v3668_v51  ;;  %vm7839_vm0 = vmor %vm4045_vm5, %vm4046_vm10 }
 0x68f   : > { %v3526_v12 = vand.u32 2147483647, %v7808_v18  ;;  %v4043_v57 = vmul.f32 %v5129_v2, %v4042_v30  ;;  %v3528_v55 = vand.u32 2147483648, %v7808_v18  ;;  %5136 = vrcp.f32 %v7820_v10  ;;  %vm7855_vm13 = vmor %vm3662_vm7, %vm3663_vm11 }
 0x690   : > { %v3659_v58 = vsub.f32 1.0, %v3658_v48  ;;  %vm3648_vm4 = vweird.f32 %v7806_v59  ;;  %vm7844_vm15 = vcmp.eq.f32.partialorder %v3652_v52, 8.507059e+37  ;;  %v3655_v40 = vor.u32 1.1754944e-38, %v3654_v33  ;;  %v2926_v33 = vld [vmem:[#allocation3 + $0x28] sm:$0xff] }
 0x691   : > { %v7848_v38 = vmax.f32 %v3970_v37, 1e-30  ;;  %v5133_v47 = vpop.eup %5132  ;;  %v4044_v49 = vadd.f32 %v5129_v2, %v4043_v57  ;;  %vm3522_vm2 = vweird.f32 %v7808_v18  ;;  %5138 = vrcp.f32 %v7826_v53 }
 0x692   : > { %v3660_v39 = vmul.f32 %v5131_v63, %v3659_v58  ;;  %v3644_v56 = vmul.f32 %v5133_v47, %v7806_v59  ;;  %vm7860_vm9 = vcmp.eq.f32.partialorder %v3526_v12, 8.507059e+37  ;;  %vm3014_vm3 = vweird.f32 %v7820_v10 }
 0x693   : > { %v3018_v44 = vand.u32 2147483647, %v7820_v10  ;;  %v5135_v27 = vpop.eup %5134  ;;  %v4048_v19 = vsel %vm7839_vm0, %v5129_v2, %v4044_v49  ;;  %v3529_v31 = vor.u32 1.1754944e-38, %v3528_v55  ;;  %v3020_v61 = vand.u32 2147483648, %v7820_v10 }
 0x694   : > { %v3661_v41 = vadd.f32 %v5131_v63, %v3660_v39  ;;  %v4053_v8 = vsel %vm7810_vm8, %v4052_v45, %v4048_v19  ;;  %v3645_v11 = vsub.f32 1.0, %v3644_v56  ;;  %vm3649_vm14 = vweird.f32 %v5133_v47  ;;  %v3972_v56 = vld [vmem:[#allocation3 + $0x130] sm:$0xff]  ;;  %v3973_v39 = vld [vmem:[#allocation3 + $0x138] sm:$0xff] }
 0x695   : > { %v3518_v6 = vmul.f32 %v5135_v27, %v7808_v18  ;;  %v5137_v60 = vpop.eup %5136  ;;  %4256 = vperm.xlu0 %5097, %v4053_v8   ;;  %vm3523_vm6 = vweird.f32 %v5135_v27  ;;  %v4077_v3 = vand.u32 2147483647, %v7826_v53  ;;  %5140 = vrcp.f32 %v7848_v38  ;;  %vm7882_vm1 = vmor %vm3648_vm4, %vm3649_vm14 }
 0x696   : > { %v3665_v4 = vsel %vm7855_vm13, %v5131_v63, %v3661_v41  ;;  %v3646_v43 = vmul.f32 %v5133_v47, %v3645_v11  ;;  %v3010_v42 = vmul.f32 %v5137_v60, %v7820_v10  ;;  %vm3015_vm5 = vweird.f32 %v5137_v60  ;;  %vm7895_vm8 = vmor %vm3522_vm2, %vm3523_vm6 }
 0x697   : > { %v3670_v13 = vsel %vm7830_vm12, %v3669_v0, %v3665_v4  ;;  %v3519_v23 = vsub.f32 1.0, %v3518_v6  ;;  %v5139_v1 = vpop.eup %5138  ;;  %vm7886_vm7 = vcmp.eq.f32.partialorder %v3018_v44, 8.507059e+37  ;;  %v3021_v22 = vor.u32 1.1754944e-38, %v3020_v61  ;;  %vm7913_vm0 = vmor %vm3014_vm3, %vm3015_vm5 }
 0x698   : > { %3783 = vperm.xlu2 %5099, %v3670_v13   ;;  %v4079_v14 = vand.u32 2147483648, %v7826_v53  ;;  %v3647_v26 = vadd.f32 %v5133_v47, %v3646_v43  ;;  %v3011_v54 = vsub.f32 1.0, %v3010_v42  ;;  %v4069_v46 = vmul.f32 %v5139_v1, %v7826_v53 }
 0x699   : > { %v3520_v16 = vmul.f32 %v5135_v27, %v3519_v23  ;;  %vm4073_vm10 = vweird.f32 %v7826_v53  ;;  %vm4074_vm11 = vweird.f32 %v5139_v1  ;;  %vm7900_vm12 = vcmp.eq.f32.partialorder %v4077_v3, 8.507059e+37 }
 0x69a   : > { %v7904_v32 = vmax.f32 %v3448_v62, 1e-30  ;;  %v3651_v59 = vsel %vm7882_vm1, %v5133_v47, %v3647_v26  ;;  %v3012_v2 = vmul.f32 %v5137_v60, %v3011_v54  ;;  %v4070_v34 = vsub.f32 1.0, %v4069_v46 }
 0x69b   : > { %v3521_v5 = vadd.f32 %v5135_v27, %v3520_v16  ;;  %v5141_v18 = vpop.eup %5140  ;;  %v3656_v45 = vsel %vm7844_vm15, %v3655_v40, %v3651_v59  ;;  %v4080_v51 = vor.u32 1.1754944e-38, %v4079_v14  ;;  %vm4059_vm4 = vweird.f32 %v7848_v38  ;;  %vm7927_vm15 = vmor %vm4073_vm10, %vm4074_vm11  ;;  %v2928_v59 = vld [vmem:[#allocation3 + $0x38] sm:$0xff] }
 0x69c   : > { %5142 = vrcp.f32 %v7904_v32  ;;  %3778 = vperm.xlu1 %5098, %v3656_v45   ;;  %v3013_v63 = vadd.f32 %v5137_v60, %v3012_v2  ;;  %v4071_v28 = vmul.f32 %v5139_v1, %v4070_v34  ;;  %v4055_v52 = vmul.f32 %v5141_v18, %v7848_v38 }
 0x69d   : > { %v3525_v15 = vsel %vm7895_vm8, %v5135_v27, %v3521_v5  ;;  %vm4060_vm2 = vweird.f32 %v5141_v18  ;;  %v4063_v48 = vand.u32 2147483647, %v7848_v38  ;;  %v4065_v37 = vand.u32 2147483648, %v7848_v38 }
 0x69e   : > { %v3530_v10 = vsel %vm7860_vm9, %v3529_v31, %v3525_v15  ;;  %v3017_v17 = vsel %vm7913_vm0, %v5137_v60, %v3013_v63  ;;  %v4072_v0 = vadd.f32 %v5139_v1, %v4071_v28  ;;  %v4056_v12 = vsub.f32 1.0, %v4055_v52  ;;  %vm7951_vm13 = vmor %vm4059_vm4, %vm4060_vm2  ;;  %v3457_v31 = vld [vmem:[#allocation3 + $0xf0] sm:$0xff] }
 0x69f   : > { %3733 = vperm.xlu0 %5097, %v3530_v10   ;;  %v7935_v57 = vmax.f32 %v3447_v21, 1e-30  ;;  %v3022_v53 = vsel %vm7886_vm7, %v3021_v22, %v3017_v17  ;;  %v3554_v58 = vand.u32 2147483647, %v7904_v32  ;;  %v3556_v55 = vand.u32 2147483648, %v7904_v32 }
 0x6a0   : > { %v7941_v24 = vmax.f32 %v2926_v33, 1e-30  ;;  %3215 = vperm.xlu2 %5099, %v3022_v53   ;;  %v4076_v20 = vsel %vm7927_vm15, %v5139_v1, %v4072_v0  ;;  %v4057_v40 = vmul.f32 %v5141_v18, %v4056_v12  ;;  %v4066_v9 = vor.u32 1.1754944e-38, %v4065_v37 }
 0x6a1   : > { %5144 = vrcp.f32 %v7935_v57  ;;  %v4081_v49 = vsel %vm7900_vm12, %v4080_v51, %v4076_v20  ;;  %vm4064_vm9 = vcmp.eq.f32.partialorder %v4063_v48, 8.507059e+37  ;;  %vm3550_vm3 = vweird.f32 %v7904_v32 }
 0x6a2   : > { %v5143_v47 = vpop.eup %5142  ;;  %5146 = vrcp.f32 %v7941_v24  ;;  %v4058_v44 = vadd.f32 %v5141_v18, %v4057_v40  ;;  %vm7958_vm6 = vcmp.eq.f32.partialorder %v3554_v58, 8.507059e+37  ;;  %v3557_v38 = vor.u32 1.1754944e-38, %v3556_v55 }
 0x6a3   : > { %v3546_v27 = vmul.f32 %v5143_v47, %v7904_v32  ;;  %vm3551_vm14 = vweird.f32 %v5143_v47  ;;  %v3540_v41 = vand.u32 2147483647, %v7935_v57  ;;  %v7965_v11 = vmax.f32 %v3972_v56, 1e-30 }
 0x6a4   : > { %4266 = vperm.xlu1 %5098, %v4081_v49   ;;  %v4062_v61 = vsel %vm7951_vm13, %v5141_v18, %v4058_v44  ;;  %v7967_v6 = vmax.f32 %v3458_v50, 1e-30  ;;  %vm3536_vm1 = vweird.f32 %v7935_v57  ;;  %v3542_v4 = vand.u32 2147483648, %v7935_v57  ;;  %vm7979_vm7 = vmor %vm3550_vm3, %vm3551_vm14 }
 0x6a5   : > { %v3547_v8 = vsub.f32 1.0, %v3546_v27  ;;  %v4067_v60 = vsel %vm4064_vm9, %v4066_v9, %v4062_v61  ;;  %v3032_v3 = vand.u32 2147483647, %v7941_v24  ;;  %vm3028_vm5 = vweird.f32 %v7941_v24  ;;  %v3974_v27 = vld [vmem:[#allocation3 + $0x140] sm:$0xff] }
 0x6a6   : > { %5148 = vrcp.f32 %v7965_v11  ;;  %v7974_v23 = vmax.f32 %v3457_v31, 1e-30  ;;  %vm7984_vm8 = vcmp.eq.f32.partialorder %v3540_v41, 8.507059e+37  ;;  %v3034_v36 = vand.u32 2147483648, %v7941_v24 }
 0x6a7   : > { %v5145_v13 = vpop.eup %5144  ;;  %4261 = vperm.xlu0 %5097, %v4067_v60   ;;  %v3548_v43 = vmul.f32 %v5143_v47, %v3547_v8  ;;  %5150 = vrcp.f32 %v7967_v6  ;;  %v4091_v26 = vand.u32 2147483647, %v7965_v11  ;;  %v4093_v16 = vand.u32 2147483648, %v7965_v11 }
 0x6a8   : > { %v5147_v42 = vpop.eup %5146  ;;  %v3532_v1 = vmul.f32 %v5145_v13, %v7935_v57  ;;  %vm3537_vm10 = vweird.f32 %v5145_v13  ;;  %v3543_v46 = vor.u32 1.1754944e-38, %v3542_v4  ;;  %vm7993_vm11 = vcmp.eq.f32.partialorder %v3032_v3, 8.507059e+37  ;;  %v2927_v57 = vld [vmem:[#allocation3 + $0x30] sm:$0xff] }
 0x6a9   : > { %v3549_v22 = vadd.f32 %v5143_v47, %v3548_v43  ;;  %v3024_v14 = vmul.f32 %v5147_v42, %v7941_v24  ;;  %vm3029_vm12 = vweird.f32 %v5147_v42  ;;  %5152 = vrcp.f32 %v7974_v23  ;;  %vm8005_vm4 = vmor %vm3536_vm1, %vm3537_vm10 }
 0x6aa   : > { %v3533_v54 = vsub.f32 1.0, %v3532_v1  ;;  %v3035_v34 = vor.u32 1.1754944e-38, %v3034_v36  ;;  %vm4087_vm0 = vweird.f32 %v7965_v11  ;;  %vm8009_vm15 = vcmp.eq.f32.partialorder %v4091_v26, 8.507059e+37  ;;  %vm8017_vm13 = vmor %vm3028_vm5, %vm3029_vm12 }
 0x6ab   : > { %v3553_v25 = vsel %vm7979_vm7, %v5143_v47, %v3549_v22  ;;  %v3025_v32 = vsub.f32 1.0, %v3024_v14  ;;  %v4094_v21 = vor.u32 1.1754944e-38, %v4093_v16  ;;  %vm3690_vm2 = vweird.f32 %v7967_v6  ;;  %v3975_v16 = vld [vmem:[#allocation3 + $0x148] sm:$0xff] }
 0x6ac   : > { %v3558_v5 = vsel %vm7958_vm6, %v3557_v38, %v3553_v25  ;;  %v3534_v2 = vmul.f32 %v5145_v13, %v3533_v54  ;;  %v5149_v18 = vpop.eup %5148  ;;  %v3694_v33 = vand.u32 2147483647, %v7967_v6  ;;  %v8023_v10 = vmax.f32 %v2928_v59, 1e-30 }
 0x6ad   : > { %3743 = vperm.xlu2 %5099, %v3558_v5   ;;  %v3026_v7 = vmul.f32 %v5147_v42, %v3025_v32  ;;  %v5151_v15 = vpop.eup %5150  ;;  %v4083_v52 = vmul.f32 %v5149_v18, %v7965_v11  ;;  %v3696_v37 = vand.u32 2147483648, %v7967_v6  ;;  %v3682_v17 = vand.u32 2147483648, %v7974_v23 }
 0x6ae   : > { %v3535_v63 = vadd.f32 %v5145_v13, %v3534_v2  ;;  %v3686_v48 = vmul.f32 %v5151_v15, %v7967_v6  ;;  %vm4088_vm9 = vweird.f32 %v5149_v18  ;;  %5154 = vrcp.f32 %v8023_v10  ;;  %v3449_v2 = vld [vmem:[#allocation3 + $0xb0] sm:$0xff] }
 0x6af   : > { %v3027_v30 = vadd.f32 %v5147_v42, %v3026_v7  ;;  %v4084_v12 = vsub.f32 1.0, %v4083_v52  ;;  %v5153_v53 = vpop.eup %5152  ;;  %vm3691_vm3 = vweird.f32 %v5151_v15  ;;  %vm8037_vm14 = vcmp.eq.f32.partialorder %v3694_v33, 8.507059e+37  ;;  %vm8045_vm6 = vmor %vm4087_vm0, %vm4088_vm9 }
 0x6b0   : > { %v3539_v0 = vsel %vm8005_vm4, %v5145_v13, %v3535_v63  ;;  %v3687_v24 = vsub.f32 1.0, %v3686_v48  ;;  %v3672_v49 = vmul.f32 %v5153_v53, %v7974_v23  ;;  %v3697_v50 = vor.u32 1.1754944e-38, %v3696_v37  ;;  %vm8055_vm5 = vmor %vm3690_vm2, %vm3691_vm3  ;;  %v3979_v63 = vld [vmem:[#allocation3 + $0x168] sm:$0xff] }
 0x6b1   : > { %v3544_v58 = vsel %vm7984_vm8, %v3543_v46, %v3539_v0  ;;  %v3031_v55 = vsel %vm8017_vm13, %v5147_v42, %v3027_v30  ;;  %v4085_v40 = vmul.f32 %v5149_v18, %v4084_v12  ;;  %vm3676_vm1 = vweird.f32 %v7974_v23  ;;  %v3450_v46 = vld [vmem:[#allocation3 + $0xb8] sm:$0xff] }
 0x6b2   : > { %3738 = vperm.xlu1 %5098, %v3544_v58   ;;  %v3036_v20 = vsel %vm7993_vm11, %v3035_v34, %v3031_v55  ;;  %v3688_v56 = vmul.f32 %v5151_v15, %v3687_v24  ;;  %v8050_v44 = vmax.f32 %v2927_v57, 1e-30  ;;  %v3673_v41 = vsub.f32 1.0, %v3672_v49  ;;  %v4888_v58 = vld [vmem:[%s8831_s6 + $0x38] sm:$0xff] }
 0x6b3   : > { %3220 = vperm.xlu0 %5097, %v3036_v20   ;;  %v4086_v19 = vadd.f32 %v5149_v18, %v4085_v40  ;;  %vm3677_vm7 = vweird.f32 %v5153_v53  ;;  %v3680_v31 = vand.u32 2147483647, %v7974_v23  ;;  %v3683_v8 = vor.u32 1.1754944e-38, %v3682_v17  ;;  %3361 = vmatpush.bf16.msra.mxu0 %v4888_v58 }
 0x6b4   : > { %v3689_v61 = vadd.f32 %v5151_v15, %v3688_v56  ;;  %5156 = vrcp.f32 %v8050_v44  ;;  %v8061_v11 = vmax.f32 %v3973_v39, 1e-30  ;;  %v5155_v60 = vpop.eup %5154  ;;  %v3674_v3 = vmul.f32 %v5153_v53, %v3673_v41  ;;  %vm8074_vm8 = vmor %vm3676_vm1, %vm3677_vm7  ;;  %4921 = vmatpush.bf16.msra.mxu3 %v4888_v58 }
 0x6b5   : > { %v4090_v4 = vsel %vm8045_vm6, %v5149_v18, %v4086_v19  ;;  %v3060_v6 = vand.u32 2147483647, %v8023_v10  ;;  %v8066_v13 = vmax.f32 %v3974_v27, 1e-30  ;;  %v3052_v1 = vmul.f32 %v5155_v60, %v8023_v10 }
 0x6b6   : > { %v4095_v43 = vsel %vm8009_vm15, %v4094_v21, %v4090_v4  ;;  %v3693_v42 = vsel %vm8055_vm5, %v5151_v15, %v3689_v61  ;;  %v3062_v29 = vand.u32 2147483648, %v8023_v10  ;;  %v3675_v22 = vadd.f32 %v5153_v53, %v3674_v3 }
 0x6b7   : > { %4271 = vperm.xlu2 %5099, %v4095_v43   ;;  %v3698_v36 = vsel %vm8037_vm14, %v3697_v50, %v3693_v42  ;;  %vm3681_vm10 = vcmp.eq.f32.partialorder %v3680_v31, 8.507059e+37  ;;  %v3046_v14 = vand.u32 2147483647, %v8050_v44  ;;  %v3053_v26 = vsub.f32 1.0, %v3052_v1 }
 0x6b8   : > { %vm3056_vm11 = vweird.f32 %v8023_v10  ;;  %vm3057_vm12 = vweird.f32 %v5155_v60  ;;  %5158 = vrcp.f32 %v8061_v11  ;;  %v3679_v23 = vsel %vm8074_vm8, %v5153_v53, %v3675_v22  ;;  %v3978_v53 = vld [vmem:[#allocation3 + $0x160] sm:$0xff] }
 0x6b9   : > { %vm8087_vm0 = vcmp.eq.f32.partialorder %v3060_v6, 8.507059e+37  ;;  %v3048_v54 = vand.u32 2147483648, %v8050_v44  ;;  %5160 = vrcp.f32 %v8066_v13  ;;  %v3684_v25 = vsel %vm3681_vm10, %v3683_v8, %v3679_v23  ;;  %vm8097_vm4 = vmor %vm3056_vm11, %vm3057_vm12 }
 0x6ba   : > { %3793 = vperm.xlu1 %5098, %v3698_v36   ;;  %v5157_v35 = vpop.eup %5156  ;;  %v3054_v32 = vmul.f32 %v5155_v60, %v3053_v26  ;;  %v3063_v59 = vor.u32 1.1754944e-38, %v3062_v29  ;;  %v4105_v5 = vand.u32 2147483647, %v8061_v11  ;;  %vm3042_vm15 = vweird.f32 %v8050_v44  ;;  %v4887_v36 = vld [vmem:[%s8831_s6 + $0x30] sm:$0xff] }
 0x6bb   : > { %3788 = vperm.xlu0 %5097, %v3684_v25   ;;  %v3038_v18 = vmul.f32 %v5157_v35, %v8050_v44  ;;  %vm8103_vm2 = vcmp.eq.f32.partialorder %v3046_v14, 8.507059e+37  ;;  %vm4101_vm13 = vweird.f32 %v8061_v11  ;;  %v4107_v51 = vand.u32 2147483648, %v8061_v11  ;;  %3362 = vmatpush.bf16.msra.mxu0 %v4887_v36 }
 0x6bc   : > { %v3055_v7 = vadd.f32 %v5155_v60, %v3054_v32  ;;  %v4119_v21 = vand.u32 2147483647, %v8066_v13  ;;  %v8110_v15 = vmax.f32 %v3450_v46, 1e-30  ;;  %vm3043_vm9 = vweird.f32 %v5157_v35  ;;  %v8205_v46 = vld [vmem:[%s8833_s8 + $0x38] sm:$0xff]  ;;  %4922 = vmatpush.bf16.msra.mxu3 %v4887_v36  ;;  %v3976_v36 = vld [vmem:[#allocation3 + $0x150] sm:$0xff] }
 0x6bd   : > { %v3039_v28 = vsub.f32 1.0, %v3038_v18  ;;  %v3049_v52 = vor.u32 1.1754944e-38, %v3048_v54  ;;  %v8112_v33 = vmax.f32 %v3449_v2, 1e-30  ;;  %vm8116_vm3 = vcmp.eq.f32.partialorder %v4105_v5, 8.507059e+37  ;;  %vm8133_vm6 = vmor %vm3042_vm15, %vm3043_vm9  ;;  %v8200_v54 = vld [vmem:[%s8832_s7 + $0x38] sm:$0xff]  ;;  %4407 = vmatpush.bf16.msra.mxu2 %v8205_v46 }
 0x6be   : > { %v5159_v10 = vpop.eup %5158  ;;  %v3059_v30 = vsel %vm8097_vm4, %v5155_v60, %v3055_v7  ;;  %vm4115_vm14 = vweird.f32 %v8066_v13  ;;  %5162 = vrcp.f32 %v8110_v15  ;;  %v8125_v57 = vmax.f32 %v3979_v63, 1e-30  ;;  %v3451_v5 = vld [vmem:[#allocation3 + $0xc0] sm:$0xff]  ;;  %v4886_v2 = vld [vmem:[%s8831_s6 + $0x28] sm:$0xff]  ;;  %3884 = vmatpush.bf16.msra.mxu1 %v8200_v54 }
 0x6bf   : > { %v5161_v37 = vpop.eup %5160  ;;  %v3064_v17 = vsel %vm8087_vm0, %v3063_v59, %v3059_v30  ;;  %v3040_v0 = vmul.f32 %v5157_v35, %v3039_v28  ;;  %v4097_v12 = vmul.f32 %v5159_v10, %v8061_v11  ;;  %v4108_v24 = vor.u32 1.1754944e-38, %v4107_v51  ;;  %v2930_v51 = vld [vmem:[#allocation3 + $0x48] sm:$0xff]  ;;  %3363 = vmatpush.bf16.msra.mxu0 %v4886_v2 }
 0x6c0   : > { %3230 = vperm.xlu2 %5099, %v3064_v17   ;;  %v4111_v20 = vmul.f32 %v5161_v37, %v8066_v13  ;;  %vm8138_vm1 = vcmp.eq.f32.partialorder %v4119_v21, 8.507059e+37  ;;  %v4121_v47 = vand.u32 2147483648, %v8066_v13  ;;  %vm4102_vm5 = vweird.f32 %v5159_v10  ;;  %4923 = vmatpush.bf16.msra.mxu3 %v4886_v2 }
 0x6c1   : > { %v3041_v49 = vadd.f32 %v5157_v35, %v3040_v0  ;;  %v4098_v39 = vsub.f32 1.0, %v4097_v12  ;;  %5164 = vrcp.f32 %v8112_v33  ;;  %vm4116_vm7 = vweird.f32 %v5161_v37  ;;  %vm8157_vm8 = vmor %vm4101_vm13, %vm4102_vm5 }
 0x6c2   : > { %v4112_v9 = vsub.f32 1.0, %v4111_v20  ;;  %v3582_v56 = vand.u32 2147483647, %v8110_v15  ;;  %v8145_v50 = vmax.f32 %v3978_v53, 1e-30  ;;  %v3584_v19 = vand.u32 2147483648, %v8110_v15  ;;  %vm8165_vm10 = vmor %vm4115_vm14, %vm4116_vm7 }
 0x6c3   : > { %v3045_v44 = vsel %vm8133_vm6, %v5157_v35, %v3041_v49  ;;  %v4099_v27 = vmul.f32 %v5159_v10, %v4098_v39  ;;  %5166 = vrcp.f32 %v8125_v57  ;;  %v4122_v8 = vor.u32 1.1754944e-38, %v4121_v47 }
 0x6c4   : > { %v8151_v38 = vpop.eup %5162  ;;  %v3050_v41 = vsel %vm8103_vm2, %v3049_v52, %v3045_v44  ;;  %v4113_v61 = vmul.f32 %v5161_v37, %v4112_v9  ;;  %v3568_v60 = vand.u32 2147483647, %v8112_v33  ;;  %vm3578_vm11 = vweird.f32 %v8110_v15  ;;  %v3190_v44 = vld [vmem:[#allocation4 + $0x100] sm:$0xff] }
 0x6c5   : > { %3225 = vperm.xlu1 %5098, %v3050_v41   ;;  %v4100_v4 = vadd.f32 %v5159_v10, %v4099_v27  ;;  %v3574_v11 = vmul.f32 %v8151_v38, %v8110_v15  ;;  %v3570_v6 = vand.u32 2147483648, %v8112_v33  ;;  %vm8173_vm12 = vcmp.eq.f32.partialorder %v3582_v56, 8.507059e+37  ;;  %v2929_v27 = vld [vmem:[#allocation3 + $0x40] sm:$0xff] }
 0x6c6   : > { %v4114_v43 = vadd.f32 %v5161_v37, %v4113_v61  ;;  %vm3564_vm0 = vweird.f32 %v8112_v33  ;;  %5168 = vrcp.f32 %v8145_v50  ;;  %vm3579_vm4 = vweird.f32 %v8151_v38 }
 0x6c7   : > { %v8179_v13 = vpop.eup %5164  ;;  %v4104_v62 = vsel %vm8157_vm8, %v5159_v10, %v4100_v4  ;;  %v3575_v1 = vsub.f32 1.0, %v3574_v11  ;;  %v3585_v29 = vor.u32 1.1754944e-38, %v3584_v19  ;;  %vm8193_vm15 = vcmp.eq.f32.partialorder %v3568_v60, 8.507059e+37  ;;  %vm8218_vm13 = vmor %vm3578_vm11, %vm3579_vm4  ;;  %v3261_v60 = vpop.permute.xlu2 %3260  ;;  %v4885_v4 = vld [vmem:[%s8831_s6 + $0x20] sm:$0xff] }
 0x6c8   : > { %v4109_v22 = vsel %vm8116_vm3, %v4108_v24, %v4104_v62  ;;  %v4118_v14 = vsel %vm8165_vm10, %v5161_v37, %v4114_v43  ;;  %v3560_v26 = vmul.f32 %v8179_v13, %v8112_v33  ;;  %v3571_v59 = vor.u32 1.1754944e-38, %v3570_v6  ;;  %v8301_v43 = vld [vmem:[%s8833_s8 + $0x30] sm:$0xff]  ;;  %3364 = vmatpush.bf16.msra.mxu0 %v4885_v4  ;;  %4924 = vmatpush.bf16.msra.mxu3 %v4885_v4  ;;  %v8428_v4 = vld [vmem:[%s8832_s7 + $0x20] sm:$0xff] }
 0x6c9   : > { %v5167_v35 = vpop.eup %5166  ;;  %4276 = vperm.xlu0 %5097, %v4109_v22   ;;  %v4123_v25 = vsel %vm8138_vm1, %v4122_v8, %v4118_v14  ;;  %v3576_v32 = vmul.f32 %v8151_v38, %v3575_v1  ;;  %vm4185_vm2 = vweird.f32 %v8125_v57  ;;  %vm3565_vm9 = vweird.f32 %v8179_v13  ;;  %v4884_v22 = vld [vmem:[%s8831_s6 + $0x18] sm:$0xff]  ;;  %4408 = vmatpush.bf16.msra.mxu2 %v8301_v43 }
 0x6ca   : > { %4281 = vperm.xlu2 %5099, %v4123_v25   ;;  %v3561_v18 = vsub.f32 1.0, %v3560_v26  ;;  %v4181_v45 = vmul.f32 %v5167_v35, %v8125_v57  ;;  %v4189_v7 = vand.u32 2147483647, %v8125_v57  ;;  %v4191_v63 = vand.u32 2147483648, %v8125_v57  ;;  %vm8242_vm6 = vmor %vm3564_vm0, %vm3565_vm9  ;;  %v8331_v25 = vld [vmem:[%s8833_s8 + $0x28] sm:$0xff] }
 0x6cb   : > { %v3577_v21 = vadd.f32 %v8151_v38, %v3576_v32  ;;  %vm4171_vm3 = vweird.f32 %v8145_v50  ;;  %v8228_v15 = vmax.f32 %v3975_v16, 1e-30  ;;  %vm4186_vm14 = vweird.f32 %v5167_v35 }
 0x6cc   : > { %v5169_v28 = vpop.eup %5168  ;;  %v3562_v52 = vmul.f32 %v8179_v13, %v3561_v18  ;;  %v4182_v10 = vsub.f32 1.0, %v4181_v45  ;;  %v8233_v30 = vmax.f32 %v3451_v5, 1e-30  ;;  %v4177_v0 = vand.u32 2147483648, %v8145_v50  ;;  %vm8256_vm1 = vmor %vm4185_vm2, %vm4186_vm14  ;;  %3365 = vmatpush.bf16.msra.mxu0 %v4884_v22  ;;  %4925 = vmatpush.bf16.msra.mxu3 %v4884_v22 }
 0x6cd   : > { %v3581_v48 = vsel %vm8218_vm13, %v8151_v38, %v3577_v21  ;;  %v4167_v17 = vmul.f32 %v5169_v28, %v8145_v50  ;;  %v8248_v12 = vmax.f32 %v2930_v51, 1e-30  ;;  %5170 = vrcp.f32 %v8228_v15  ;;  %4409 = vmatpush.bf16.msra.mxu2 %v8331_v25 }
 0x6ce   : > { %v3586_v53 = vsel %vm8173_vm12, %v3585_v29, %v3581_v48  ;;  %v3563_v58 = vadd.f32 %v8179_v13, %v3562_v52  ;;  %v4183_v55 = vmul.f32 %v5167_v35, %v4182_v10  ;;  %v4192_v24 = vor.u32 1.1754944e-38, %v4191_v63  ;;  %v3977_v29 = vld [vmem:[#allocation3 + $0x158] sm:$0xff] }
 0x6cf   : > { %3753 = vperm.xlu1 %5098, %v3586_v53   ;;  %v4168_v20 = vsub.f32 1.0, %v4167_v17  ;;  %vm4172_vm5 = vweird.f32 %v5169_v28  ;;  %v4175_v40 = vand.u32 2147483647, %v8145_v50  ;;  %vm4190_vm7 = vcmp.eq.f32.partialorder %v4189_v7, 8.507059e+37  ;;  %v8288_v50 = vld [vmem:[%s8832_s7 + $0x30] sm:$0xff]  ;;  %v4223_v17 = vld [vmem:[#allocation4 + $0x60] sm:$0xff] }
 0x6d0   : > { %v3567_v47 = vsel %vm8242_vm6, %v8179_v13, %v3563_v58  ;;  %v4184_v49 = vadd.f32 %v5167_v35, %v4183_v55  ;;  %5172 = vrcp.f32 %v8233_v30  ;;  %v4133_v9 = vand.u32 2147483647, %v8228_v15  ;;  %vm8273_vm8 = vmor %vm4171_vm3, %vm4172_vm5  ;;  %3885 = vmatpush.bf16.msra.mxu1 %v8288_v50  ;;  %v8628_v58 = vld [vmem:[%s8833_s8] sm:$0xff] }
 0x6d1   : > { %v3572_v57 = vsel %vm8193_vm15, %v3571_v59, %v3567_v47  ;;  %v4169_v39 = vmul.f32 %v5169_v28, %v4168_v20  ;;  %v4135_v56 = vand.u32 2147483648, %v8228_v15  ;;  %v4178_v41 = vor.u32 1.1754944e-38, %v4177_v0  ;;  %v4242_v47 = vpop.permute.xlu2 %4241 }
 0x6d2   : > { %3748 = vperm.xlu0 %5097, %v3572_v57   ;;  %v4188_v19 = vsel %vm8256_vm1, %v5167_v35, %v4184_v49  ;;  %5174 = vrcp.f32 %v8248_v12  ;;  %vm8278_vm10 = vcmp.eq.f32.partialorder %v4175_v40, 8.507059e+37  ;;  %vm4129_vm11 = vweird.f32 %v8228_v15  ;;  %v8326_v35 = vld [vmem:[%s8832_s7 + $0x28] sm:$0xff] }
 0x6d3   : > { %v4193_v31 = vsel %vm4190_vm7, %v4192_v24, %v4188_v19  ;;  %v4170_v61 = vadd.f32 %v5169_v28, %v4169_v39  ;;  %v8290_v3 = vpop.eup %5170  ;;  %v8293_v11 = vmul.f32 %v3261_v60, %v3190_v44  ;;  %vm3592_vm12 = vweird.f32 %v8233_v30  ;;  %v3452_v49 = vld [vmem:[#allocation3 + $0xc8] sm:$0xff]  ;;  %v4883_v60 = vld [vmem:[%s8831_s6 + $0x10] sm:$0xff] }
 0x6d4   : > { %4306 = vperm.xlu2 %5099, %v4193_v31   ;;  %v8296_v6 = vmax.f32 %v2929_v27, 1e-30  ;;  %v4125_v13 = vmul.f32 %v8290_v3, %v8228_v15  ;;  %vm8307_vm0 = vcmp.eq.f32.partialorder %v4133_v9, 8.507059e+37  ;;  %v4136_v1 = vor.u32 1.1754944e-38, %v4135_v56  ;;  %3886 = vmatpush.bf16.msra.mxu1 %v8326_v35  ;;  %v8538_v39 = vld [vmem:[%s8833_s8 + $0x10] sm:$0xff] }
 0x6d5   : > { %v4174_v42 = vsel %vm8273_vm8, %v5169_v28, %v4170_v61  ;;  %v3596_v23 = vand.u32 2147483647, %v8233_v30  ;;  %v3598_v16 = vand.u32 2147483648, %v8233_v30  ;;  %vm4130_vm4 = vweird.f32 %v8290_v3  ;;  %3366 = vmatpush.bf16.msra.mxu0 %v4883_v60  ;;  %4926 = vmatpush.bf16.msra.mxu3 %v4883_v60 }
 0x6d6   : > { %v8314_v14 = vpop.eup %5172  ;;  %v4179_v26 = vsel %vm8278_vm10, %v4178_v41, %v4174_v42  ;;  %5176 = vrcp.f32 %v8296_v6  ;;  %v4126_v32 = vsub.f32 1.0, %v4125_v13  ;;  %v3088_v5 = vand.u32 2147483647, %v8248_v12  ;;  %vm8351_vm13 = vmor %vm4129_vm11, %vm4130_vm4 }
 0x6d7   : > { %4301 = vperm.xlu1 %5098, %v4179_v26   ;;  %v3588_v59 = vmul.f32 %v8314_v14, %v8233_v30  ;;  %vm3084_vm15 = vweird.f32 %v8248_v12  ;;  %v3090_v34 = vand.u32 2147483648, %v8248_v12  ;;  %v8341_v18 = vmax.f32 %v3977_v29, 1e-30  ;;  %v8440_v29 = vld [vmem:[%s8833_s8 + $0x20] sm:$0xff] }
 0x6d8   : > { %v8337_v2 = vpop.eup %5174  ;;  %v8343_v45 = vmax.f32 %v3976_v36, 1e-30  ;;  %v4127_v7 = vmul.f32 %v8290_v3, %v4126_v32  ;;  %vm3593_vm2 = vweird.f32 %v8314_v14  ;;  %vm8355_vm9 = vcmp.eq.f32.partialorder %v3596_v23, 8.507059e+37  ;;  %v4882_v32 = vld [vmem:[%s8831_s6 + $0x8] sm:$0xff]  ;;  %3887 = vmatpush.bf16.msra.mxu1 %v8428_v4  ;;  %4410 = vmatpush.bf16.msra.mxu2 %v8440_v29 }
 0x6d9   : > { %v3589_v51 = vsub.f32 1.0, %v3588_v59  ;;  %v3080_v21 = vmul.f32 %v8337_v2, %v8248_v12  ;;  %v3599_v52 = vor.u32 1.1754944e-38, %v3598_v16  ;;  %v3074_v10 = vand.u32 2147483647, %v8296_v6  ;;  %vm8372_vm14 = vmor %vm3592_vm12, %vm3593_vm2  ;;  %v3981_v16 = vld [vmem:[#allocation3 + $0x178] sm:$0xff]  ;;  %3367 = vmatpush.bf16.msra.mxu0 %v4882_v32  ;;  %4927 = vmatpush.bf16.msra.mxu3 %v4882_v32 }
 0x6da   : > { %5178 = vrcp.f32 %v8341_v18  ;;  %v4128_v48 = vadd.f32 %v8290_v3, %v4127_v7  ;;  %vm3085_vm3 = vweird.f32 %v8337_v2  ;;  %vm8376_vm6 = vcmp.eq.f32.partialorder %v3088_v5, 8.507059e+37 }
 0x6db   : > { %v3590_v15 = vmul.f32 %v8314_v14, %v3589_v51  ;;  %v3081_v37 = vsub.f32 1.0, %v3080_v21  ;;  %v3091_v55 = vor.u32 1.1754944e-38, %v3090_v34  ;;  %v3076_v33 = vand.u32 2147483648, %v8296_v6  ;;  %vm8395_vm1 = vmor %vm3084_vm15, %vm3085_vm3  ;;  %v8479_v51 = vld [vmem:[%s8833_s8 + $0x18] sm:$0xff] }
 0x6dc   : > { %v8366_v0 = vpop.eup %5176  ;;  %5180 = vrcp.f32 %v8343_v45  ;;  %v4132_v24 = vsel %vm8351_vm13, %v8290_v3, %v4128_v48  ;;  %vm3070_vm5 = vweird.f32 %v8296_v6  ;;  %vm8400_vm7 = vcmp.eq.f32.partialorder %v3074_v10, 8.507059e+37  ;;  %v8411_v19 = vpop.permute.xlu1 %3205  ;;  %4411 = vmatpush.bf16.msra.mxu2 %v8479_v51 }
 0x6dd   : > { %v3591_v20 = vadd.f32 %v8314_v14, %v3590_v15  ;;  %v3082_v30 = vmul.f32 %v8337_v2, %v3081_v37  ;;  %v3066_v40 = vmul.f32 %v8366_v0, %v8296_v6  ;;  %v4137_v57 = vsel %vm8307_vm0, %v4136_v1, %v4132_v24  ;;  %v8420_v8 = vpop.permute.xlu0 %3195  ;;  %v2931_v1 = vld [vmem:[#allocation3 + $0x50] sm:$0xff] }
 0x6de   : > { %v8404_v56 = vmul.f32 %v4242_v47, %v4223_v17  ;;  %4286 = vperm.xlu0 %5097, %v4137_v57   ;;  %vm3071_vm8 = vweird.f32 %v8366_v0  ;;  %v3077_v31 = vor.u32 1.1754944e-38, %v3076_v33  ;;  %vm4157_vm10 = vweird.f32 %v8341_v18  ;;  %v3724_v33 = vpop.permute.xlu2 %3723  ;;  %v3980_v24 = vld [vmem:[#allocation3 + $0x170] sm:$0xff] }
 0x6df   : > { %v3595_v44 = vsel %vm8372_vm14, %v8314_v14, %v3591_v20  ;;  %v3083_v27 = vadd.f32 %v8337_v2, %v3082_v30  ;;  %v3067_v12 = vsub.f32 1.0, %v3066_v40  ;;  %v8418_v61 = vmax.f32 %v3452_v49, 1e-30  ;;  %vm8450_vm11 = vmor %vm3070_vm5, %vm3071_vm8  ;;  %v4881_v49 = vld [vmem:[%s8831_s6] sm:$0xff]  ;;  %v8533_v57 = vld [vmem:[%s8832_s7 + $0x10] sm:$0xff] }
 0x6e0   : > { %v8413_v38 = vpop.eup %5178  ;;  %v3600_v41 = vsel %vm8355_vm9, %v3599_v52, %v3595_v44  ;;  %v4161_v62 = vand.u32 2147483647, %v8341_v18  ;;  %v4163_v26 = vand.u32 2147483648, %v8341_v18  ;;  %v4147_v23 = vand.u32 2147483647, %v8343_v45  ;;  %v3701_v52 = vld [vmem:[#allocation4 + $0x130] sm:$0xff]  ;;  %3368 = vmatpush.bf16.msra.mxu0 %v4881_v49  ;;  %4928 = vmatpush.bf16.msra.mxu3 %v4881_v49 }
 0x6e1   : > { %3758 = vperm.xlu2 %5099, %v3600_v41   ;;  %v3087_v3 = vsel %vm8395_vm1, %v8337_v2, %v3083_v27  ;;  %v3068_v42 = vmul.f32 %v8366_v0, %v3067_v12  ;;  %v4153_v13 = vmul.f32 %v8413_v38, %v8341_v18  ;;  %5182 = vrcp.f32 %v8418_v61  ;;  %v8468_v2 = vld [vmem:[%s8832_s7 + $0x18] sm:$0xff]  ;;  %4412 = vmatpush.bf16.msra.mxu2 %v8538_v39 }
 0x6e2   : > { %v8442_v36 = vpop.eup %5180  ;;  %v3092_v22 = vsel %vm8376_vm6, %v3091_v55, %v3087_v3  ;;  %vm4158_vm12 = vweird.f32 %v8413_v38  ;;  %vm4143_vm0 = vweird.f32 %v8343_v45  ;;  %v4149_v34 = vand.u32 2147483648, %v8343_v45  ;;  %3888 = vmatpush.bf16.msra.mxu1 %v8468_v2  ;;  %v3454_v12 = vld [vmem:[#allocation3 + $0xd8] sm:$0xff] }
 0x6e3   : > { %3240 = vperm.xlu1 %5098, %v3092_v22   ;;  %v3069_v6 = vadd.f32 %v8366_v0, %v3068_v42  ;;  %v4154_v59 = vsub.f32 1.0, %v4153_v13  ;;  %v4139_v5 = vmul.f32 %v8442_v36, %v8343_v45  ;;  %vm4144_vm4 = vweird.f32 %v8442_v36  ;;  %vm8493_vm15 = vmor %vm4157_vm10, %vm4158_vm12 }
 0x6e4   : > { %v8473_v7 = vmax.f32 %v2931_v1, 1e-30  ;;  %v8485_v10 = vmax.f32 %v3981_v16, 1e-30  ;;  %v4164_v37 = vor.u32 1.1754944e-38, %v4163_v26  ;;  %vm8500_vm2 = vcmp.eq.f32.partialorder %v4161_v62, 8.507059e+37  ;;  %vm8509_vm13 = vmor %vm4143_vm0, %vm4144_vm4  ;;  %v8518_v20 = vpop.permute.xlu1 %3255  ;;  %4929 = vmatpush.bf16.msrb.mxu3 %v8200_v54 }
 0x6e5   : > { %v3073_v21 = vsel %vm8450_vm11, %v8366_v0, %v3069_v6  ;;  %v4155_v63 = vmul.f32 %v8413_v38, %v4154_v59  ;;  %v4140_v28 = vsub.f32 1.0, %v4139_v5  ;;  %v3610_v17 = vand.u32 2147483647, %v8418_v61  ;;  %v8547_v41 = vpop.permute.xlu0 %3200  ;;  %v8567_v1 = vld [vmem:[%s8832_s7 + $0x8] sm:$0xff]  ;;  %v3178_v5 = vld [vmem:[#allocation4 + $0xd0] sm:$0xff] }
 0x6e6   : > { %v3078_v48 = vsel %vm8400_vm7, %v3077_v31, %v3073_v21  ;;  %5184 = vrcp.f32 %v8473_v7  ;;  %vm8513_vm9 = vcmp.eq.f32.partialorder %v4147_v23, 8.507059e+37  ;;  %v4150_v40 = vor.u32 1.1754944e-38, %v4149_v34  ;;  %3889 = vmatpush.bf16.msra.mxu1 %v8533_v57  ;;  %v8581_v16 = vld [vmem:[%s8833_s8 + $0x8] sm:$0xff] }
 0x6e7   : > { %3235 = vperm.xlu0 %5097, %v3078_v48   ;;  %v4156_v0 = vadd.f32 %v8413_v38, %v4155_v63  ;;  %v4141_v18 = vmul.f32 %v8442_v36, %v4140_v28  ;;  %v8520_v30 = vpop.eup %5182  ;;  %v3612_v47 = vand.u32 2147483648, %v8418_v61  ;;  %v8523_v45 = vmul.f32 %v3724_v33, %v3701_v52  ;;  %v3453_v52 = vld [vmem:[#allocation3 + $0xd0] sm:$0xff]  ;;  %v2932_v48 = vld [vmem:[#allocation3 + $0x58] sm:$0xff]  ;;  %4413 = vmatpush.bf16.msra.mxu2 %v8581_v16 }
 0x6e8   : > { %5186 = vrcp.f32 %v8485_v10  ;;  %v3602_v27 = vmul.f32 %v8520_v30, %v8418_v61  ;;  %vm3606_vm3 = vweird.f32 %v8418_v61  ;;  %vm8551_vm14 = vcmp.eq.f32.partialorder %v3610_v17, 8.507059e+37  ;;  %4930 = vmatpush.bf16.msrb.mxu3 %v8288_v50 }
 0x6e9   : > { %v4160_v9 = vsel %vm8493_vm15, %v8413_v38, %v4156_v0  ;;  %v4142_v44 = vadd.f32 %v8442_v36, %v4141_v18  ;;  %v3102_v3 = vand.u32 2147483647, %v8473_v7  ;;  %v3104_v38 = vand.u32 2147483648, %v8473_v7  ;;  %v3177_v18 = vld [vmem:[#allocation4 + $0xb0] sm:$0xff] }
 0x6ea   : > { %v4165_v31 = vsel %vm8500_vm2, %v4164_v37, %v4160_v9  ;;  %v3603_v13 = vsub.f32 1.0, %v3602_v27  ;;  %vm3607_vm6 = vweird.f32 %v8520_v30  ;;  %v8561_v62 = vmax.f32 %v3980_v24, 1e-30  ;;  %3890 = vmatpush.bf16.msra.mxu1 %v8567_v1  ;;  %v8614_v37 = vld [vmem:[%s8832_s7] sm:$0xff] }
 0x6eb   : > { %4296 = vperm.xlu2 %5099, %v4165_v31   ;;  %v4146_v42 = vsel %vm8509_vm13, %v8442_v36, %v4142_v44  ;;  %v3613_v26 = vor.u32 1.1754944e-38, %v3612_v47  ;;  %v4217_v36 = vand.u32 2147483647, %v8485_v10  ;;  %v8574_v23 = vmax.f32 %v3454_v12, 1e-30  ;;  %vm8594_vm7 = vmor %vm3606_vm3, %vm3607_vm6  ;;  %4414 = vmatpush.bf16.msra.mxu2 %v8628_v58 }
 0x6ec   : > { %v8569_v22 = vpop.eup %5184  ;;  %v4151_v14 = vsel %vm8513_vm9, %v4150_v40, %v4146_v42  ;;  %v3604_v32 = vmul.f32 %v8520_v30, %v3603_v13  ;;  %vm3098_vm1 = vweird.f32 %v8473_v7  ;;  %vm4213_vm5 = vweird.f32 %v8485_v10  ;;  %4931 = vmatpush.bf16.msrb.mxu3 %v8326_v35  ;;  %v3189_v35 = vld [vmem:[#allocation4 + $0x148] sm:$0xff] }
 0x6ed   : > { %4291 = vperm.xlu1 %5098, %v4151_v14   ;;  %v3094_v6 = vmul.f32 %v8569_v22, %v8473_v7  ;;  %vm8598_vm8 = vcmp.eq.f32.partialorder %v3102_v3, 8.507059e+37  ;;  %v3105_v34 = vor.u32 1.1754944e-38, %v3104_v38  ;;  %v4219_v21 = vand.u32 2147483648, %v8485_v10 }
 0x6ee   : > { %v8588_v59 = vpop.eup %5186  ;;  %5188 = vrcp.f32 %v8561_v62  ;;  %v3605_v63 = vadd.f32 %v8520_v30, %v3604_v32  ;;  %vm3099_vm10 = vweird.f32 %v8569_v22  ;;  %v8609_v15 = vpop.permute.xlu1 %3718  ;;  %vm8616_vm11 = vcmp.eq.f32.partialorder %v4217_v36, 8.507059e+37  ;;  %3891 = vmatpush.bf16.msra.mxu1 %v8614_v37 }
 0x6ef   : > { %v3095_v28 = vsub.f32 1.0, %v3094_v6  ;;  %v4209_v61 = vmul.f32 %v8588_v59, %v8485_v10  ;;  %v4203_v0 = vand.u32 2147483647, %v8561_v62  ;;  %v4205_v53 = vand.u32 2147483648, %v8561_v62  ;;  %vm8641_vm0 = vmor %vm3098_vm1, %vm3099_vm10  ;;  %v8687_v6 = vpop.permute.xlu2 %4251 }
 0x6f0   : > { %5190 = vrcp.f32 %v8574_v23  ;;  %v3609_v55 = vsel %vm8594_vm7, %v8520_v30, %v3605_v63  ;;  %vm4214_vm12 = vweird.f32 %v8588_v59  ;;  %v3638_v47 = vand.u32 2147483647, %v8574_v23  ;;  %4932 = vmatpush.bf16.msrb.mxu3 %v8428_v4 }
 0x6f1   : > { %v3096_v33 = vmul.f32 %v8569_v22, %v3095_v28  ;;  %v4210_v24 = vsub.f32 1.0, %v4209_v61  ;;  %v3614_v40 = vsel %vm8551_vm14, %v3613_v26, %v3609_v55  ;;  %v8646_v49 = vmax.f32 %v3453_v52, 1e-30  ;;  %vm8658_vm4 = vmor %vm4213_vm5, %vm4214_vm12 }
 0x6f2   : > { %v8648_v30 = vmax.f32 %v2932_v48, 1e-30  ;;  %3763 = vperm.xlu0 %5097, %v3614_v40   ;;  %v4220_v27 = vor.u32 1.1754944e-38, %v4219_v21  ;;  %v8653_v12 = vmul.f32 %v8420_v8, %v3177_v18  ;;  %vm4199_vm15 = vweird.f32 %v8561_v62  ;;  %v4224_v48 = vld [vmem:[#allocation4 + $0xc8] sm:$0xff] }
 0x6f3   : > { %v3097_v9 = vadd.f32 %v8569_v22, %v3096_v33  ;;  %v4211_v44 = vmul.f32 %v8588_v59, %v4210_v24  ;;  %v4247_v7 = vpop.permute.xlu0 %4246  ;;  %vm8663_vm2 = vcmp.eq.f32.partialorder %v4203_v0, 8.507059e+37  ;;  %v3640_v38 = vand.u32 2147483648, %v8574_v23 }
 0x6f4   : > { %v5189_v31 = vpop.eup %5188  ;;  %5192 = vrcp.f32 %v8646_v49  ;;  %v4206_v13 = vor.u32 1.1754944e-38, %v4205_v53  ;;  %vm3634_vm13 = vweird.f32 %v8574_v23  ;;  %vm8679_vm9 = vcmp.eq.f32.partialorder %v3638_v47, 8.507059e+37  ;;  %4933 = vmatpush.bf16.msrb.mxu3 %v8468_v2 }
 0x6f5   : > { %v3101_v8 = vsel %vm8641_vm0, %v8569_v22, %v3097_v9  ;;  %v4212_v10 = vadd.f32 %v8588_v59, %v4211_v44  ;;  %v4195_v42 = vmul.f32 %v5189_v31, %v8561_v62  ;;  %5194 = vrcp.f32 %v8648_v30 }
 0x6f6   : > { %v5191_v14 = vpop.eup %5190  ;;  %v3106_v26 = vsel %vm8598_vm8, %v3105_v34, %v3101_v8  ;;  %vm4200_vm3 = vweird.f32 %v5189_v31  ;;  %v3700_v34 = vld [vmem:[#allocation4 + $0x80] sm:$0xff]  ;;  %v3641_v63 = vor.u32 1.1754944e-38, %v3640_v38  ;;  %vm3620_vm14 = vweird.f32 %v8646_v49 }
 0x6f7   : > { %3245 = vperm.xlu2 %5099, %v3106_v26   ;;  %v4216_v22 = vsel %vm8658_vm4, %v8588_v59, %v4212_v10  ;;  %v4196_v32 = vsub.f32 1.0, %v4195_v42  ;;  %v3630_v54 = vmul.f32 %v5191_v14, %v8574_v23  ;;  %v3624_v28 = vand.u32 2147483647, %v8646_v49  ;;  %vm8699_vm1 = vmor %vm4199_vm15, %vm4200_vm3 }
 0x6f8   : > { %v4221_v21 = vsel %vm8616_vm11, %v4220_v27, %v4216_v22  ;;  %vm3635_vm6 = vweird.f32 %v5191_v14  ;;  %v3285_v52 = vmul.f32 %v8518_v20, %v3189_v35  ;;  %v3271_v0 = vpop.permute.xlu1 %3270  ;;  %v3626_v18 = vand.u32 2147483648, %v8646_v49  ;;  %4934 = vmatpush.bf16.msrb.mxu3 %v8533_v57  ;;  %v3192_v35 = vld [vmem:[#allocation4 + $0xd8] sm:$0xff] }
 0x6f9   : > { %4316 = vperm.xlu1 %5098, %v4221_v21   ;;  %v4197_v59 = vmul.f32 %v5189_v31, %v4196_v32  ;;  %v3631_v61 = vsub.f32 1.0, %v3630_v54  ;;  %vm3112_vm5 = vweird.f32 %v8648_v30  ;;  %v3274_v4 = vmul.f32 %v8547_v41, %v3178_v5  ;;  %vm8712_vm7 = vmor %vm3634_vm13, %vm3635_vm6  ;;  %v3191_v22 = vld [vmem:[#allocation4 + $0x58] sm:$0xff]  ;;  %v3180_v32 = vld [vmem:[#allocation4 + $0x48] sm:$0xff] }
 0x6fa   : > { %v5193_v53 = vpop.eup %5192  ;;  %v3796_v55 = vmul.f32 %v8609_v15, %v3700_v34  ;;  %v3116_v40 = vand.u32 2147483647, %v8648_v30  ;;  %v3295_v41 = vpack.c.bf16 %v8293_v11, %v3285_v52  ;;  %v4320_v15 = vmul.f32 %v4247_v7, %v4224_v48  ;;  %v3179_v34 = vld [vmem:[#allocation4 + $0x10] sm:$0xff] }
 0x6fb   : > { %v4198_v33 = vadd.f32 %v5189_v31, %v4197_v59  ;;  %v3632_v20 = vmul.f32 %v5191_v14, %v3631_v61  ;;  %v3616_v24 = vmul.f32 %v5193_v53, %v8646_v49  ;;  %v5195_v50 = vpop.eup %5194  ;;  %vm3621_vm8 = vweird.f32 %v5193_v53  ;;  %v3266_v23 = vpop.permute.xlu0 %3265  ;;  %v4225_v61 = vld [vmem:[#allocation4 + $0x28] sm:$0xff] }
 0x6fc   : > { %v3289_v47 = vpack.c.bf16 %v3274_v4, %v8653_v12  ;;  %v3108_v60 = vmul.f32 %v5195_v50, %v8648_v30  ;;  %v3118_v8 = vand.u32 2147483648, %v8648_v30  ;;  %3399 = vmatmul.bf16.vlgmr.msra.gmra.mxu3 %v3295_v41  ;;  %v3812_v11 = vpack.c.bf16 %v8523_v45, %v3796_v55  ;;  %vm8734_vm11 = vmor %vm3620_vm14, %vm3621_vm8  ;;  %v4226_v30 = vld [vmem:[#allocation4 + $0x38] sm:$0xff] }
 0x6fd   : > { %v4202_v9 = vsel %vm8699_vm1, %v5189_v31, %v4198_v33  ;;  %v3633_v44 = vadd.f32 %v5191_v14, %v3632_v20  ;;  %v3617_v27 = vsub.f32 1.0, %v3616_v24  ;;  %v4335_v12 = vpack.c.bf16 %v4320_v15, %v8404_v56  ;;  %4935 = vmatpush.bf16.msrb.mxu3 %v8567_v1  ;;  %v3702_v33 = vld [vmem:[#allocation4 + $0x138] sm:$0xff]  ;;  %v3703_v20 = vld [vmem:[#allocation4 + $0x120] sm:$0xff] }
 0x6fe   : > { %v4207_v38 = vsel %vm8663_vm2, %v4206_v13, %v4202_v9  ;;  %3369 = vmatmul.bf16.vlgmr.msra.gmra.mxu0 %v3289_v47  ;;  %v3109_v31 = vsub.f32 1.0, %v3108_v60  ;;  %vm3113_vm10 = vweird.f32 %v5195_v50  ;;  %v3627_v45 = vor.u32 1.1754944e-38, %v3626_v18  ;;  %3892 = vmatmul.bf16.vlgmr.msra.gmra.mxu1 %v3812_v11  ;;  %v3729_v13 = vpop.permute.xlu2 %3728  ;;  %v4227_v15 = vld [vmem:[#allocation4 + $0xc0] sm:$0xff] }
 0x6ff   : > { %4311 = vperm.xlu0 %5097, %v4207_v38   ;;  %v3637_v2 = vsel %vm8712_vm7, %v5191_v14, %v3633_v44  ;;  %v3618_v7 = vmul.f32 %v5193_v53, %v3617_v27  ;;  %4415 = vmatmul.bf16.vlgmr.msra.gmra.mxu2 %v4335_v12  ;;  %vm3625_vm12 = vcmp.eq.f32.partialorder %v3624_v28, 8.507059e+37  ;;  %vm8741_vm0 = vmor %vm3112_vm5, %vm3113_vm10  ;;  %v3119_v49 = vor.u32 1.1754944e-38, %v3118_v8  ;;  %v3704_v8 = vld [vmem:[#allocation4 + $0xe0] sm:$0xff]  ;;  %v3182_v12 = vld [vmem:[#allocation4 + $0x128] sm:$0xff] }
 0x700   : > { %v3642_v10 = vsel %vm8679_vm9, %v3641_v63, %v3637_v2  ;;  %v3110_v42 = vmul.f32 %v5195_v50, %v3109_v31  ;;  %vm3117_vm4 = vcmp.eq.f32.partialorder %v3116_v40, 8.507059e+37  ;;  %v3211_v54 = vpop.permute.xlu1 %3210  ;;  %v3288_v63 = vmul.f32 %v3271_v0, %v3192_v35  ;;  %v3181_v11 = vld [vmem:[#allocation4 + $0x160] sm:$0xff]  ;;  %v3184_v35 = vld [vmem:[#allocation4 + $0x178] sm:$0xff] }
 0x701   : > { %3773 = vperm.xlu2 %5099, %v3642_v10   ;;  %v3619_v56 = vadd.f32 %v5193_v53, %v3618_v7  ;;  %v3287_v28 = vmul.f32 %v3266_v23, %v3191_v22  ;;  %v3276_v59 = vmul.f32 %v3211_v54, %v3180_v32  ;;  %v3275_v48 = vmul.f32 %v8411_v19, %v3179_v34  ;;  %v3183_v22 = vld [vmem:[#allocation4 + $0x40] sm:$0xff]  ;;  %v4229_v34 = vld [vmem:[#allocation4 + $0x98] sm:$0xff] }
 0x702   : > { %v3111_v36 = vadd.f32 %v5195_v50, %v3110_v42  ;;  %4936 = vmatpush.bf16.msrb.mxu3 %v8614_v37  ;;  %v4321_v17 = vmul.f32 %v8687_v6, %v4225_v61  ;;  %v3798_v24 = vmul.f32 %v3729_v13, %v3702_v33  ;;  %v3712_v37 = vld [vmem:[#allocation4 + $0xa0] sm:$0xff]  ;;  %v3713_v6 = vld [vmem:[#allocation4 + $0x170] sm:$0xff]  ;;  %v3707_v61 = vld [vmem:[#allocation4 + $0x168] sm:$0xff] }
 0x703   : > { %v3623_v26 = vsel %vm8734_vm11, %v5193_v53, %v3619_v56  ;;  %v3296_v18 = vpack.c.bf16 %v3288_v63, %v3287_v28  ;;  %v3290_v4 = vpack.c.bf16 %v3276_v59, %v3275_v48  ;;  %v3714_v13 = vld [vmem:[#allocation4 + $0xf0] sm:$0xff]  ;;  %v3706_v48 = vld [vmem:[#allocation4 + $0xb8] sm:$0xff] }
 0x704   : > { %v3628_v5 = vsel %vm3625_vm12, %v3627_v45, %v3623_v26  ;;  %v3115_v57 = vsel %vm8741_vm0, %v5195_v50, %v3111_v36  ;;  %v4235_v33 = vld [vmem:[#allocation4 + $0x70] sm:$0xff] }
 0x705   : > { %3768 = vperm.xlu1 %5098, %v3628_v5   ;;  %v3120_v21 = vsel %vm3117_vm4, %v3119_v49, %v3115_v57  ;;  %v4230_v57 = vld [vmem:[#allocation4 + $0x8] sm:$0xff] }
 0x706   : > { %4937 = vmatpush.bf16.msra.mxu3 %v8205_v46  ;;  %v3784_v55 = vpop.permute.xlu2 %3783  ;;  %v4228_v46 = vld [vmem:[#allocation4 + $0x18] sm:$0xff] }
 0x707   : > { %3250 = vperm.xlu0 %5097, %v3120_v21   ;;  %v4257_v52 = vpop.permute.xlu0 %4256  ;;  %v3809_v9 = vmul.f32 %v3784_v55, %v3713_v6 }
 0x708   : > { %v4322_v53 = vmul.f32 %v4257_v52, %v4226_v30 }
 0x70a   : > { %v4336_v1 = vpack.c.bf16 %v4322_v53, %v4321_v17  ;;  %4938 = vmatpush.bf16.msra.mxu3 %v8301_v43 }
 0x70c   : > { %3404 = vmatmul.bf16.gmra.mxu3 %v3296_v18 }
 0x70e   : > { %3374 = vmatmul.bf16.gmra.mxu0 %v3290_v4  ;;  %v3779_v0 = vpop.permute.xlu1 %3778  ;;  %4939 = vmatpush.bf16.msra.mxu3 %v8331_v25  ;;  %v3216_v62 = vpop.permute.xlu2 %3215  ;;  %v3705_v25 = vld [vmem:[#allocation4 + $0xa8] sm:$0xff]  ;;  %v4236_v4 = vld [vmem:[#allocation4 + $0x30] sm:$0xff] }
 0x70f   : > { %4420 = vmatmul.bf16.gmra.mxu2 %v4336_v1  ;;  %v3808_v47 = vmul.f32 %v3779_v0, %v3712_v37  ;;  %v3277_v10 = vmul.f32 %v3216_v62, %v3181_v11  ;;  %v4232_v37 = vld [vmem:[#allocation4 + $0x78] sm:$0xff] }
 0x711   : > { %v3734_v19 = vpop.permute.xlu0 %3733  ;;  %v3818_v60 = vpack.c.bf16 %v3809_v9, %v3808_v47  ;;  %v3185_v9 = vld [vmem:[#allocation4 + $0x108] sm:$0xff] }
 0x712   : > { %v3799_v40 = vmul.f32 %v3734_v19, %v3703_v20  ;;  %4940 = vmatpush.bf16.msra.mxu3 %v8440_v29 }
 0x714   : > { %v3813_v50 = vpack.c.bf16 %v3799_v40, %v3798_v24  ;;  %v4231_v40 = vld [vmem:[#allocation4] sm:$0xff] }
 0x716   : > { %3897 = vmatmul.bf16.gmra.mxu1 %v3813_v50  ;;  %v4267_v41 = vpop.permute.xlu1 %4266  ;;  %4941 = vmatpush.bf16.msra.mxu3 %v8479_v51  ;;  %v3744_v38 = vpop.permute.xlu2 %3743 }
 0x717   : > { %v4324_v44 = vmul.f32 %v4267_v41, %v4228_v46  ;;  %v3801_v29 = vmul.f32 %v3744_v38, %v3705_v25  ;;  %v3186_v41 = vld [vmem:[#allocation4 + $0x110] sm:$0xff] }
 0x718   : > { %v4233_v25 = vld [vmem:[#allocation4 + $0x50] sm:$0xff] }
 0x719   : > { %v4262_v43 = vpop.permute.xlu0 %4261 }
 0x71a   : > { %v4323_v27 = vmul.f32 %v4262_v43, %v4227_v15  ;;  %4942 = vmatpush.bf16.msra.mxu3 %v8538_v39  ;;  %v3715_v39 = vld [vmem:[#allocation4 + $0x140] sm:$0xff] }
 0x71c   : > { %v4337_v23 = vpack.c.bf16 %v4324_v44, %v4323_v27  ;;  %3922 = vmatmul.bf16.vlgmr.msrb.gmra.mxu3 %v3818_v60 }
 0x71e   : > { %4943 = vmatpush.bf16.msra.mxu3 %v8581_v16  ;;  %v4272_v56 = vpop.permute.xlu2 %4271 }
 0x71f   : > { %4425 = vmatmul.bf16.gmra.mxu2 %v4337_v23  ;;  %v4325_v21 = vmul.f32 %v4272_v56, %v4229_v34  ;;  %v4234_v23 = vld [vmem:[#allocation4 + $0x68] sm:$0xff]  ;;  %v4238_v56 = vld [vmem:[#allocation4 + $0x150] sm:$0xff] }
 0x722   : > { %4944 = vmatpush.bf16.msra.mxu3 %v8628_v58 }
 0x724   : > { %v3739_v2 = vpop.permute.xlu1 %3738 }
 0x725   : > { %v3800_v7 = vmul.f32 %v3739_v2, %v3704_v8  ;;  %v3221_v31 = vpop.permute.xlu0 %3220 }
 0x726   : > { %v3278_v3 = vmul.f32 %v3221_v31, %v3182_v12  ;;  %v3231_v16 = vpop.permute.xlu2 %3230 }
 0x727   : > { %v3814_v45 = vpack.c.bf16 %v3801_v29, %v3800_v7  ;;  %v3280_v54 = vmul.f32 %v3231_v16, %v3184_v35  ;;  %v3708_v29 = vld [vmem:[#allocation4 + $0xe8] sm:$0xff]  ;;  %v3709_v7 = vld [vmem:[#allocation4 + $0xf8] sm:$0xff]  ;;  %v3710_v35 = vld [vmem:[#allocation4 + $0x20] sm:$0xff] }
 0x728   : > { %v3291_v51 = vpack.c.bf16 %v3278_v3, %v3277_v10 }
 0x729   : > { %3902 = vmatmul.bf16.gmra.mxu1 %v3814_v45 }
 0x72a   : > { %3379 = vmatmul.bf16.gmra.mxu0 %v3291_v51 }
 0x72c   : > { %v3794_v42 = vpop.permute.xlu1 %3793 }
 0x72d   : > { %v3811_v14 = vmul.f32 %v3794_v42, %v3715_v39  ;;  %v3789_v49 = vpop.permute.xlu0 %3788  ;;  %v4237_v42 = vld [vmem:[#allocation4 + $0x158] sm:$0xff] }
 0x72e   : > { %v3810_v26 = vmul.f32 %v3789_v49, %v3714_v13  ;;  %v4282_v28 = vpop.permute.xlu2 %4281 }
 0x72f   : > { %v4327_v6 = vmul.f32 %v4282_v28, %v4231_v40 }
 0x730   : > { %v3819_v36 = vpack.c.bf16 %v3811_v14, %v3810_v26 }
 0x732   : > { %3927 = vmatmul.bf16.gmra.mxu3 %v3819_v36  ;;  %v3711_v36 = vld [vmem:[#allocation4 + $0x88] sm:$0xff] }
 0x736   : > { %v4307_v55 = vpop.permute.xlu2 %4306 }
 0x737   : > { %v3226_v32 = vpop.permute.xlu1 %3225  ;;  %v4332_v20 = vmul.f32 %v4307_v55, %v4236_v4 }
 0x738   : > { %v3279_v5 = vmul.f32 %v3226_v32, %v3183_v22  ;;  %v3187_v22 = vld [vmem:[#allocation4 + $0x90] sm:$0xff] }
 0x73a   : > { %v3292_v58 = vpack.c.bf16 %v3280_v54, %v3279_v5  ;;  %v3188_v54 = vld [vmem:[#allocation4 + $0x118] sm:$0xff] }
 0x73b   : > { %v4277_v30 = vpop.permute.xlu0 %4276 }
 0x73c   : > { %v4326_v63 = vmul.f32 %v4277_v30, %v4230_v57  ;;  %3384 = vmatmul.bf16.gmra.mxu0 %v3292_v58 }
 0x73e   : > { %v4338_v59 = vpack.c.bf16 %v4326_v63, %v4325_v21  ;;  %v3759_v46 = vpop.permute.xlu2 %3758 }
 0x73f   : > { %v3804_v10 = vmul.f32 %v3759_v46, %v3708_v29  ;;  %v2908_v29 = vld [vmem:[%s5463_s10 + $0x18] sm:$0xff] }
 0x740   : > { %4430 = vmatmul.bf16.gmra.mxu2 %v4338_v59 }
 0x741   : > { %v3754_v52 = vpop.permute.xlu1 %3753 }
 0x742   : > { %v3803_v53 = vmul.f32 %v3754_v52, %v3707_v61 }
 0x744   : > { %v3749_v17 = vpop.permute.xlu0 %3748 }
 0x745   : > { %v3802_v18 = vmul.f32 %v3749_v17, %v3706_v48 }
 0x746   : > { %v4297_v38 = vpop.permute.xlu2 %4296 }
 0x747   : > { %v3815_v1 = vpack.c.bf16 %v3803_v53, %v3802_v18  ;;  %v4330_v11 = vmul.f32 %v4297_v38, %v4234_v23  ;;  %v2905_v53 = vld [vmem:[%s5463_s10] sm:$0xff] }
 0x749   : > { %3907 = vmatmul.bf16.gmra.mxu1 %v3815_v1  ;;  %v4302_v0 = vpop.permute.xlu1 %4301 }
 0x74a   : > { %v4331_v19 = vmul.f32 %v4302_v0, %v4235_v33 }
 0x74c   : > { %v4341_v24 = vpack.c.bf16 %v4332_v20, %v4331_v19 }
 0x74e   : > { %4445 = vmatmul.bf16.vlgmr.msra.gmra.mxu3 %v4341_v24  ;;  %v2906_v24 = vld [vmem:[%s5463_s10 + $0x8] sm:$0xff] }
 0x750   : > { %v4287_v50 = vpop.permute.xlu0 %4286 }
 0x751   : > { %v4328_v62 = vmul.f32 %v4287_v50, %v4232_v37  ;;  %v3246_v51 = vpop.permute.xlu2 %3245 }
 0x752   : > { %v3283_v58 = vmul.f32 %v3246_v51, %v3187_v22 }
 0x753   : > { %v4339_v47 = vpack.c.bf16 %v4328_v62, %v4327_v6 }
 0x755   : > { %v3241_v15 = vpop.permute.xlu1 %3240  ;;  %4435 = vmatmul.bf16.gmra.mxu2 %v4339_v47 }
 0x756   : > { %v3282_v44 = vmul.f32 %v3241_v15, %v3186_v41 }
 0x759   : > { %v3236_v43 = vpop.permute.xlu0 %3235 }
 0x75a   : > { %v3281_v27 = vmul.f32 %v3236_v43, %v3185_v9  ;;  %v2907_v43 = vld [vmem:[%s5463_s10 + $0x10] sm:$0xff] }
 0x75b   : > { %v3774_v16 = vpop.permute.xlu2 %3773 }
 0x75c   : > { %v3293_v60 = vpack.c.bf16 %v3282_v44, %v3281_v27  ;;  %v3807_v5 = vmul.f32 %v3774_v16, %v3711_v36 }
 0x75e   : > { %3389 = vmatmul.bf16.gmra.mxu0 %v3293_v60 }
 0x75f   : > { %v4292_v8 = vpop.permute.xlu1 %4291 }
 0x760   : > { %v4329_v12 = vmul.f32 %v4292_v8, %v4233_v25 }
 0x762   : > { %v4340_v2 = vpack.c.bf16 %v4330_v11, %v4329_v12 }
 0x764   : > { %v3764_v31 = vpop.permute.xlu0 %3763 }
 0x765   : > { %v3805_v3 = vmul.f32 %v3764_v31, %v3709_v7  ;;  %4440 = vmatmul.bf16.gmra.mxu2 %v4340_v2 }
 0x767   : > { %v3816_v45 = vpack.c.bf16 %v3805_v3, %v3804_v10 }
 0x769   : > { %3912 = vmatmul.bf16.gmra.mxu1 %v3816_v45 }
 0x76b   : > { %v4317_v39 = vpop.permute.xlu1 %4316 }
 0x76c   : > { %v4334_v13 = vmul.f32 %v4317_v39, %v4238_v56 }
 0x771   : > { %v4312_v14 = vpop.permute.xlu0 %4311 }
 0x772   : > { %v4333_v49 = vmul.f32 %v4312_v14, %v4237_v42 }
 0x774   : > { %v4342_v26 = vpack.c.bf16 %v4334_v13, %v4333_v49  ;;  %v2909_v13 = vld [vmem:[%s5463_s10 + $0x20] sm:$0xff] }
 0x776   : > { %4450 = vmatmul.bf16.gmra.mxu3 %v4342_v26 }
 0x777   : > { %v3769_v32 = vpop.permute.xlu1 %3768 }
 0x778   : > { %v3806_v34 = vmul.f32 %v3769_v32, %v3710_v35 }
 0x779   : > { %v3251_v57 = vpop.permute.xlu0 %3250 }
 0x77a   : > { %v3284_v30 = vmul.f32 %v3251_v57, %v3188_v54  ;;  %v3817_v21 = vpack.c.bf16 %v3807_v5, %v3806_v34  ;;  %v2910_v34 = vld [vmem:[%s5463_s10 + $0x28] sm:$0xff] }
 0x77b   : > { %v3370_v63 = vpop.f32.mrf.mxu0  ;;  %v3893_v59 = vpop.f32.mrf.mxu1 }
 0x77c   : > { %v3294_v28 = vpack.c.bf16 %v3284_v30, %v3283_v58  ;;  %3917 = vmatmul.bf16.gmra.mxu1 %v3817_v21  ;;  %5196 = vtanh.f32 %v3370_v63 }
 0x77d   : > { %5198 = vtanh.f32 %v3893_v59 }
 0x77e   : > { %3394 = vmatmul.bf16.gmra.mxu0 %v3294_v28 }
 0x77f   : > { %v8762_v17 = vpop.f32.mrf.mxu3 }
 0x782   : > { %v4416_v52 = vpop.f32.mrf.mxu2  ;;  %v5197_v48 = vpop.eup %5196 }
 0x783   : > { %v3372_v61 = vpop.f32.mrf.mxu0  ;;  %5200 = vtanh.f32 %v4416_v52  ;;  %v3895_v18 = vpop.f32.mrf.mxu1  ;;  %v3426_v55 = vadd.f32 %v5197_v48, %v2905_v53 }
 0x784   : > { %5202 = vtanh.f32 %v3372_v61  ;;  %v5199_v4 = vpop.eup %5198 }
 0x785   : > { %5204 = vtanh.f32 %v3895_v18  ;;  %v3949_v1 = vadd.f32 %v5199_v4, %v3426_v55  ;;  %v2911_v55 = vld [vmem:[%s5463_s10 + $0x30] sm:$0xff] }
 0x787   : > { %v8766_v6 = vpop.f32.mrf.mxu3 }
 0x789   : > { %v5201_v33 = vpop.eup %5200 }
 0x78a   : > { %v4418_v0 = vpop.f32.mrf.mxu2  ;;  %v5203_v19 = vpop.eup %5202  ;;  %v4472_v40 = vadd.f32 %v5201_v33, %v3949_v1 }
 0x78b   : > { %v3375_v20 = vpop.f32.mrf.mxu0  ;;  %5206 = vtanh.f32 %v4418_v0  ;;  %v5205_v37 = vpop.eup %5204  ;;  %v3427_v50 = vadd.f32 %v5203_v19, %v2906_v24 }
 0x78c   : > { %4488 = vst [vmem:[%s5471_s21] sm:$0xff] %v4472_v40  ;;  %5208 = vtanh.f32 %v3375_v20 }
 0x78d   : > { %v3950_v62 = vadd.f32 %v5205_v37, %v3427_v50 }
 0x78f   : > { %v8770_v23 = vpop.f32.mrf.mxu3 }
 0x791   : > { %v5207_v46 = vpop.eup %5206 }
 0x792   : > { %v4473_v41 = vadd.f32 %v5207_v46, %v3950_v62  ;;  %v4421_v15 = vpop.f32.mrf.mxu2  ;;  %v5209_v44 = vpop.eup %5208  ;;  %v2912_v62 = vld [vmem:[%s5463_s10 + $0x38] sm:$0xff] }
 0x793   : > { %v3898_v47 = vpop.f32.mrf.mxu1  ;;  %v3377_v9 = vpop.f32.mrf.mxu0  ;;  %v3428_v27 = vadd.f32 %v5209_v44, %v2907_v43 }
 0x794   : > { %5210 = vtanh.f32 %v3898_v47  ;;  %4489 = vst [vmem:[%s5471_s21 + $0x8] sm:$0xff] %v4473_v41  ;;  %v2917_v41 = vld [vmem:[%s5463_s10 + $0x60] sm:$0xff] }
 0x795   : > { %5212 = vtanh.f32 %v4421_v15 }
 0x796   : > { %5214 = vtanh.f32 %v3377_v9 }
 0x797   : > { %v8774_v45 = vpop.f32.mrf.mxu3 }
 0x79a   : > { %v5211_v60 = vpop.eup %5210  ;;  %v4423_v11 = vpop.f32.mrf.mxu2 }
 0x79b   : > { %v3951_v38 = vadd.f32 %v5211_v60, %v3428_v27  ;;  %v3900_v25 = vpop.f32.mrf.mxu1  ;;  %v5213_v8 = vpop.eup %5212 }
 0x79c   : > { %5216 = vtanh.f32 %v3900_v25  ;;  %v5215_v2 = vpop.eup %5214 }
 0x79d   : > { %v4474_v12 = vadd.f32 %v5213_v8, %v3951_v38  ;;  %5218 = vtanh.f32 %v4423_v11  ;;  %v3429_v7 = vadd.f32 %v5215_v2, %v2908_v29  ;;  %v2918_v2 = vld [vmem:[%s5463_s10 + $0x68] sm:$0xff] }
 0x79f   : > { %4490 = vst [vmem:[%s5471_s21 + $0x10] sm:$0xff] %v4474_v12  ;;  %v3923_v49 = vpop.f32.mrf.mxu3 }
 0x7a2   : > { %v5217_v31 = vpop.eup %5216  ;;  %v4426_v39 = vpop.f32.mrf.mxu2 }
 0x7a3   : > { %v3952_v10 = vadd.f32 %v5217_v31, %v3429_v7  ;;  %v5219_v3 = vpop.eup %5218 }
 0x7a5   : > { %v4475_v51 = vadd.f32 %v5219_v3, %v3952_v10 }
 0x7a6   : > { %v3903_v56 = vpop.f32.mrf.mxu1 }
 0x7a7   : > { %4491 = vst [vmem:[%s5471_s21 + $0x18] sm:$0xff] %v4475_v51  ;;  %v3380_v42 = vpop.f32.mrf.mxu0  ;;  %v3925_v21 = vpop.f32.mrf.mxu3 }
 0x7a8   : > { %5220 = vtanh.f32 %v3380_v42 }
 0x7a9   : > { %5222 = vtanh.f32 %v3903_v56 }
 0x7aa   : > { %5224 = vtanh.f32 %v4426_v39  ;;  %v4428_v32 = vpop.f32.mrf.mxu2 }
 0x7ae   : > { %v5221_v14 = vpop.eup %5220  ;;  %v3905_v16 = vpop.f32.mrf.mxu1 }
 0x7af   : > { %v3430_v26 = vadd.f32 %v5221_v14, %v2909_v13  ;;  %v3382_v36 = vpop.f32.mrf.mxu0  ;;  %v5223_v35 = vpop.eup %5222  ;;  %v2913_v13 = vld [vmem:[%s5463_s10 + $0x40] sm:$0xff] }
 0x7b0   : > { %5226 = vtanh.f32 %v3382_v36  ;;  %v5225_v54 = vpop.eup %5224 }
 0x7b1   : > { %v3953_v22 = vadd.f32 %v5223_v35, %v3430_v26  ;;  %5228 = vtanh.f32 %v3905_v16 }
 0x7b2   : > { %5230 = vtanh.f32 %v4428_v32 }
 0x7b3   : > { %v4476_v5 = vadd.f32 %v5225_v54, %v3953_v22  ;;  %v2914_v54 = vld [vmem:[%s5463_s10 + $0x48] sm:$0xff] }
 0x7b5   : > { %4492 = vst [vmem:[%s5471_s21 + $0x20] sm:$0xff] %v4476_v5  ;;  %v8781_v52 = vpop.f32.mrf.mxu3 }
 0x7b6   : > { %v5227_v57 = vpop.eup %5226 }
 0x7b7   : > { %v3431_v58 = vadd.f32 %v5227_v57, %v2910_v34  ;;  %v5229_v30 = vpop.eup %5228 }
 0x7b8   : > { %v5231_v28 = vpop.eup %5230 }
 0x7b9   : > { %v3954_v63 = vadd.f32 %v5229_v30, %v3431_v58  ;;  %v3385_v61 = vpop.f32.mrf.mxu0 }
 0x7ba   : > { %5232 = vtanh.f32 %v3385_v61 }
 0x7bb   : > { %v4477_v59 = vadd.f32 %v5231_v28, %v3954_v63 }
 0x7bd   : > { %4493 = vst [vmem:[%s5471_s21 + $0x28] sm:$0xff] %v4477_v59  ;;  %v8784_v1 = vpop.f32.mrf.mxu3  ;;  %v2919_v59 = vld [vmem:[%s5463_s10 + $0x70] sm:$0xff] }
 0x7c0   : > { %v5233_v4 = vpop.eup %5232 }
 0x7c1   : > { %v3387_v18 = vpop.f32.mrf.mxu0  ;;  %v3432_v33 = vadd.f32 %v5233_v4, %v2911_v55  ;;  %v2915_v4 = vld [vmem:[%s5463_s10 + $0x50] sm:$0xff] }
 0x7c3   : > { %v4431_v48 = vpop.f32.mrf.mxu2 }
 0x7c6   : > { %v3908_v53 = vpop.f32.mrf.mxu1 }
 0x7c7   : > { %5234 = vtanh.f32 %v3908_v53 }
 0x7c8   : > { %5236 = vtanh.f32 %v4431_v48 }
 0x7c9   : > { %5238 = vtanh.f32 %v3387_v18 }
 0x7ca   : > { %5240 = vtanh.f32 %v8762_v17 }
 0x7cb   : > { %5242 = vtanh.f32 %v3923_v49  ;;  %v4433_v19 = vpop.f32.mrf.mxu2 }
 0x7cd   : > { %v5235_v0 = vpop.eup %5234 }
 0x7ce   : > { %v3955_v20 = vadd.f32 %v5235_v0, %v3432_v33  ;;  %v3910_v24 = vpop.f32.mrf.mxu1  ;;  %v5237_v40 = vpop.eup %5236 }
 0x7cf   : > { %5244 = vtanh.f32 %v3910_v24  ;;  %v5239_v50 = vpop.eup %5238 }
 0x7d0   : > { %v4478_v37 = vadd.f32 %v5237_v40, %v3955_v20  ;;  %5246 = vtanh.f32 %v4433_v19  ;;  %v5241_v47 = vpop.eup %5240  ;;  %v3433_v15 = vadd.f32 %v5239_v50, %v2912_v62 }
 0x7d1   : > { %v4446_v46 = vpop.f32.mrf.mxu3  ;;  %v5243_v17 = vpop.eup %5242  ;;  %v3438_v44 = vadd.f32 %v5241_v47, %v2917_v41 }
 0x7d2   : > { %4494 = vst [vmem:[%s5471_s21 + $0x30] sm:$0xff] %v4478_v37  ;;  %5248 = vtanh.f32 %v4446_v46 }
 0x7d3   : > { %5250 = vtanh.f32 %v8766_v6  ;;  %v3961_v60 = vadd.f32 %v5243_v17, %v3438_v44 }
 0x7d4   : > { %5252 = vtanh.f32 %v3925_v21 }
 0x7d5   : > { %v5245_v9 = vpop.eup %5244 }
 0x7d6   : > { %v3956_v43 = vadd.f32 %v5245_v9, %v3433_v15  ;;  %v5247_v27 = vpop.eup %5246  ;;  %v2916_v9 = vld [vmem:[%s5463_s10 + $0x58] sm:$0xff] }
 0x7d8   : > { %v5249_v38 = vpop.eup %5248  ;;  %v4479_v25 = vadd.f32 %v5247_v27, %v3956_v43  ;;  %v4436_v51 = vpop.f32.mrf.mxu2 }
 0x7d9   : > { %v4484_v8 = vadd.f32 %v5249_v38, %v3961_v60  ;;  %v4448_v11 = vpop.f32.mrf.mxu3  ;;  %v5251_v12 = vpop.eup %5250 }
 0x7da   : > { %4495 = vst [vmem:[%s5471_s21 + $0x38] sm:$0xff] %v4479_v25  ;;  %5254 = vtanh.f32 %v4448_v11  ;;  %v5253_v29 = vpop.eup %5252  ;;  %v3439_v7 = vadd.f32 %v5251_v12, %v2918_v2 }
 0x7db   : > { %4500 = vst [vmem:[%s5471_s21 + $0x60] sm:$0xff] %v4484_v8  ;;  %v3390_v31 = vpop.f32.mrf.mxu0 }
 0x7dc   : > { %v3962_v10 = vadd.f32 %v5253_v29, %v3439_v7  ;;  %5256 = vtanh.f32 %v3390_v31 }
 0x7e0   : > { %v5255_v6 = vpop.eup %5254  ;;  %v4438_v26 = vpop.f32.mrf.mxu2 }
 0x7e1   : > { %v4485_v3 = vadd.f32 %v5255_v6, %v3962_v10 }
 0x7e2   : > { %v5257_v42 = vpop.eup %5256 }
 0x7e3   : > { %4501 = vst [vmem:[%s5471_s21 + $0x68] sm:$0xff] %v4485_v3  ;;  %v3392_v39 = vpop.f32.mrf.mxu0  ;;  %v3434_v14 = vadd.f32 %v5257_v42, %v2913_v13 }
 0x7e6   : > { %v3913_v56 = vpop.f32.mrf.mxu1 }
 0x7e7   : > { %5258 = vtanh.f32 %v3913_v56 }
 0x7e8   : > { %5260 = vtanh.f32 %v4436_v51  ;;  %v4441_v61 = vpop.f32.mrf.mxu2 }
 0x7e9   : > { %5262 = vtanh.f32 %v3392_v39 }
 0x7ed   : > { %v5259_v49 = vpop.eup %5258 }
 0x7ee   : > { %v3957_v36 = vadd.f32 %v5259_v49, %v3434_v14  ;;  %v3915_v16 = vpop.f32.mrf.mxu1  ;;  %v5261_v35 = vpop.eup %5260 }
 0x7ef   : > { %5264 = vtanh.f32 %v3915_v16  ;;  %v5263_v32 = vpop.eup %5262 }
 0x7f0   : > { %v4480_v22 = vadd.f32 %v5261_v35, %v3957_v36  ;;  %5266 = vtanh.f32 %v4438_v26  ;;  %v3435_v5 = vadd.f32 %v5263_v32, %v2914_v54  ;;  %v4443_v62 = vpop.f32.mrf.mxu2 }
 0x7f1   : > { %5268 = vtanh.f32 %v8770_v23 }
 0x7f2   : > { %4496 = vst [vmem:[%s5471_s21 + $0x40] sm:$0xff] %v4480_v22  ;;  %5270 = vtanh.f32 %v8781_v52 }
 0x7f5   : > { %v5265_v34 = vpop.eup %5264 }
 0x7f6   : > { %v3958_v57 = vadd.f32 %v5265_v34, %v3435_v5  ;;  %v5267_v58 = vpop.eup %5266 }
 0x7f7   : > { %v5269_v28 = vpop.eup %5268 }
 0x7f8   : > { %v4481_v30 = vadd.f32 %v5267_v58, %v3958_v57  ;;  %v5271_v23 = vpop.eup %5270  ;;  %v3440_v53 = vadd.f32 %v5269_v28, %v2919_v59 }
 0x7f9   : > { %v4451_v21 = vpop.f32.mrf.mxu3  ;;  %v3918_v63 = vpop.f32.mrf.mxu1 }
 0x7fa   : > { %5272 = vtanh.f32 %v4451_v21  ;;  %4497 = vst [vmem:[%s5471_s21 + $0x48] sm:$0xff] %v4481_v30  ;;  %v3963_v52 = vadd.f32 %v5271_v23, %v3440_v53 }
 0x7fb   : > { %5274 = vtanh.f32 %v8774_v45  ;;  %v3395_v48 = vpop.f32.mrf.mxu0  ;;  %v2920_v45 = vld [vmem:[%s5463_s10 + $0x78] sm:$0xff] }
 0x7fc   : > { %5276 = vtanh.f32 %v3395_v48 }
 0x7fd   : > { %5278 = vtanh.f32 %v8784_v1 }
 0x7fe   : > { %5280 = vtanh.f32 %v3918_v63 }
 0x7ff   : > { %5282 = vtanh.f32 %v4441_v61 }
 0x800   : > { %v5273_v18 = vpop.eup %5272 }
 0x801   : > { %v5275_v55 = vpop.eup %5274  ;;  %v4486_v33 = vadd.f32 %v5273_v18, %v3963_v52  ;;  %v4453_v0 = vpop.f32.mrf.mxu3 }
 0x802   : > { %v5277_v20 = vpop.eup %5276  ;;  %5284 = vtanh.f32 %v4453_v0  ;;  %v3920_v37 = vpop.f32.mrf.mxu1  ;;  %v3441_v50 = vadd.f32 %v5275_v55, %v2920_v45 }
 0x803   : > { %v5279_v19 = vpop.eup %5278  ;;  %4502 = vst [vmem:[%s5471_s21 + $0x70] sm:$0xff] %v4486_v33  ;;  %v3436_v24 = vadd.f32 %v5277_v20, %v2915_v4  ;;  %v3397_v40 = vpop.f32.mrf.mxu0 }
 0x804   : > { %v5281_v1 = vpop.eup %5280  ;;  %5286 = vtanh.f32 %v3397_v40  ;;  %v3964_v41 = vadd.f32 %v5279_v19, %v3441_v50 }
 0x805   : > { %v3959_v46 = vadd.f32 %v5281_v1, %v3436_v24  ;;  %v5283_v47 = vpop.eup %5282  ;;  %5288 = vtanh.f32 %v3920_v37 }
 0x806   : > { %5290 = vtanh.f32 %v4443_v62 }
 0x807   : > { %v4482_v17 = vadd.f32 %v5283_v47, %v3959_v46 }
 0x808   : > { %v5285_v15 = vpop.eup %5284 }
 0x809   : > { %4498 = vst [vmem:[%s5471_s21 + $0x50] sm:$0xff] %v4482_v17  ;;  %v4487_v44 = vadd.f32 %v5285_v15, %v3964_v41 }
 0x80a   : > { %v5287_v43 = vpop.eup %5286 }
 0x80b   : > { %4503 = vst [vmem:[%s5471_s21 + $0x78] sm:$0xff] %v4487_v44  ;;  %v3437_v27 = vadd.f32 %v5287_v43, %v2916_v9  ;;  %v5289_v60 = vpop.eup %5288 }
 0x80c   : > { %v5291_v25 = vpop.eup %5290 }
 0x80d   : > { %v3960_v38 = vadd.f32 %v5289_v60, %v3437_v27 }
 0x80f   : > { %v4483_v8 = vadd.f32 %v5291_v25, %v3960_v38 }
 0x811   : > { %4499 = vst [vmem:[%s5471_s21 + $0x58] sm:$0xff] %v4483_v8 }
 0x812 PF: > { %s32_s20 = sadd.s32 1, %s5356_s20   ;;  %s9541_s17 = sld [smem:[#allocation9_spill]] }
 0x813   : > { %p29_p4 = scmp.ge.s32.totalorder %s32_s20, 11   ;;  %s9542_s18 = sld [smem:[#allocation10_spill]] }
 0x814   : > { %s9543_s19 = sld [smem:[#allocation11_spill]] }
 0x815   : > { %s9544_s0 = sld [smem:[#allocation12_spill]]  ;;  %31 = sbr.rel (!%p29_p4) target bundleno = 10 (0xa), region = 109 }

</bundles_post_ra>
